<compile_context>
chip_gen: v5e
topology: v5e:2x2
jax: 0.10.0
libtpu: 0.0.40
codegen_flags: <defaults>
</compile_context>

<pallas_src>
import jax
import jax.numpy as jnp
import numpy as np
from jax import lax
from jax.experimental import pallas as pl
from jax.experimental.pallas import tpu as pltpu

COLUMNS = ['GZ3', 'bk', 'NKTR', 'NKTD', 'GZ1', 'DGK', 'ALPS']
C_IN = len(COLUMNS)   # 7
C_MID = 10
C_OUT = 1
K = 5
PAD = 2

CP1 = 8                    # C_IN  padded to a sublane multiple
CP2 = 16                   # C_MID padded to a sublane multiple
BROWS = 8                  # bias/ones row group at the top of the im2col buffer
R1 = BROWS + K * CP1       # 48 rows read by layer 1
R2 = BROWS + K * CP2       # 88 rows read by layers 2/3
IM_ROWS = R2


def net_kernel(x_ref, w1_ref, w2_ref, w3_ref, o_ref,
               xp_ref, h1p_ref, h2p_ref, im_ref):
    # x_ref : (B, C_IN, L)    raw (unpadded) NCL input block
    # w*_ref: (C_out, R)      im2col-flattened weights, col 0 = bias, tap k at
    #                         cols [BROWS + k*CP, ...), zero-padded channels
    # o_ref : (B, C_OUT, L)   lane-dense output
    # xp/h1p/h2p : (B, C, L+2*PAD)  per-item padded activations (length halo)
    # im_ref: (IM_ROWS, B*L)  shared im2col staging buffer, items on lanes
    B = x_ref.shape[0]
    L = o_ref.shape[2]
    BL = B * L

    # ---- per-step init (scratch persists per-core; first step may see
    #      uninitialised VMEM and 0 * NaN = NaN, so always rewrite) ----------
    # bias group: row 0 = ones (multiplied by the bias column), rows 1..7 = 0.
    im_ref[pl.ds(0, 1), :] = jnp.ones((1, BL), jnp.float32)
    im_ref[pl.ds(1, BROWS - 1), :] = jnp.zeros((BROWS - 1, BL), jnp.float32)

    # zero only the 2*PAD halo lanes of the padded activation buffers.
    for ref, c in ((xp_ref, C_IN), (h1p_ref, C_MID), (h2p_ref, C_MID)):
        z = jnp.zeros((B, c, PAD), jnp.float32)
        ref[:, :, pl.ds(0, PAD)] = z
        ref[:, :, pl.ds(L + PAD, PAD)] = z

    # in-kernel "padding=2": drop this batch tile into the halo buffer.
    for b in range(B):
        xp_ref[b, :, pl.ds(PAD, L)] = x_ref[b, :, :]

    def conv(src_ref, c_in, cp, w_ref, zero_pad_rows):
        """One conv layer as a single (C_out, R) @ (R, B*L) MXU matmul."""
        rows = BROWS + K * cp
        if zero_pad_rows and cp > c_in:
            zp = jnp.zeros((cp - c_in, BL), jnp.float32)
            for k in range(K):
                im_ref[pl.ds(BROWS + k * cp + c_in, cp - c_in), :] = zp
        # im2col: row BROWS + k*cp + c, lane b*L + l  ==  src_pad[b, c, l + k]
        for k in range(K):
            for b in range(B):
                im_ref[pl.ds(BROWS + k * cp, c_in), pl.ds(b * L, L)] = \
                    src_ref[b, :, pl.ds(k, L)]
        cols = im_ref[pl.ds(0, rows), :]
        return jnp.dot(w_ref[...], cols, preferred_element_type=jnp.float32)

    # layer 1
    h1 = jnp.maximum(conv(xp_ref, C_IN, CP1, w1_ref, True), 0.0)
    for b in range(B):
        h1p_ref[b, :, pl.ds(PAD, L)] = h1[:, b * L:(b + 1) * L]

    # layer 2
    h2 = jnp.maximum(conv(h1p_ref, C_MID, CP2, w2_ref, True), 0.0)
    for b in range(B):
        h2p_ref[b, :, pl.ds(PAD, L)] = h2[:, b * L:(b + 1) * L]

    # layer 3 (pad rows are still zero from layer 2 — nothing touched them)
    y3 = jax.nn.sigmoid(conv(h2p_ref, C_MID, CP2, w3_ref, False))
    for b in range(B):
        o_ref[b, :, :] = y3[:, b * L:(b + 1) * L]


def _round_up(x, m):
    return -(-x // m) * m


def _pick_b_tile(n, max_tile=8):
    # Largest divisor of N that is <= max_tile while keeping >= 2 grid steps
    # (so both v7x TensorCores get work); falls back to 1 tile when N == 1.
    for bt in range(min(max_tile, n), 0, -1):
        if n % bt == 0 and n // bt >= 2:
            return bt
    return min(max_tile, n)


def _vmem_limit_bytes(b_tile, L):
    f32 = 4
    lp = _round_up(L + 2 * PAD, 128)
    bl = _round_up(b_tile * L, 128)
    scratch = (b_tile * _round_up(C_IN, 8) * lp
               + 2 * b_tile * _round_up(C_MID, 8) * lp
               + _round_up(IM_ROWS, 8) * bl) * f32
    io = 2 * (b_tile * _round_up(C_IN, 8) * _round_up(L, 128)
              + b_tile * _round_up(C_OUT, 8) * _round_up(L, 128)) * f32
    w = 2 * (2 * _round_up(C_MID, 8) + _round_up(C_OUT, 8)) * _round_up(R2, 128) * f32
    # 2x headroom for compiler temporaries; ceiling stays v7x-safe (64 MiB VMEM).
    return int(min(32 * 2**20, max(8 * 2**20, 2 * (scratch + io + w))))


def _flat_weight(w, b, cp):
    """PyTorch (Cout, Cin, K) conv weight -> (Cout, BROWS + K*cp) im2col weight.

    Column 0 = bias, columns 1..BROWS-1 = 0, column BROWS + k*cp + c = W[o,c,k]
    (zero for padded channels c >= Cin) — matches the in-kernel im2col rows."""
    cout, cin, k = w.shape
    wt = jnp.transpose(w, (0, 2, 1))                      # (cout, K, cin)
    wt = jnp.pad(wt, ((0, 0), (0, 0), (0, cp - cin)))     # (cout, K, cp)
    return jnp.concatenate(
        [b.reshape(cout, 1),
         jnp.zeros((cout, BROWS - 1), jnp.float32),
         wt.reshape(cout, k * cp)], axis=1).astype(jnp.float32)


def net_forward(x_ncl, params):
    """x_ncl: (N, C_IN, L) -> (N, 1, L) float32 (matches the PyTorch module)."""
    w1, b1, w2, b2, w3, b3 = params
    N, C, L = x_ncl.shape
    assert C == C_IN
    assert L % 128 == 0, "L must be a multiple of 128 (lane-dense tiles)"

    if x_ncl.dtype != jnp.float32:
        x_ncl = x_ncl.astype(jnp.float32)

    w1f = _flat_weight(w1, b1, CP1)   # (10, 48)
    w2f = _flat_weight(w2, b2, CP2)   # (10, 88)
    w3f = _flat_weight(w3, b3, CP2)   # (1, 88)

    b_tile = _pick_b_tile(N)
    grid = (N // b_tile,)

    return pl.pallas_call(
        net_kernel,
        out_shape=jax.ShapeDtypeStruct((N, C_OUT, L), jnp.float32),
        grid_spec=pltpu.PrefetchScalarGridSpec(
            num_scalar_prefetch=0,
            grid=grid,
            in_specs=[
                pl.BlockSpec((b_tile, C_IN, L), lambda n: (n, 0, 0)),
                pl.BlockSpec((C_MID, R1), lambda n: (0, 0)),
                pl.BlockSpec((C_MID, R2), lambda n: (0, 0)),
                pl.BlockSpec((C_OUT, R2), lambda n: (0, 0)),
            ],
            out_specs=pl.BlockSpec((b_tile, C_OUT, L), lambda n: (n, 0, 0)),
            scratch_shapes=[
                pltpu.VMEM((b_tile, C_IN, L + 2 * PAD), jnp.float32),
                pltpu.VMEM((b_tile, C_MID, L + 2 * PAD), jnp.float32),
                pltpu.VMEM((b_tile, C_MID, L + 2 * PAD), jnp.float32),
                pltpu.VMEM((IM_ROWS, b_tile * L), jnp.float32),
            ],
        ),
        compiler_params=pltpu.CompilerParams(
            dimension_semantics=("parallel",),            # batch axis -> 2 TCs on v7x
            vmem_limit_bytes=_vmem_limit_bytes(b_tile, L),
        ),
    )(x_ncl, w1f, w2f, w3f)


def init_params(key):
    """Deterministic PyTorch-style init: U(-1/sqrt(fan_in), 1/sqrt(fan_in))."""
    def conv_init(key, cout, cin, k):
        kw, kb = jax.random.split(key)
        bound = 1.0 / np.sqrt(cin * k)
        w = jax.random.uniform(kw, (cout, cin, k), jnp.float32, -bound, bound)
        b = jax.random.uniform(kb, (cout,), jnp.float32, -bound, bound)
        return w, b

    k1, k2, k3 = jax.random.split(key, 3)
    w1, b1 = conv_init(k1, C_MID, C_IN, K)
    w2, b2 = conv_init(k2, C_MID, C_MID, K)
    w3, b3 = conv_init(k3, C_OUT, C_MID, K)
    return w1, b1, w2, b2, w3, b3


def reference_forward(x_ncl, params):
    """Pure-JAX reference using lax.conv (NCL / OIH layouts) for validation."""
    w1, b1, w2, b2, w3, b3 = params

    def conv(x, w, b):
        y = lax.conv_general_dilated(
            x, w, window_strides=(1,), padding=[(PAD, PAD)],
            dimension_numbers=('NCH', 'OIH', 'NCH'))
        return y + b[None, :, None]

    h = jax.nn.relu(conv(x_ncl, w1, b1))
    h = jax.nn.relu(conv(h, w2, b2))
    return jax.nn.sigmoid(conv(h, w3, b3))


if __name__ == "__main__":
    key = jax.random.PRNGKey(0)
    k_x, k_p = jax.random.split(key)

    N, L = 8, 256   # small, lane-friendly (L multiple of 128); B_TILE=4, grid=2
    x = jax.random.normal(k_x, (N, C_IN, L), jnp.float32)
    params = init_params(k_p)

    out = jax.block_until_ready(net_forward(x, params))

    ref = reference_forward(x, params)
    assert out.shape == (N, C_OUT, L)
    np.testing.assert_allclose(np.asarray(out), np.asarray(ref),
                               rtol=5e-5, atol=5e-5)
    print("KERNEL_OK")
</pallas_src>

<mosaic_0001>
module attributes {stable_mosaic.version = 11 : i64} {
  func.func @net_kernel(%arg0: i32, %arg1: memref<4x7x256xf32, #tpu.memory_space<vmem>>, %arg2: memref<10x48xf32, #tpu.memory_space<vmem>>, %arg3: memref<10x88xf32, #tpu.memory_space<vmem>>, %arg4: memref<1x88xf32, #tpu.memory_space<vmem>>, %arg5: memref<4x1x256xf32, #tpu.memory_space<vmem>>, %arg6: memref<4x7x260xf32, #tpu.memory_space<vmem>>, %arg7: memref<4x10x260xf32, #tpu.memory_space<vmem>>, %arg8: memref<4x10x260xf32, #tpu.memory_space<vmem>>, %arg9: memref<88x1024xf32, #tpu.memory_space<vmem>>) attributes {dimension_semantics = [#tpu.dimension_semantics<parallel>], iteration_bounds = array<i64: 2>, scalar_prefetch = 0 : i64, scratch_operands = 4 : i64, tpu.core_type = #tpu.core_type<tc>, window_params = [{transform_indices = @transform_0, window_bounds = array<i64: 4, 7, 256>}, {pipeline_mode = #tpu.pipeline_mode<synchronous>, transform_indices = @transform_1, window_bounds = array<i64: 10, 48>}, {pipeline_mode = #tpu.pipeline_mode<synchronous>, transform_indices = @transform_2, window_bounds = array<i64: 10, 88>}, {pipeline_mode = #tpu.pipeline_mode<synchronous>, transform_indices = @transform_3, window_bounds = array<i64: 1, 88>}, {transform_indices = @transform_4, window_bounds = array<i64: 4, 1, 256>}]} {
    %cst = arith.constant 1.000000e+00 : f32
    %0 = vector.broadcast %cst : f32 to vector<1x1024xf32>
    %c0 = arith.constant 0 : index
    %c0_0 = arith.constant 0 : index
    %1 = vector.load %arg9[%c0, %c0_0] : memref<88x1024xf32, #tpu.memory_space<vmem>>, vector<1x1024xf32>
    tpu.vector_store %arg9[%c0, %c0_0], %0 {strides = array<i32>} : memref<88x1024xf32, #tpu.memory_space<vmem>>, vector<1x1024xf32>,
    %cst_1 = arith.constant 0.000000e+00 : f32
    %2 = vector.broadcast %cst_1 : f32 to vector<7x1024xf32>
    %c1 = arith.constant 1 : index
    %c0_2 = arith.constant 0 : index
    %3 = vector.load %arg9[%c1, %c0_2] : memref<88x1024xf32, #tpu.memory_space<vmem>>, vector<7x1024xf32>
    tpu.vector_store %arg9[%c1, %c0_2], %2 {strides = array<i32>} : memref<88x1024xf32, #tpu.memory_space<vmem>>, vector<7x1024xf32>,
    %cst_3 = arith.constant 0.000000e+00 : f32
    %4 = vector.broadcast %cst_3 : f32 to vector<4x7x2xf32>
    %c0_4 = arith.constant 0 : index
    %c0_5 = arith.constant 0 : index
    %c0_6 = arith.constant 0 : index
    %5 = vector.load %arg6[%c0_4, %c0_5, %c0_6] : memref<4x7x260xf32, #tpu.memory_space<vmem>>, vector<4x7x2xf32>
    tpu.vector_store %arg6[%c0_4, %c0_5, %c0_6], %4 {strides = array<i32>} : memref<4x7x260xf32, #tpu.memory_space<vmem>>, vector<4x7x2xf32>,
    %c0_7 = arith.constant 0 : index
    %c0_8 = arith.constant 0 : index
    %c258 = arith.constant 258 : index
    %6 = vector.load %arg6[%c0_7, %c0_8, %c258] : memref<4x7x260xf32, #tpu.memory_space<vmem>>, vector<4x7x2xf32>
    tpu.vector_store %arg6[%c0_7, %c0_8, %c258], %4 {strides = array<i32>} : memref<4x7x260xf32, #tpu.memory_space<vmem>>, vector<4x7x2xf32>,
    %cst_9 = arith.constant 0.000000e+00 : f32
    %7 = vector.broadcast %cst_9 : f32 to vector<4x10x2xf32>
    %c0_10 = arith.constant 0 : index
    %c0_11 = arith.constant 0 : index
    %c0_12 = arith.constant 0 : index
    %8 = vector.load %arg7[%c0_10, %c0_11, %c0_12] : memref<4x10x260xf32, #tpu.memory_space<vmem>>, vector<4x10x2xf32>
    tpu.vector_store %arg7[%c0_10, %c0_11, %c0_12], %7 {strides = array<i32>} : memref<4x10x260xf32, #tpu.memory_space<vmem>>, vector<4x10x2xf32>,
    %c0_13 = arith.constant 0 : index
    %c0_14 = arith.constant 0 : index
    %c258_15 = arith.constant 258 : index
    %9 = vector.load %arg7[%c0_13, %c0_14, %c258_15] : memref<4x10x260xf32, #tpu.memory_space<vmem>>, vector<4x10x2xf32>
    tpu.vector_store %arg7[%c0_13, %c0_14, %c258_15], %7 {strides = array<i32>} : memref<4x10x260xf32, #tpu.memory_space<vmem>>, vector<4x10x2xf32>,
    %cst_16 = arith.constant 0.000000e+00 : f32
    %10 = vector.broadcast %cst_16 : f32 to vector<4x10x2xf32>
    %c0_17 = arith.constant 0 : index
    %c0_18 = arith.constant 0 : index
    %c0_19 = arith.constant 0 : index
    %11 = vector.load %arg8[%c0_17, %c0_18, %c0_19] : memref<4x10x260xf32, #tpu.memory_space<vmem>>, vector<4x10x2xf32>
    tpu.vector_store %arg8[%c0_17, %c0_18, %c0_19], %10 {strides = array<i32>} : memref<4x10x260xf32, #tpu.memory_space<vmem>>, vector<4x10x2xf32>,
    %c0_20 = arith.constant 0 : index
    %c0_21 = arith.constant 0 : index
    %c258_22 = arith.constant 258 : index
    %12 = vector.load %arg8[%c0_20, %c0_21, %c258_22] : memref<4x10x260xf32, #tpu.memory_space<vmem>>, vector<4x10x2xf32>
    tpu.vector_store %arg8[%c0_20, %c0_21, %c258_22], %10 {strides = array<i32>} : memref<4x10x260xf32, #tpu.memory_space<vmem>>, vector<4x10x2xf32>,
    %c0_23 = arith.constant 0 : index
    %c0_24 = arith.constant 0 : index
    %c0_25 = arith.constant 0 : index
    %13 = vector.load %arg1[%c0_23, %c0_24, %c0_25] : memref<4x7x256xf32, #tpu.memory_space<vmem>>, vector<1x7x256xf32>
    %14 = vector.shape_cast %13 : vector<1x7x256xf32> to vector<7x256xf32>
    %c0_26 = arith.constant 0 : index
    %c0_27 = arith.constant 0 : index
    %c2 = arith.constant 2 : index
    %15 = vector.load %arg6[%c0_26, %c0_27, %c2] : memref<4x7x260xf32, #tpu.memory_space<vmem>>, vector<1x7x256xf32>
    %16 = vector.shape_cast %15 : vector<1x7x256xf32> to vector<7x256xf32>
    %17 = vector.shape_cast %14 : vector<7x256xf32> to vector<1x7x256xf32>
    tpu.vector_store %arg6[%c0_26, %c0_27, %c2], %17 {strides = array<i32>} : memref<4x7x260xf32, #tpu.memory_space<vmem>>, vector<1x7x256xf32>,
    %c1_28 = arith.constant 1 : index
    %c0_29 = arith.constant 0 : index
    %c0_30 = arith.constant 0 : index
    %18 = vector.load %arg1[%c1_28, %c0_29, %c0_30] : memref<4x7x256xf32, #tpu.memory_space<vmem>>, vector<1x7x256xf32>
    %19 = vector.shape_cast %18 : vector<1x7x256xf32> to vector<7x256xf32>
    %c1_31 = arith.constant 1 : index
    %c0_32 = arith.constant 0 : index
    %c2_33 = arith.constant 2 : index
    %20 = vector.load %arg6[%c1_31, %c0_32, %c2_33] : memref<4x7x260xf32, #tpu.memory_space<vmem>>, vector<1x7x256xf32>
    %21 = vector.shape_cast %20 : vector<1x7x256xf32> to vector<7x256xf32>
    %22 = vector.shape_cast %19 : vector<7x256xf32> to vector<1x7x256xf32>
    tpu.vector_store %arg6[%c1_31, %c0_32, %c2_33], %22 {strides = array<i32>} : memref<4x7x260xf32, #tpu.memory_space<vmem>>, vector<1x7x256xf32>,
    %c2_34 = arith.constant 2 : index
    %c0_35 = arith.constant 0 : index
    %c0_36 = arith.constant 0 : index
    %23 = vector.load %arg1[%c2_34, %c0_35, %c0_36] : memref<4x7x256xf32, #tpu.memory_space<vmem>>, vector<1x7x256xf32>
    %24 = vector.shape_cast %23 : vector<1x7x256xf32> to vector<7x256xf32>
    %c2_37 = arith.constant 2 : index
    %c0_38 = arith.constant 0 : index
    %c2_39 = arith.constant 2 : index
    %25 = vector.load %arg6[%c2_37, %c0_38, %c2_39] : memref<4x7x260xf32, #tpu.memory_space<vmem>>, vector<1x7x256xf32>
    %26 = vector.shape_cast %25 : vector<1x7x256xf32> to vector<7x256xf32>
    %27 = vector.shape_cast %24 : vector<7x256xf32> to vector<1x7x256xf32>
    tpu.vector_store %arg6[%c2_37, %c0_38, %c2_39], %27 {strides = array<i32>} : memref<4x7x260xf32, #tpu.memory_space<vmem>>, vector<1x7x256xf32>,
    %c3 = arith.constant 3 : index
    %c0_40 = arith.constant 0 : index
    %c0_41 = arith.constant 0 : index
    %28 = vector.load %arg1[%c3, %c0_40, %c0_41] : memref<4x7x256xf32, #tpu.memory_space<vmem>>, vector<1x7x256xf32>
    %29 = vector.shape_cast %28 : vector<1x7x256xf32> to vector<7x256xf32>
    %c3_42 = arith.constant 3 : index
    %c0_43 = arith.constant 0 : index
    %c2_44 = arith.constant 2 : index
    %30 = vector.load %arg6[%c3_42, %c0_43, %c2_44] : memref<4x7x260xf32, #tpu.memory_space<vmem>>, vector<1x7x256xf32>
    %31 = vector.shape_cast %30 : vector<1x7x256xf32> to vector<7x256xf32>
    %32 = vector.shape_cast %29 : vector<7x256xf32> to vector<1x7x256xf32>
    tpu.vector_store %arg6[%c3_42, %c0_43, %c2_44], %32 {strides = array<i32>} : memref<4x7x260xf32, #tpu.memory_space<vmem>>, vector<1x7x256xf32>,
    %cst_45 = arith.constant 0.000000e+00 : f32
    %33 = vector.broadcast %cst_45 : f32 to vector<1x1024xf32>
    %c15 = arith.constant 15 : index
    %c0_46 = arith.constant 0 : index
    %34 = vector.load %arg9[%c15, %c0_46] : memref<88x1024xf32, #tpu.memory_space<vmem>>, vector<1x1024xf32>
    tpu.vector_store %arg9[%c15, %c0_46], %33 {strides = array<i32>} : memref<88x1024xf32, #tpu.memory_space<vmem>>, vector<1x1024xf32>,
    %c23 = arith.constant 23 : index
    %c0_47 = arith.constant 0 : index
    %35 = vector.load %arg9[%c23, %c0_47] : memref<88x1024xf32, #tpu.memory_space<vmem>>, vector<1x1024xf32>
    tpu.vector_store %arg9[%c23, %c0_47], %33 {strides = array<i32>} : memref<88x1024xf32, #tpu.memory_space<vmem>>, vector<1x1024xf32>,
    %c31 = arith.constant 31 : index
    %c0_48 = arith.constant 0 : index
    %36 = vector.load %arg9[%c31, %c0_48] : memref<88x1024xf32, #tpu.memory_space<vmem>>, vector<1x1024xf32>
    tpu.vector_store %arg9[%c31, %c0_48], %33 {strides = array<i32>} : memref<88x1024xf32, #tpu.memory_space<vmem>>, vector<1x1024xf32>,
    %c39 = arith.constant 39 : index
    %c0_49 = arith.constant 0 : index
    %37 = vector.load %arg9[%c39, %c0_49] : memref<88x1024xf32, #tpu.memory_space<vmem>>, vector<1x1024xf32>
    tpu.vector_store %arg9[%c39, %c0_49], %33 {strides = array<i32>} : memref<88x1024xf32, #tpu.memory_space<vmem>>, vector<1x1024xf32>,
    %c47 = arith.constant 47 : index
    %c0_50 = arith.constant 0 : index
    %38 = vector.load %arg9[%c47, %c0_50] : memref<88x1024xf32, #tpu.memory_space<vmem>>, vector<1x1024xf32>
    tpu.vector_store %arg9[%c47, %c0_50], %33 {strides = array<i32>} : memref<88x1024xf32, #tpu.memory_space<vmem>>, vector<1x1024xf32>,
    %c0_51 = arith.constant 0 : index
    %c0_52 = arith.constant 0 : index
    %c0_53 = arith.constant 0 : index
    %39 = vector.load %arg6[%c0_51, %c0_52, %c0_53] : memref<4x7x260xf32, #tpu.memory_space<vmem>>, vector<1x7x256xf32>
    %40 = vector.shape_cast %39 : vector<1x7x256xf32> to vector<7x256xf32>
    %c8 = arith.constant 8 : index
    %c0_54 = arith.constant 0 : index
    %41 = vector.load %arg9[%c8, %c0_54] : memref<88x1024xf32, #tpu.memory_space<vmem>>, vector<7x256xf32>
    tpu.vector_store %arg9[%c8, %c0_54], %40 {strides = array<i32>} : memref<88x1024xf32, #tpu.memory_space<vmem>>, vector<7x256xf32>,
    %c1_55 = arith.constant 1 : index
    %c0_56 = arith.constant 0 : index
    %c0_57 = arith.constant 0 : index
    %42 = vector.load %arg6[%c1_55, %c0_56, %c0_57] : memref<4x7x260xf32, #tpu.memory_space<vmem>>, vector<1x7x256xf32>
    %43 = vector.shape_cast %42 : vector<1x7x256xf32> to vector<7x256xf32>
    %c8_58 = arith.constant 8 : index
    %c256 = arith.constant 256 : index
    %44 = vector.load %arg9[%c8_58, %c256] : memref<88x1024xf32, #tpu.memory_space<vmem>>, vector<7x256xf32>
    tpu.vector_store %arg9[%c8_58, %c256], %43 {strides = array<i32>} : memref<88x1024xf32, #tpu.memory_space<vmem>>, vector<7x256xf32>,
    %c2_59 = arith.constant 2 : index
    %c0_60 = arith.constant 0 : index
    %c0_61 = arith.constant 0 : index
    %45 = vector.load %arg6[%c2_59, %c0_60, %c0_61] : memref<4x7x260xf32, #tpu.memory_space<vmem>>, vector<1x7x256xf32>
    %46 = vector.shape_cast %45 : vector<1x7x256xf32> to vector<7x256xf32>
    %c8_62 = arith.constant 8 : index
    %c512 = arith.constant 512 : index
    %47 = vector.load %arg9[%c8_62, %c512] : memref<88x1024xf32, #tpu.memory_space<vmem>>, vector<7x256xf32>
    tpu.vector_store %arg9[%c8_62, %c512], %46 {strides = array<i32>} : memref<88x1024xf32, #tpu.memory_space<vmem>>, vector<7x256xf32>,
    %c3_63 = arith.constant 3 : index
    %c0_64 = arith.constant 0 : index
    %c0_65 = arith.constant 0 : index
    %48 = vector.load %arg6[%c3_63, %c0_64, %c0_65] : memref<4x7x260xf32, #tpu.memory_space<vmem>>, vector<1x7x256xf32>
    %49 = vector.shape_cast %48 : vector<1x7x256xf32> to vector<7x256xf32>
    %c8_66 = arith.constant 8 : index
    %c768 = arith.constant 768 : index
    %50 = vector.load %arg9[%c8_66, %c768] : memref<88x1024xf32, #tpu.memory_space<vmem>>, vector<7x256xf32>
    tpu.vector_store %arg9[%c8_66, %c768], %49 {strides = array<i32>} : memref<88x1024xf32, #tpu.memory_space<vmem>>, vector<7x256xf32>,
    %c0_67 = arith.constant 0 : index
    %c0_68 = arith.constant 0 : index
    %c1_69 = arith.constant 1 : index
    %51 = vector.load %arg6[%c0_67, %c0_68, %c1_69] : memref<4x7x260xf32, #tpu.memory_space<vmem>>, vector<1x7x256xf32>
    %52 = vector.shape_cast %51 : vector<1x7x256xf32> to vector<7x256xf32>
    %c16 = arith.constant 16 : index
    %c0_70 = arith.constant 0 : index
    %53 = vector.load %arg9[%c16, %c0_70] : memref<88x1024xf32, #tpu.memory_space<vmem>>, vector<7x256xf32>
    tpu.vector_store %arg9[%c16, %c0_70], %52 {strides = array<i32>} : memref<88x1024xf32, #tpu.memory_space<vmem>>, vector<7x256xf32>,
    %c1_71 = arith.constant 1 : index
    %c0_72 = arith.constant 0 : index
    %c1_73 = arith.constant 1 : index
    %54 = vector.load %arg6[%c1_71, %c0_72, %c1_73] : memref<4x7x260xf32, #tpu.memory_space<vmem>>, vector<1x7x256xf32>
    %55 = vector.shape_cast %54 : vector<1x7x256xf32> to vector<7x256xf32>
    %c16_74 = arith.constant 16 : index
    %c256_75 = arith.constant 256 : index
    %56 = vector.load %arg9[%c16_74, %c256_75] : memref<88x1024xf32, #tpu.memory_space<vmem>>, vector<7x256xf32>
    tpu.vector_store %arg9[%c16_74, %c256_75], %55 {strides = array<i32>} : memref<88x1024xf32, #tpu.memory_space<vmem>>, vector<7x256xf32>,
    %c2_76 = arith.constant 2 : index
    %c0_77 = arith.constant 0 : index
    %c1_78 = arith.constant 1 : index
    %57 = vector.load %arg6[%c2_76, %c0_77, %c1_78] : memref<4x7x260xf32, #tpu.memory_space<vmem>>, vector<1x7x256xf32>
    %58 = vector.shape_cast %57 : vector<1x7x256xf32> to vector<7x256xf32>
    %c16_79 = arith.constant 16 : index
    %c512_80 = arith.constant 512 : index
    %59 = vector.load %arg9[%c16_79, %c512_80] : memref<88x1024xf32, #tpu.memory_space<vmem>>, vector<7x256xf32>
    tpu.vector_store %arg9[%c16_79, %c512_80], %58 {strides = array<i32>} : memref<88x1024xf32, #tpu.memory_space<vmem>>, vector<7x256xf32>,
    %c3_81 = arith.constant 3 : index
    %c0_82 = arith.constant 0 : index
    %c1_83 = arith.constant 1 : index
    %60 = vector.load %arg6[%c3_81, %c0_82, %c1_83] : memref<4x7x260xf32, #tpu.memory_space<vmem>>, vector<1x7x256xf32>
    %61 = vector.shape_cast %60 : vector<1x7x256xf32> to vector<7x256xf32>
    %c16_84 = arith.constant 16 : index
    %c768_85 = arith.constant 768 : index
    %62 = vector.load %arg9[%c16_84, %c768_85] : memref<88x1024xf32, #tpu.memory_space<vmem>>, vector<7x256xf32>
    tpu.vector_store %arg9[%c16_84, %c768_85], %61 {strides = array<i32>} : memref<88x1024xf32, #tpu.memory_space<vmem>>, vector<7x256xf32>,
    %c0_86 = arith.constant 0 : index
    %c0_87 = arith.constant 0 : index
    %c2_88 = arith.constant 2 : index
    %63 = vector.load %arg6[%c0_86, %c0_87, %c2_88] : memref<4x7x260xf32, #tpu.memory_space<vmem>>, vector<1x7x256xf32>
    %64 = vector.shape_cast %63 : vector<1x7x256xf32> to vector<7x256xf32>
    %c24 = arith.constant 24 : index
    %c0_89 = arith.constant 0 : index
    %65 = vector.load %arg9[%c24, %c0_89] : memref<88x1024xf32, #tpu.memory_space<vmem>>, vector<7x256xf32>
    tpu.vector_store %arg9[%c24, %c0_89], %64 {strides = array<i32>} : memref<88x1024xf32, #tpu.memory_space<vmem>>, vector<7x256xf32>,
    %c1_90 = arith.constant 1 : index
    %c0_91 = arith.constant 0 : index
    %c2_92 = arith.constant 2 : index
    %66 = vector.load %arg6[%c1_90, %c0_91, %c2_92] : memref<4x7x260xf32, #tpu.memory_space<vmem>>, vector<1x7x256xf32>
    %67 = vector.shape_cast %66 : vector<1x7x256xf32> to vector<7x256xf32>
    %c24_93 = arith.constant 24 : index
    %c256_94 = arith.constant 256 : index
    %68 = vector.load %arg9[%c24_93, %c256_94] : memref<88x1024xf32, #tpu.memory_space<vmem>>, vector<7x256xf32>
    tpu.vector_store %arg9[%c24_93, %c256_94], %67 {strides = array<i32>} : memref<88x1024xf32, #tpu.memory_space<vmem>>, vector<7x256xf32>,
    %c2_95 = arith.constant 2 : index
    %c0_96 = arith.constant 0 : index
    %c2_97 = arith.constant 2 : index
    %69 = vector.load %arg6[%c2_95, %c0_96, %c2_97] : memref<4x7x260xf32, #tpu.memory_space<vmem>>, vector<1x7x256xf32>
    %70 = vector.shape_cast %69 : vector<1x7x256xf32> to vector<7x256xf32>
    %c24_98 = arith.constant 24 : index
    %c512_99 = arith.constant 512 : index
    %71 = vector.load %arg9[%c24_98, %c512_99] : memref<88x1024xf32, #tpu.memory_space<vmem>>, vector<7x256xf32>
    tpu.vector_store %arg9[%c24_98, %c512_99], %70 {strides = array<i32>} : memref<88x1024xf32, #tpu.memory_space<vmem>>, vector<7x256xf32>,
    %c3_100 = arith.constant 3 : index
    %c0_101 = arith.constant 0 : index
    %c2_102 = arith.constant 2 : index
    %72 = vector.load %arg6[%c3_100, %c0_101, %c2_102] : memref<4x7x260xf32, #tpu.memory_space<vmem>>, vector<1x7x256xf32>
    %73 = vector.shape_cast %72 : vector<1x7x256xf32> to vector<7x256xf32>
    %c24_103 = arith.constant 24 : index
    %c768_104 = arith.constant 768 : index
    %74 = vector.load %arg9[%c24_103, %c768_104] : memref<88x1024xf32, #tpu.memory_space<vmem>>, vector<7x256xf32>
    tpu.vector_store %arg9[%c24_103, %c768_104], %73 {strides = array<i32>} : memref<88x1024xf32, #tpu.memory_space<vmem>>, vector<7x256xf32>,
    %c0_105 = arith.constant 0 : index
    %c0_106 = arith.constant 0 : index
    %c3_107 = arith.constant 3 : index
    %75 = vector.load %arg6[%c0_105, %c0_106, %c3_107] : memref<4x7x260xf32, #tpu.memory_space<vmem>>, vector<1x7x256xf32>
    %76 = vector.shape_cast %75 : vector<1x7x256xf32> to vector<7x256xf32>
    %c32 = arith.constant 32 : index
    %c0_108 = arith.constant 0 : index
    %77 = vector.load %arg9[%c32, %c0_108] : memref<88x1024xf32, #tpu.memory_space<vmem>>, vector<7x256xf32>
    tpu.vector_store %arg9[%c32, %c0_108], %76 {strides = array<i32>} : memref<88x1024xf32, #tpu.memory_space<vmem>>, vector<7x256xf32>,
    %c1_109 = arith.constant 1 : index
    %c0_110 = arith.constant 0 : index
    %c3_111 = arith.constant 3 : index
    %78 = vector.load %arg6[%c1_109, %c0_110, %c3_111] : memref<4x7x260xf32, #tpu.memory_space<vmem>>, vector<1x7x256xf32>
    %79 = vector.shape_cast %78 : vector<1x7x256xf32> to vector<7x256xf32>
    %c32_112 = arith.constant 32 : index
    %c256_113 = arith.constant 256 : index
    %80 = vector.load %arg9[%c32_112, %c256_113] : memref<88x1024xf32, #tpu.memory_space<vmem>>, vector<7x256xf32>
    tpu.vector_store %arg9[%c32_112, %c256_113], %79 {strides = array<i32>} : memref<88x1024xf32, #tpu.memory_space<vmem>>, vector<7x256xf32>,
    %c2_114 = arith.constant 2 : index
    %c0_115 = arith.constant 0 : index
    %c3_116 = arith.constant 3 : index
    %81 = vector.load %arg6[%c2_114, %c0_115, %c3_116] : memref<4x7x260xf32, #tpu.memory_space<vmem>>, vector<1x7x256xf32>
    %82 = vector.shape_cast %81 : vector<1x7x256xf32> to vector<7x256xf32>
    %c32_117 = arith.constant 32 : index
    %c512_118 = arith.constant 512 : index
    %83 = vector.load %arg9[%c32_117, %c512_118] : memref<88x1024xf32, #tpu.memory_space<vmem>>, vector<7x256xf32>
    tpu.vector_store %arg9[%c32_117, %c512_118], %82 {strides = array<i32>} : memref<88x1024xf32, #tpu.memory_space<vmem>>, vector<7x256xf32>,
    %c3_119 = arith.constant 3 : index
    %c0_120 = arith.constant 0 : index
    %c3_121 = arith.constant 3 : index
    %84 = vector.load %arg6[%c3_119, %c0_120, %c3_121] : memref<4x7x260xf32, #tpu.memory_space<vmem>>, vector<1x7x256xf32>
    %85 = vector.shape_cast %84 : vector<1x7x256xf32> to vector<7x256xf32>
    %c32_122 = arith.constant 32 : index
    %c768_123 = arith.constant 768 : index
    %86 = vector.load %arg9[%c32_122, %c768_123] : memref<88x1024xf32, #tpu.memory_space<vmem>>, vector<7x256xf32>
    tpu.vector_store %arg9[%c32_122, %c768_123], %85 {strides = array<i32>} : memref<88x1024xf32, #tpu.memory_space<vmem>>, vector<7x256xf32>,
    %c0_124 = arith.constant 0 : index
    %c0_125 = arith.constant 0 : index
    %c4 = arith.constant 4 : index
    %87 = vector.load %arg6[%c0_124, %c0_125, %c4] : memref<4x7x260xf32, #tpu.memory_space<vmem>>, vector<1x7x256xf32>
    %88 = vector.shape_cast %87 : vector<1x7x256xf32> to vector<7x256xf32>
    %c40 = arith.constant 40 : index
    %c0_126 = arith.constant 0 : index
    %89 = vector.load %arg9[%c40, %c0_126] : memref<88x1024xf32, #tpu.memory_space<vmem>>, vector<7x256xf32>
    tpu.vector_store %arg9[%c40, %c0_126], %88 {strides = array<i32>} : memref<88x1024xf32, #tpu.memory_space<vmem>>, vector<7x256xf32>,
    %c1_127 = arith.constant 1 : index
    %c0_128 = arith.constant 0 : index
    %c4_129 = arith.constant 4 : index
    %90 = vector.load %arg6[%c1_127, %c0_128, %c4_129] : memref<4x7x260xf32, #tpu.memory_space<vmem>>, vector<1x7x256xf32>
    %91 = vector.shape_cast %90 : vector<1x7x256xf32> to vector<7x256xf32>
    %c40_130 = arith.constant 40 : index
    %c256_131 = arith.constant 256 : index
    %92 = vector.load %arg9[%c40_130, %c256_131] : memref<88x1024xf32, #tpu.memory_space<vmem>>, vector<7x256xf32>
    tpu.vector_store %arg9[%c40_130, %c256_131], %91 {strides = array<i32>} : memref<88x1024xf32, #tpu.memory_space<vmem>>, vector<7x256xf32>,
    %c2_132 = arith.constant 2 : index
    %c0_133 = arith.constant 0 : index
    %c4_134 = arith.constant 4 : index
    %93 = vector.load %arg6[%c2_132, %c0_133, %c4_134] : memref<4x7x260xf32, #tpu.memory_space<vmem>>, vector<1x7x256xf32>
    %94 = vector.shape_cast %93 : vector<1x7x256xf32> to vector<7x256xf32>
    %c40_135 = arith.constant 40 : index
    %c512_136 = arith.constant 512 : index
    %95 = vector.load %arg9[%c40_135, %c512_136] : memref<88x1024xf32, #tpu.memory_space<vmem>>, vector<7x256xf32>
    tpu.vector_store %arg9[%c40_135, %c512_136], %94 {strides = array<i32>} : memref<88x1024xf32, #tpu.memory_space<vmem>>, vector<7x256xf32>,
    %c3_137 = arith.constant 3 : index
    %c0_138 = arith.constant 0 : index
    %c4_139 = arith.constant 4 : index
    %96 = vector.load %arg6[%c3_137, %c0_138, %c4_139] : memref<4x7x260xf32, #tpu.memory_space<vmem>>, vector<1x7x256xf32>
    %97 = vector.shape_cast %96 : vector<1x7x256xf32> to vector<7x256xf32>
    %c40_140 = arith.constant 40 : index
    %c768_141 = arith.constant 768 : index
    %98 = vector.load %arg9[%c40_140, %c768_141] : memref<88x1024xf32, #tpu.memory_space<vmem>>, vector<7x256xf32>
    tpu.vector_store %arg9[%c40_140, %c768_141], %97 {strides = array<i32>} : memref<88x1024xf32, #tpu.memory_space<vmem>>, vector<7x256xf32>,
    %c0_142 = arith.constant 0 : index
    %c0_143 = arith.constant 0 : index
    %99 = vector.load %arg9[%c0_142, %c0_143] : memref<88x1024xf32, #tpu.memory_space<vmem>>, vector<48x1024xf32>
    %c0_144 = arith.constant 0 : index
    %c0_145 = arith.constant 0 : index
    %100 = vector.load %arg2[%c0_144, %c0_145] : memref<10x48xf32, #tpu.memory_space<vmem>>, vector<10x48xf32>
    %cst_146 = arith.constant dense<0.000000e+00> : vector<10x1024xf32>
    %101 = tpu.matmul %100, %99, %cst_146 {dimension_numbers = #tpu.dot_dimension_numbers<[1], [0], [0], [1], [0, 0, 1, 1], [], []>} : vector<10x48xf32>, vector<48x1024xf32>, vector<10x1024xf32> -> vector<10x1024xf32>
    %cst_147 = arith.constant 0.000000e+00 : f32
    %102 = vector.broadcast %cst_147 : f32 to vector<10x1024xf32>
    %103 = arith.maximumf %101, %102 : vector<10x1024xf32>
    %104 = vector.extract_strided_slice %103 {offsets = [0, 0], sizes = [10, 256], strides = [1, 1]} : vector<10x1024xf32> to vector<10x256xf32>
    %c0_148 = arith.constant 0 : index
    %c0_149 = arith.constant 0 : index
    %c2_150 = arith.constant 2 : index
    %105 = vector.load %arg7[%c0_148, %c0_149, %c2_150] : memref<4x10x260xf32, #tpu.memory_space<vmem>>, vector<1x10x256xf32>
    %106 = vector.shape_cast %105 : vector<1x10x256xf32> to vector<10x256xf32>
    %107 = vector.shape_cast %104 : vector<10x256xf32> to vector<1x10x256xf32>
    tpu.vector_store %arg7[%c0_148, %c0_149, %c2_150], %107 {strides = array<i32>} : memref<4x10x260xf32, #tpu.memory_space<vmem>>, vector<1x10x256xf32>,
    %108 = vector.extract_strided_slice %103 {offsets = [0, 256], sizes = [10, 256], strides = [1, 1]} : vector<10x1024xf32> to vector<10x256xf32>
    %c1_151 = arith.constant 1 : index
    %c0_152 = arith.constant 0 : index
    %c2_153 = arith.constant 2 : index
    %109 = vector.load %arg7[%c1_151, %c0_152, %c2_153] : memref<4x10x260xf32, #tpu.memory_space<vmem>>, vector<1x10x256xf32>
    %110 = vector.shape_cast %109 : vector<1x10x256xf32> to vector<10x256xf32>
    %111 = vector.shape_cast %108 : vector<10x256xf32> to vector<1x10x256xf32>
    tpu.vector_store %arg7[%c1_151, %c0_152, %c2_153], %111 {strides = array<i32>} : memref<4x10x260xf32, #tpu.memory_space<vmem>>, vector<1x10x256xf32>,
    %112 = vector.extract_strided_slice %103 {offsets = [0, 512], sizes = [10, 256], strides = [1, 1]} : vector<10x1024xf32> to vector<10x256xf32>
    %c2_154 = arith.constant 2 : index
    %c0_155 = arith.constant 0 : index
    %c2_156 = arith.constant 2 : index
    %113 = vector.load %arg7[%c2_154, %c0_155, %c2_156] : memref<4x10x260xf32, #tpu.memory_space<vmem>>, vector<1x10x256xf32>
    %114 = vector.shape_cast %113 : vector<1x10x256xf32> to vector<10x256xf32>
    %115 = vector.shape_cast %112 : vector<10x256xf32> to vector<1x10x256xf32>
    tpu.vector_store %arg7[%c2_154, %c0_155, %c2_156], %115 {strides = array<i32>} : memref<4x10x260xf32, #tpu.memory_space<vmem>>, vector<1x10x256xf32>,
    %116 = vector.extract_strided_slice %103 {offsets = [0, 768], sizes = [10, 256], strides = [1, 1]} : vector<10x1024xf32> to vector<10x256xf32>
    %c3_157 = arith.constant 3 : index
    %c0_158 = arith.constant 0 : index
    %c2_159 = arith.constant 2 : index
    %117 = vector.load %arg7[%c3_157, %c0_158, %c2_159] : memref<4x10x260xf32, #tpu.memory_space<vmem>>, vector<1x10x256xf32>
    %118 = vector.shape_cast %117 : vector<1x10x256xf32> to vector<10x256xf32>
    %119 = vector.shape_cast %116 : vector<10x256xf32> to vector<1x10x256xf32>
    tpu.vector_store %arg7[%c3_157, %c0_158, %c2_159], %119 {strides = array<i32>} : memref<4x10x260xf32, #tpu.memory_space<vmem>>, vector<1x10x256xf32>,
    %cst_160 = arith.constant 0.000000e+00 : f32
    %120 = vector.broadcast %cst_160 : f32 to vector<6x1024xf32>
    %c18 = arith.constant 18 : index
    %c0_161 = arith.constant 0 : index
    %121 = vector.load %arg9[%c18, %c0_161] : memref<88x1024xf32, #tpu.memory_space<vmem>>, vector<6x1024xf32>
    tpu.vector_store %arg9[%c18, %c0_161], %120 {strides = array<i32>} : memref<88x1024xf32, #tpu.memory_space<vmem>>, vector<6x1024xf32>,
    %c34 = arith.constant 34 : index
    %c0_162 = arith.constant 0 : index
    %122 = vector.load %arg9[%c34, %c0_162] : memref<88x1024xf32, #tpu.memory_space<vmem>>, vector<6x1024xf32>
    tpu.vector_store %arg9[%c34, %c0_162], %120 {strides = array<i32>} : memref<88x1024xf32, #tpu.memory_space<vmem>>, vector<6x1024xf32>,
    %c50 = arith.constant 50 : index
    %c0_163 = arith.constant 0 : index
    %123 = vector.load %arg9[%c50, %c0_163] : memref<88x1024xf32, #tpu.memory_space<vmem>>, vector<6x1024xf32>
    tpu.vector_store %arg9[%c50, %c0_163], %120 {strides = array<i32>} : memref<88x1024xf32, #tpu.memory_space<vmem>>, vector<6x1024xf32>,
    %c66 = arith.constant 66 : index
    %c0_164 = arith.constant 0 : index
    %124 = vector.load %arg9[%c66, %c0_164] : memref<88x1024xf32, #tpu.memory_space<vmem>>, vector<6x1024xf32>
    tpu.vector_store %arg9[%c66, %c0_164], %120 {strides = array<i32>} : memref<88x1024xf32, #tpu.memory_space<vmem>>, vector<6x1024xf32>,
    %c82 = arith.constant 82 : index
    %c0_165 = arith.constant 0 : index
    %125 = vector.load %arg9[%c82, %c0_165] : memref<88x1024xf32, #tpu.memory_space<vmem>>, vector<6x1024xf32>
    tpu.vector_store %arg9[%c82, %c0_165], %120 {strides = array<i32>} : memref<88x1024xf32, #tpu.memory_space<vmem>>, vector<6x1024xf32>,
    %c0_166 = arith.constant 0 : index
    %c0_167 = arith.constant 0 : index
    %c0_168 = arith.constant 0 : index
    %126 = vector.load %arg7[%c0_166, %c0_167, %c0_168] : memref<4x10x260xf32, #tpu.memory_space<vmem>>, vector<1x10x256xf32>
    %127 = vector.shape_cast %126 : vector<1x10x256xf32> to vector<10x256xf32>
    %c8_169 = arith.constant 8 : index
    %c0_170 = arith.constant 0 : index
    %128 = vector.load %arg9[%c8_169, %c0_170] : memref<88x1024xf32, #tpu.memory_space<vmem>>, vector<10x256xf32>
    tpu.vector_store %arg9[%c8_169, %c0_170], %127 {strides = array<i32>} : memref<88x1024xf32, #tpu.memory_space<vmem>>, vector<10x256xf32>,
    %c1_171 = arith.constant 1 : index
    %c0_172 = arith.constant 0 : index
    %c0_173 = arith.constant 0 : index
    %129 = vector.load %arg7[%c1_171, %c0_172, %c0_173] : memref<4x10x260xf32, #tpu.memory_space<vmem>>, vector<1x10x256xf32>
    %130 = vector.shape_cast %129 : vector<1x10x256xf32> to vector<10x256xf32>
    %c8_174 = arith.constant 8 : index
    %c256_175 = arith.constant 256 : index
    %131 = vector.load %arg9[%c8_174, %c256_175] : memref<88x1024xf32, #tpu.memory_space<vmem>>, vector<10x256xf32>
    tpu.vector_store %arg9[%c8_174, %c256_175], %130 {strides = array<i32>} : memref<88x1024xf32, #tpu.memory_space<vmem>>, vector<10x256xf32>,
    %c2_176 = arith.constant 2 : index
    %c0_177 = arith.constant 0 : index
    %c0_178 = arith.constant 0 : index
    %132 = vector.load %arg7[%c2_176, %c0_177, %c0_178] : memref<4x10x260xf32, #tpu.memory_space<vmem>>, vector<1x10x256xf32>
    %133 = vector.shape_cast %132 : vector<1x10x256xf32> to vector<10x256xf32>
    %c8_179 = arith.constant 8 : index
    %c512_180 = arith.constant 512 : index
    %134 = vector.load %arg9[%c8_179, %c512_180] : memref<88x1024xf32, #tpu.memory_space<vmem>>, vector<10x256xf32>
    tpu.vector_store %arg9[%c8_179, %c512_180], %133 {strides = array<i32>} : memref<88x1024xf32, #tpu.memory_space<vmem>>, vector<10x256xf32>,
    %c3_181 = arith.constant 3 : index
    %c0_182 = arith.constant 0 : index
    %c0_183 = arith.constant 0 : index
    %135 = vector.load %arg7[%c3_181, %c0_182, %c0_183] : memref<4x10x260xf32, #tpu.memory_space<vmem>>, vector<1x10x256xf32>
    %136 = vector.shape_cast %135 : vector<1x10x256xf32> to vector<10x256xf32>
    %c8_184 = arith.constant 8 : index
    %c768_185 = arith.constant 768 : index
    %137 = vector.load %arg9[%c8_184, %c768_185] : memref<88x1024xf32, #tpu.memory_space<vmem>>, vector<10x256xf32>
    tpu.vector_store %arg9[%c8_184, %c768_185], %136 {strides = array<i32>} : memref<88x1024xf32, #tpu.memory_space<vmem>>, vector<10x256xf32>,
    %c0_186 = arith.constant 0 : index
    %c0_187 = arith.constant 0 : index
    %c1_188 = arith.constant 1 : index
    %138 = vector.load %arg7[%c0_186, %c0_187, %c1_188] : memref<4x10x260xf32, #tpu.memory_space<vmem>>, vector<1x10x256xf32>
    %139 = vector.shape_cast %138 : vector<1x10x256xf32> to vector<10x256xf32>
    %c24_189 = arith.constant 24 : index
    %c0_190 = arith.constant 0 : index
    %140 = vector.load %arg9[%c24_189, %c0_190] : memref<88x1024xf32, #tpu.memory_space<vmem>>, vector<10x256xf32>
    tpu.vector_store %arg9[%c24_189, %c0_190], %139 {strides = array<i32>} : memref<88x1024xf32, #tpu.memory_space<vmem>>, vector<10x256xf32>,
    %c1_191 = arith.constant 1 : index
    %c0_192 = arith.constant 0 : index
    %c1_193 = arith.constant 1 : index
    %141 = vector.load %arg7[%c1_191, %c0_192, %c1_193] : memref<4x10x260xf32, #tpu.memory_space<vmem>>, vector<1x10x256xf32>
    %142 = vector.shape_cast %141 : vector<1x10x256xf32> to vector<10x256xf32>
    %c24_194 = arith.constant 24 : index
    %c256_195 = arith.constant 256 : index
    %143 = vector.load %arg9[%c24_194, %c256_195] : memref<88x1024xf32, #tpu.memory_space<vmem>>, vector<10x256xf32>
    tpu.vector_store %arg9[%c24_194, %c256_195], %142 {strides = array<i32>} : memref<88x1024xf32, #tpu.memory_space<vmem>>, vector<10x256xf32>,
    %c2_196 = arith.constant 2 : index
    %c0_197 = arith.constant 0 : index
    %c1_198 = arith.constant 1 : index
    %144 = vector.load %arg7[%c2_196, %c0_197, %c1_198] : memref<4x10x260xf32, #tpu.memory_space<vmem>>, vector<1x10x256xf32>
    %145 = vector.shape_cast %144 : vector<1x10x256xf32> to vector<10x256xf32>
    %c24_199 = arith.constant 24 : index
    %c512_200 = arith.constant 512 : index
    %146 = vector.load %arg9[%c24_199, %c512_200] : memref<88x1024xf32, #tpu.memory_space<vmem>>, vector<10x256xf32>
    tpu.vector_store %arg9[%c24_199, %c512_200], %145 {strides = array<i32>} : memref<88x1024xf32, #tpu.memory_space<vmem>>, vector<10x256xf32>,
    %c3_201 = arith.constant 3 : index
    %c0_202 = arith.constant 0 : index
    %c1_203 = arith.constant 1 : index
    %147 = vector.load %arg7[%c3_201, %c0_202, %c1_203] : memref<4x10x260xf32, #tpu.memory_space<vmem>>, vector<1x10x256xf32>
    %148 = vector.shape_cast %147 : vector<1x10x256xf32> to vector<10x256xf32>
    %c24_204 = arith.constant 24 : index
    %c768_205 = arith.constant 768 : index
    %149 = vector.load %arg9[%c24_204, %c768_205] : memref<88x1024xf32, #tpu.memory_space<vmem>>, vector<10x256xf32>
    tpu.vector_store %arg9[%c24_204, %c768_205], %148 {strides = array<i32>} : memref<88x1024xf32, #tpu.memory_space<vmem>>, vector<10x256xf32>,
    %c0_206 = arith.constant 0 : index
    %c0_207 = arith.constant 0 : index
    %c2_208 = arith.constant 2 : index
    %150 = vector.load %arg7[%c0_206, %c0_207, %c2_208] : memref<4x10x260xf32, #tpu.memory_space<vmem>>, vector<1x10x256xf32>
    %151 = vector.shape_cast %150 : vector<1x10x256xf32> to vector<10x256xf32>
    %c40_209 = arith.constant 40 : index
    %c0_210 = arith.constant 0 : index
    %152 = vector.load %arg9[%c40_209, %c0_210] : memref<88x1024xf32, #tpu.memory_space<vmem>>, vector<10x256xf32>
    tpu.vector_store %arg9[%c40_209, %c0_210], %151 {strides = array<i32>} : memref<88x1024xf32, #tpu.memory_space<vmem>>, vector<10x256xf32>,
    %c1_211 = arith.constant 1 : index
    %c0_212 = arith.constant 0 : index
    %c2_213 = arith.constant 2 : index
    %153 = vector.load %arg7[%c1_211, %c0_212, %c2_213] : memref<4x10x260xf32, #tpu.memory_space<vmem>>, vector<1x10x256xf32>
    %154 = vector.shape_cast %153 : vector<1x10x256xf32> to vector<10x256xf32>
    %c40_214 = arith.constant 40 : index
    %c256_215 = arith.constant 256 : index
    %155 = vector.load %arg9[%c40_214, %c256_215] : memref<88x1024xf32, #tpu.memory_space<vmem>>, vector<10x256xf32>
    tpu.vector_store %arg9[%c40_214, %c256_215], %154 {strides = array<i32>} : memref<88x1024xf32, #tpu.memory_space<vmem>>, vector<10x256xf32>,
    %c2_216 = arith.constant 2 : index
    %c0_217 = arith.constant 0 : index
    %c2_218 = arith.constant 2 : index
    %156 = vector.load %arg7[%c2_216, %c0_217, %c2_218] : memref<4x10x260xf32, #tpu.memory_space<vmem>>, vector<1x10x256xf32>
    %157 = vector.shape_cast %156 : vector<1x10x256xf32> to vector<10x256xf32>
    %c40_219 = arith.constant 40 : index
    %c512_220 = arith.constant 512 : index
    %158 = vector.load %arg9[%c40_219, %c512_220] : memref<88x1024xf32, #tpu.memory_space<vmem>>, vector<10x256xf32>
    tpu.vector_store %arg9[%c40_219, %c512_220], %157 {strides = array<i32>} : memref<88x1024xf32, #tpu.memory_space<vmem>>, vector<10x256xf32>,
    %c3_221 = arith.constant 3 : index
    %c0_222 = arith.constant 0 : index
    %c2_223 = arith.constant 2 : index
    %159 = vector.load %arg7[%c3_221, %c0_222, %c2_223] : memref<4x10x260xf32, #tpu.memory_space<vmem>>, vector<1x10x256xf32>
    %160 = vector.shape_cast %159 : vector<1x10x256xf32> to vector<10x256xf32>
    %c40_224 = arith.constant 40 : index
    %c768_225 = arith.constant 768 : index
    %161 = vector.load %arg9[%c40_224, %c768_225] : memref<88x1024xf32, #tpu.memory_space<vmem>>, vector<10x256xf32>
    tpu.vector_store %arg9[%c40_224, %c768_225], %160 {strides = array<i32>} : memref<88x1024xf32, #tpu.memory_space<vmem>>, vector<10x256xf32>,
    %c0_226 = arith.constant 0 : index
    %c0_227 = arith.constant 0 : index
    %c3_228 = arith.constant 3 : index
    %162 = vector.load %arg7[%c0_226, %c0_227, %c3_228] : memref<4x10x260xf32, #tpu.memory_space<vmem>>, vector<1x10x256xf32>
    %163 = vector.shape_cast %162 : vector<1x10x256xf32> to vector<10x256xf32>
    %c56 = arith.constant 56 : index
    %c0_229 = arith.constant 0 : index
    %164 = vector.load %arg9[%c56, %c0_229] : memref<88x1024xf32, #tpu.memory_space<vmem>>, vector<10x256xf32>
    tpu.vector_store %arg9[%c56, %c0_229], %163 {strides = array<i32>} : memref<88x1024xf32, #tpu.memory_space<vmem>>, vector<10x256xf32>,
    %c1_230 = arith.constant 1 : index
    %c0_231 = arith.constant 0 : index
    %c3_232 = arith.constant 3 : index
    %165 = vector.load %arg7[%c1_230, %c0_231, %c3_232] : memref<4x10x260xf32, #tpu.memory_space<vmem>>, vector<1x10x256xf32>
    %166 = vector.shape_cast %165 : vector<1x10x256xf32> to vector<10x256xf32>
    %c56_233 = arith.constant 56 : index
    %c256_234 = arith.constant 256 : index
    %167 = vector.load %arg9[%c56_233, %c256_234] : memref<88x1024xf32, #tpu.memory_space<vmem>>, vector<10x256xf32>
    tpu.vector_store %arg9[%c56_233, %c256_234], %166 {strides = array<i32>} : memref<88x1024xf32, #tpu.memory_space<vmem>>, vector<10x256xf32>,
    %c2_235 = arith.constant 2 : index
    %c0_236 = arith.constant 0 : index
    %c3_237 = arith.constant 3 : index
    %168 = vector.load %arg7[%c2_235, %c0_236, %c3_237] : memref<4x10x260xf32, #tpu.memory_space<vmem>>, vector<1x10x256xf32>
    %169 = vector.shape_cast %168 : vector<1x10x256xf32> to vector<10x256xf32>
    %c56_238 = arith.constant 56 : index
    %c512_239 = arith.constant 512 : index
    %170 = vector.load %arg9[%c56_238, %c512_239] : memref<88x1024xf32, #tpu.memory_space<vmem>>, vector<10x256xf32>
    tpu.vector_store %arg9[%c56_238, %c512_239], %169 {strides = array<i32>} : memref<88x1024xf32, #tpu.memory_space<vmem>>, vector<10x256xf32>,
    %c3_240 = arith.constant 3 : index
    %c0_241 = arith.constant 0 : index
    %c3_242 = arith.constant 3 : index
    %171 = vector.load %arg7[%c3_240, %c0_241, %c3_242] : memref<4x10x260xf32, #tpu.memory_space<vmem>>, vector<1x10x256xf32>
    %172 = vector.shape_cast %171 : vector<1x10x256xf32> to vector<10x256xf32>
    %c56_243 = arith.constant 56 : index
    %c768_244 = arith.constant 768 : index
    %173 = vector.load %arg9[%c56_243, %c768_244] : memref<88x1024xf32, #tpu.memory_space<vmem>>, vector<10x256xf32>
    tpu.vector_store %arg9[%c56_243, %c768_244], %172 {strides = array<i32>} : memref<88x1024xf32, #tpu.memory_space<vmem>>, vector<10x256xf32>,
    %c0_245 = arith.constant 0 : index
    %c0_246 = arith.constant 0 : index
    %c4_247 = arith.constant 4 : index
    %174 = vector.load %arg7[%c0_245, %c0_246, %c4_247] : memref<4x10x260xf32, #tpu.memory_space<vmem>>, vector<1x10x256xf32>
    %175 = vector.shape_cast %174 : vector<1x10x256xf32> to vector<10x256xf32>
    %c72 = arith.constant 72 : index
    %c0_248 = arith.constant 0 : index
    %176 = vector.load %arg9[%c72, %c0_248] : memref<88x1024xf32, #tpu.memory_space<vmem>>, vector<10x256xf32>
    tpu.vector_store %arg9[%c72, %c0_248], %175 {strides = array<i32>} : memref<88x1024xf32, #tpu.memory_space<vmem>>, vector<10x256xf32>,
    %c1_249 = arith.constant 1 : index
    %c0_250 = arith.constant 0 : index
    %c4_251 = arith.constant 4 : index
    %177 = vector.load %arg7[%c1_249, %c0_250, %c4_251] : memref<4x10x260xf32, #tpu.memory_space<vmem>>, vector<1x10x256xf32>
    %178 = vector.shape_cast %177 : vector<1x10x256xf32> to vector<10x256xf32>
    %c72_252 = arith.constant 72 : index
    %c256_253 = arith.constant 256 : index
    %179 = vector.load %arg9[%c72_252, %c256_253] : memref<88x1024xf32, #tpu.memory_space<vmem>>, vector<10x256xf32>
    tpu.vector_store %arg9[%c72_252, %c256_253], %178 {strides = array<i32>} : memref<88x1024xf32, #tpu.memory_space<vmem>>, vector<10x256xf32>,
    %c2_254 = arith.constant 2 : index
    %c0_255 = arith.constant 0 : index
    %c4_256 = arith.constant 4 : index
    %180 = vector.load %arg7[%c2_254, %c0_255, %c4_256] : memref<4x10x260xf32, #tpu.memory_space<vmem>>, vector<1x10x256xf32>
    %181 = vector.shape_cast %180 : vector<1x10x256xf32> to vector<10x256xf32>
    %c72_257 = arith.constant 72 : index
    %c512_258 = arith.constant 512 : index
    %182 = vector.load %arg9[%c72_257, %c512_258] : memref<88x1024xf32, #tpu.memory_space<vmem>>, vector<10x256xf32>
    tpu.vector_store %arg9[%c72_257, %c512_258], %181 {strides = array<i32>} : memref<88x1024xf32, #tpu.memory_space<vmem>>, vector<10x256xf32>,
    %c3_259 = arith.constant 3 : index
    %c0_260 = arith.constant 0 : index
    %c4_261 = arith.constant 4 : index
    %183 = vector.load %arg7[%c3_259, %c0_260, %c4_261] : memref<4x10x260xf32, #tpu.memory_space<vmem>>, vector<1x10x256xf32>
    %184 = vector.shape_cast %183 : vector<1x10x256xf32> to vector<10x256xf32>
    %c72_262 = arith.constant 72 : index
    %c768_263 = arith.constant 768 : index
    %185 = vector.load %arg9[%c72_262, %c768_263] : memref<88x1024xf32, #tpu.memory_space<vmem>>, vector<10x256xf32>
    tpu.vector_store %arg9[%c72_262, %c768_263], %184 {strides = array<i32>} : memref<88x1024xf32, #tpu.memory_space<vmem>>, vector<10x256xf32>,
    %c0_264 = arith.constant 0 : index
    %c0_265 = arith.constant 0 : index
    %186 = vector.load %arg9[%c0_264, %c0_265] : memref<88x1024xf32, #tpu.memory_space<vmem>>, vector<88x1024xf32>
    %c0_266 = arith.constant 0 : index
    %c0_267 = arith.constant 0 : index
    %187 = vector.load %arg3[%c0_266, %c0_267] : memref<10x88xf32, #tpu.memory_space<vmem>>, vector<10x88xf32>
    %cst_268 = arith.constant dense<0.000000e+00> : vector<10x1024xf32>
    %188 = tpu.matmul %187, %186, %cst_268 {dimension_numbers = #tpu.dot_dimension_numbers<[1], [0], [0], [1], [0, 0, 1, 1], [], []>} : vector<10x88xf32>, vector<88x1024xf32>, vector<10x1024xf32> -> vector<10x1024xf32>
    %cst_269 = arith.constant 0.000000e+00 : f32
    %189 = vector.broadcast %cst_269 : f32 to vector<10x1024xf32>
    %190 = arith.maximumf %188, %189 : vector<10x1024xf32>
    %191 = vector.extract_strided_slice %190 {offsets = [0, 0], sizes = [10, 256], strides = [1, 1]} : vector<10x1024xf32> to vector<10x256xf32>
    %c0_270 = arith.constant 0 : index
    %c0_271 = arith.constant 0 : index
    %c2_272 = arith.constant 2 : index
    %192 = vector.load %arg8[%c0_270, %c0_271, %c2_272] : memref<4x10x260xf32, #tpu.memory_space<vmem>>, vector<1x10x256xf32>
    %193 = vector.shape_cast %192 : vector<1x10x256xf32> to vector<10x256xf32>
    %194 = vector.shape_cast %191 : vector<10x256xf32> to vector<1x10x256xf32>
    tpu.vector_store %arg8[%c0_270, %c0_271, %c2_272], %194 {strides = array<i32>} : memref<4x10x260xf32, #tpu.memory_space<vmem>>, vector<1x10x256xf32>,
    %195 = vector.extract_strided_slice %190 {offsets = [0, 256], sizes = [10, 256], strides = [1, 1]} : vector<10x1024xf32> to vector<10x256xf32>
    %c1_273 = arith.constant 1 : index
    %c0_274 = arith.constant 0 : index
    %c2_275 = arith.constant 2 : index
    %196 = vector.load %arg8[%c1_273, %c0_274, %c2_275] : memref<4x10x260xf32, #tpu.memory_space<vmem>>, vector<1x10x256xf32>
    %197 = vector.shape_cast %196 : vector<1x10x256xf32> to vector<10x256xf32>
    %198 = vector.shape_cast %195 : vector<10x256xf32> to vector<1x10x256xf32>
    tpu.vector_store %arg8[%c1_273, %c0_274, %c2_275], %198 {strides = array<i32>} : memref<4x10x260xf32, #tpu.memory_space<vmem>>, vector<1x10x256xf32>,
    %199 = vector.extract_strided_slice %190 {offsets = [0, 512], sizes = [10, 256], strides = [1, 1]} : vector<10x1024xf32> to vector<10x256xf32>
    %c2_276 = arith.constant 2 : index
    %c0_277 = arith.constant 0 : index
    %c2_278 = arith.constant 2 : index
    %200 = vector.load %arg8[%c2_276, %c0_277, %c2_278] : memref<4x10x260xf32, #tpu.memory_space<vmem>>, vector<1x10x256xf32>
    %201 = vector.shape_cast %200 : vector<1x10x256xf32> to vector<10x256xf32>
    %202 = vector.shape_cast %199 : vector<10x256xf32> to vector<1x10x256xf32>
    tpu.vector_store %arg8[%c2_276, %c0_277, %c2_278], %202 {strides = array<i32>} : memref<4x10x260xf32, #tpu.memory_space<vmem>>, vector<1x10x256xf32>,
    %203 = vector.extract_strided_slice %190 {offsets = [0, 768], sizes = [10, 256], strides = [1, 1]} : vector<10x1024xf32> to vector<10x256xf32>
    %c3_279 = arith.constant 3 : index
    %c0_280 = arith.constant 0 : index
    %c2_281 = arith.constant 2 : index
    %204 = vector.load %arg8[%c3_279, %c0_280, %c2_281] : memref<4x10x260xf32, #tpu.memory_space<vmem>>, vector<1x10x256xf32>
    %205 = vector.shape_cast %204 : vector<1x10x256xf32> to vector<10x256xf32>
    %206 = vector.shape_cast %203 : vector<10x256xf32> to vector<1x10x256xf32>
    tpu.vector_store %arg8[%c3_279, %c0_280, %c2_281], %206 {strides = array<i32>} : memref<4x10x260xf32, #tpu.memory_space<vmem>>, vector<1x10x256xf32>,
    %c0_282 = arith.constant 0 : index
    %c0_283 = arith.constant 0 : index
    %c0_284 = arith.constant 0 : index
    %207 = vector.load %arg8[%c0_282, %c0_283, %c0_284] : memref<4x10x260xf32, #tpu.memory_space<vmem>>, vector<1x10x256xf32>
    %208 = vector.shape_cast %207 : vector<1x10x256xf32> to vector<10x256xf32>
    %c8_285 = arith.constant 8 : index
    %c0_286 = arith.constant 0 : index
    %209 = vector.load %arg9[%c8_285, %c0_286] : memref<88x1024xf32, #tpu.memory_space<vmem>>, vector<10x256xf32>
    tpu.vector_store %arg9[%c8_285, %c0_286], %208 {strides = array<i32>} : memref<88x1024xf32, #tpu.memory_space<vmem>>, vector<10x256xf32>,
    %c1_287 = arith.constant 1 : index
    %c0_288 = arith.constant 0 : index
    %c0_289 = arith.constant 0 : index
    %210 = vector.load %arg8[%c1_287, %c0_288, %c0_289] : memref<4x10x260xf32, #tpu.memory_space<vmem>>, vector<1x10x256xf32>
    %211 = vector.shape_cast %210 : vector<1x10x256xf32> to vector<10x256xf32>
    %c8_290 = arith.constant 8 : index
    %c256_291 = arith.constant 256 : index
    %212 = vector.load %arg9[%c8_290, %c256_291] : memref<88x1024xf32, #tpu.memory_space<vmem>>, vector<10x256xf32>
    tpu.vector_store %arg9[%c8_290, %c256_291], %211 {strides = array<i32>} : memref<88x1024xf32, #tpu.memory_space<vmem>>, vector<10x256xf32>,
    %c2_292 = arith.constant 2 : index
    %c0_293 = arith.constant 0 : index
    %c0_294 = arith.constant 0 : index
    %213 = vector.load %arg8[%c2_292, %c0_293, %c0_294] : memref<4x10x260xf32, #tpu.memory_space<vmem>>, vector<1x10x256xf32>
    %214 = vector.shape_cast %213 : vector<1x10x256xf32> to vector<10x256xf32>
    %c8_295 = arith.constant 8 : index
    %c512_296 = arith.constant 512 : index
    %215 = vector.load %arg9[%c8_295, %c512_296] : memref<88x1024xf32, #tpu.memory_space<vmem>>, vector<10x256xf32>
    tpu.vector_store %arg9[%c8_295, %c512_296], %214 {strides = array<i32>} : memref<88x1024xf32, #tpu.memory_space<vmem>>, vector<10x256xf32>,
    %c3_297 = arith.constant 3 : index
    %c0_298 = arith.constant 0 : index
    %c0_299 = arith.constant 0 : index
    %216 = vector.load %arg8[%c3_297, %c0_298, %c0_299] : memref<4x10x260xf32, #tpu.memory_space<vmem>>, vector<1x10x256xf32>
    %217 = vector.shape_cast %216 : vector<1x10x256xf32> to vector<10x256xf32>
    %c8_300 = arith.constant 8 : index
    %c768_301 = arith.constant 768 : index
    %218 = vector.load %arg9[%c8_300, %c768_301] : memref<88x1024xf32, #tpu.memory_space<vmem>>, vector<10x256xf32>
    tpu.vector_store %arg9[%c8_300, %c768_301], %217 {strides = array<i32>} : memref<88x1024xf32, #tpu.memory_space<vmem>>, vector<10x256xf32>,
    %c0_302 = arith.constant 0 : index
    %c0_303 = arith.constant 0 : index
    %c1_304 = arith.constant 1 : index
    %219 = vector.load %arg8[%c0_302, %c0_303, %c1_304] : memref<4x10x260xf32, #tpu.memory_space<vmem>>, vector<1x10x256xf32>
    %220 = vector.shape_cast %219 : vector<1x10x256xf32> to vector<10x256xf32>
    %c24_305 = arith.constant 24 : index
    %c0_306 = arith.constant 0 : index
    %221 = vector.load %arg9[%c24_305, %c0_306] : memref<88x1024xf32, #tpu.memory_space<vmem>>, vector<10x256xf32>
    tpu.vector_store %arg9[%c24_305, %c0_306], %220 {strides = array<i32>} : memref<88x1024xf32, #tpu.memory_space<vmem>>, vector<10x256xf32>,
    %c1_307 = arith.constant 1 : index
    %c0_308 = arith.constant 0 : index
    %c1_309 = arith.constant 1 : index
    %222 = vector.load %arg8[%c1_307, %c0_308, %c1_309] : memref<4x10x260xf32, #tpu.memory_space<vmem>>, vector<1x10x256xf32>
    %223 = vector.shape_cast %222 : vector<1x10x256xf32> to vector<10x256xf32>
    %c24_310 = arith.constant 24 : index
    %c256_311 = arith.constant 256 : index
    %224 = vector.load %arg9[%c24_310, %c256_311] : memref<88x1024xf32, #tpu.memory_space<vmem>>, vector<10x256xf32>
    tpu.vector_store %arg9[%c24_310, %c256_311], %223 {strides = array<i32>} : memref<88x1024xf32, #tpu.memory_space<vmem>>, vector<10x256xf32>,
    %c2_312 = arith.constant 2 : index
    %c0_313 = arith.constant 0 : index
    %c1_314 = arith.constant 1 : index
    %225 = vector.load %arg8[%c2_312, %c0_313, %c1_314] : memref<4x10x260xf32, #tpu.memory_space<vmem>>, vector<1x10x256xf32>
    %226 = vector.shape_cast %225 : vector<1x10x256xf32> to vector<10x256xf32>
    %c24_315 = arith.constant 24 : index
    %c512_316 = arith.constant 512 : index
    %227 = vector.load %arg9[%c24_315, %c512_316] : memref<88x1024xf32, #tpu.memory_space<vmem>>, vector<10x256xf32>
    tpu.vector_store %arg9[%c24_315, %c512_316], %226 {strides = array<i32>} : memref<88x1024xf32, #tpu.memory_space<vmem>>, vector<10x256xf32>,
    %c3_317 = arith.constant 3 : index
    %c0_318 = arith.constant 0 : index
    %c1_319 = arith.constant 1 : index
    %228 = vector.load %arg8[%c3_317, %c0_318, %c1_319] : memref<4x10x260xf32, #tpu.memory_space<vmem>>, vector<1x10x256xf32>
    %229 = vector.shape_cast %228 : vector<1x10x256xf32> to vector<10x256xf32>
    %c24_320 = arith.constant 24 : index
    %c768_321 = arith.constant 768 : index
    %230 = vector.load %arg9[%c24_320, %c768_321] : memref<88x1024xf32, #tpu.memory_space<vmem>>, vector<10x256xf32>
    tpu.vector_store %arg9[%c24_320, %c768_321], %229 {strides = array<i32>} : memref<88x1024xf32, #tpu.memory_space<vmem>>, vector<10x256xf32>,
    %c0_322 = arith.constant 0 : index
    %c0_323 = arith.constant 0 : index
    %c2_324 = arith.constant 2 : index
    %231 = vector.load %arg8[%c0_322, %c0_323, %c2_324] : memref<4x10x260xf32, #tpu.memory_space<vmem>>, vector<1x10x256xf32>
    %232 = vector.shape_cast %231 : vector<1x10x256xf32> to vector<10x256xf32>
    %c40_325 = arith.constant 40 : index
    %c0_326 = arith.constant 0 : index
    %233 = vector.load %arg9[%c40_325, %c0_326] : memref<88x1024xf32, #tpu.memory_space<vmem>>, vector<10x256xf32>
    tpu.vector_store %arg9[%c40_325, %c0_326], %232 {strides = array<i32>} : memref<88x1024xf32, #tpu.memory_space<vmem>>, vector<10x256xf32>,
    %c1_327 = arith.constant 1 : index
    %c0_328 = arith.constant 0 : index
    %c2_329 = arith.constant 2 : index
    %234 = vector.load %arg8[%c1_327, %c0_328, %c2_329] : memref<4x10x260xf32, #tpu.memory_space<vmem>>, vector<1x10x256xf32>
    %235 = vector.shape_cast %234 : vector<1x10x256xf32> to vector<10x256xf32>
    %c40_330 = arith.constant 40 : index
    %c256_331 = arith.constant 256 : index
    %236 = vector.load %arg9[%c40_330, %c256_331] : memref<88x1024xf32, #tpu.memory_space<vmem>>, vector<10x256xf32>
    tpu.vector_store %arg9[%c40_330, %c256_331], %235 {strides = array<i32>} : memref<88x1024xf32, #tpu.memory_space<vmem>>, vector<10x256xf32>,
    %c2_332 = arith.constant 2 : index
    %c0_333 = arith.constant 0 : index
    %c2_334 = arith.constant 2 : index
    %237 = vector.load %arg8[%c2_332, %c0_333, %c2_334] : memref<4x10x260xf32, #tpu.memory_space<vmem>>, vector<1x10x256xf32>
    %238 = vector.shape_cast %237 : vector<1x10x256xf32> to vector<10x256xf32>
    %c40_335 = arith.constant 40 : index
    %c512_336 = arith.constant 512 : index
    %239 = vector.load %arg9[%c40_335, %c512_336] : memref<88x1024xf32, #tpu.memory_space<vmem>>, vector<10x256xf32>
    tpu.vector_store %arg9[%c40_335, %c512_336], %238 {strides = array<i32>} : memref<88x1024xf32, #tpu.memory_space<vmem>>, vector<10x256xf32>,
    %c3_337 = arith.constant 3 : index
    %c0_338 = arith.constant 0 : index
    %c2_339 = arith.constant 2 : index
    %240 = vector.load %arg8[%c3_337, %c0_338, %c2_339] : memref<4x10x260xf32, #tpu.memory_space<vmem>>, vector<1x10x256xf32>
    %241 = vector.shape_cast %240 : vector<1x10x256xf32> to vector<10x256xf32>
    %c40_340 = arith.constant 40 : index
    %c768_341 = arith.constant 768 : index
    %242 = vector.load %arg9[%c40_340, %c768_341] : memref<88x1024xf32, #tpu.memory_space<vmem>>, vector<10x256xf32>
    tpu.vector_store %arg9[%c40_340, %c768_341], %241 {strides = array<i32>} : memref<88x1024xf32, #tpu.memory_space<vmem>>, vector<10x256xf32>,
    %c0_342 = arith.constant 0 : index
    %c0_343 = arith.constant 0 : index
    %c3_344 = arith.constant 3 : index
    %243 = vector.load %arg8[%c0_342, %c0_343, %c3_344] : memref<4x10x260xf32, #tpu.memory_space<vmem>>, vector<1x10x256xf32>
    %244 = vector.shape_cast %243 : vector<1x10x256xf32> to vector<10x256xf32>
    %c56_345 = arith.constant 56 : index
    %c0_346 = arith.constant 0 : index
    %245 = vector.load %arg9[%c56_345, %c0_346] : memref<88x1024xf32, #tpu.memory_space<vmem>>, vector<10x256xf32>
    tpu.vector_store %arg9[%c56_345, %c0_346], %244 {strides = array<i32>} : memref<88x1024xf32, #tpu.memory_space<vmem>>, vector<10x256xf32>,
    %c1_347 = arith.constant 1 : index
    %c0_348 = arith.constant 0 : index
    %c3_349 = arith.constant 3 : index
    %246 = vector.load %arg8[%c1_347, %c0_348, %c3_349] : memref<4x10x260xf32, #tpu.memory_space<vmem>>, vector<1x10x256xf32>
    %247 = vector.shape_cast %246 : vector<1x10x256xf32> to vector<10x256xf32>
    %c56_350 = arith.constant 56 : index
    %c256_351 = arith.constant 256 : index
    %248 = vector.load %arg9[%c56_350, %c256_351] : memref<88x1024xf32, #tpu.memory_space<vmem>>, vector<10x256xf32>
    tpu.vector_store %arg9[%c56_350, %c256_351], %247 {strides = array<i32>} : memref<88x1024xf32, #tpu.memory_space<vmem>>, vector<10x256xf32>,
    %c2_352 = arith.constant 2 : index
    %c0_353 = arith.constant 0 : index
    %c3_354 = arith.constant 3 : index
    %249 = vector.load %arg8[%c2_352, %c0_353, %c3_354] : memref<4x10x260xf32, #tpu.memory_space<vmem>>, vector<1x10x256xf32>
    %250 = vector.shape_cast %249 : vector<1x10x256xf32> to vector<10x256xf32>
    %c56_355 = arith.constant 56 : index
    %c512_356 = arith.constant 512 : index
    %251 = vector.load %arg9[%c56_355, %c512_356] : memref<88x1024xf32, #tpu.memory_space<vmem>>, vector<10x256xf32>
    tpu.vector_store %arg9[%c56_355, %c512_356], %250 {strides = array<i32>} : memref<88x1024xf32, #tpu.memory_space<vmem>>, vector<10x256xf32>,
    %c3_357 = arith.constant 3 : index
    %c0_358 = arith.constant 0 : index
    %c3_359 = arith.constant 3 : index
    %252 = vector.load %arg8[%c3_357, %c0_358, %c3_359] : memref<4x10x260xf32, #tpu.memory_space<vmem>>, vector<1x10x256xf32>
    %253 = vector.shape_cast %252 : vector<1x10x256xf32> to vector<10x256xf32>
    %c56_360 = arith.constant 56 : index
    %c768_361 = arith.constant 768 : index
    %254 = vector.load %arg9[%c56_360, %c768_361] : memref<88x1024xf32, #tpu.memory_space<vmem>>, vector<10x256xf32>
    tpu.vector_store %arg9[%c56_360, %c768_361], %253 {strides = array<i32>} : memref<88x1024xf32, #tpu.memory_space<vmem>>, vector<10x256xf32>,
    %c0_362 = arith.constant 0 : index
    %c0_363 = arith.constant 0 : index
    %c4_364 = arith.constant 4 : index
    %255 = vector.load %arg8[%c0_362, %c0_363, %c4_364] : memref<4x10x260xf32, #tpu.memory_space<vmem>>, vector<1x10x256xf32>
    %256 = vector.shape_cast %255 : vector<1x10x256xf32> to vector<10x256xf32>
    %c72_365 = arith.constant 72 : index
    %c0_366 = arith.constant 0 : index
    %257 = vector.load %arg9[%c72_365, %c0_366] : memref<88x1024xf32, #tpu.memory_space<vmem>>, vector<10x256xf32>
    tpu.vector_store %arg9[%c72_365, %c0_366], %256 {strides = array<i32>} : memref<88x1024xf32, #tpu.memory_space<vmem>>, vector<10x256xf32>,
    %c1_367 = arith.constant 1 : index
    %c0_368 = arith.constant 0 : index
    %c4_369 = arith.constant 4 : index
    %258 = vector.load %arg8[%c1_367, %c0_368, %c4_369] : memref<4x10x260xf32, #tpu.memory_space<vmem>>, vector<1x10x256xf32>
    %259 = vector.shape_cast %258 : vector<1x10x256xf32> to vector<10x256xf32>
    %c72_370 = arith.constant 72 : index
    %c256_371 = arith.constant 256 : index
    %260 = vector.load %arg9[%c72_370, %c256_371] : memref<88x1024xf32, #tpu.memory_space<vmem>>, vector<10x256xf32>
    tpu.vector_store %arg9[%c72_370, %c256_371], %259 {strides = array<i32>} : memref<88x1024xf32, #tpu.memory_space<vmem>>, vector<10x256xf32>,
    %c2_372 = arith.constant 2 : index
    %c0_373 = arith.constant 0 : index
    %c4_374 = arith.constant 4 : index
    %261 = vector.load %arg8[%c2_372, %c0_373, %c4_374] : memref<4x10x260xf32, #tpu.memory_space<vmem>>, vector<1x10x256xf32>
    %262 = vector.shape_cast %261 : vector<1x10x256xf32> to vector<10x256xf32>
    %c72_375 = arith.constant 72 : index
    %c512_376 = arith.constant 512 : index
    %263 = vector.load %arg9[%c72_375, %c512_376] : memref<88x1024xf32, #tpu.memory_space<vmem>>, vector<10x256xf32>
    tpu.vector_store %arg9[%c72_375, %c512_376], %262 {strides = array<i32>} : memref<88x1024xf32, #tpu.memory_space<vmem>>, vector<10x256xf32>,
    %c3_377 = arith.constant 3 : index
    %c0_378 = arith.constant 0 : index
    %c4_379 = arith.constant 4 : index
    %264 = vector.load %arg8[%c3_377, %c0_378, %c4_379] : memref<4x10x260xf32, #tpu.memory_space<vmem>>, vector<1x10x256xf32>
    %265 = vector.shape_cast %264 : vector<1x10x256xf32> to vector<10x256xf32>
    %c72_380 = arith.constant 72 : index
    %c768_381 = arith.constant 768 : index
    %266 = vector.load %arg9[%c72_380, %c768_381] : memref<88x1024xf32, #tpu.memory_space<vmem>>, vector<10x256xf32>
    tpu.vector_store %arg9[%c72_380, %c768_381], %265 {strides = array<i32>} : memref<88x1024xf32, #tpu.memory_space<vmem>>, vector<10x256xf32>,
    %c0_382 = arith.constant 0 : index
    %c0_383 = arith.constant 0 : index
    %267 = vector.load %arg9[%c0_382, %c0_383] : memref<88x1024xf32, #tpu.memory_space<vmem>>, vector<88x1024xf32>
    %c0_384 = arith.constant 0 : index
    %c0_385 = arith.constant 0 : index
    %268 = vector.load %arg4[%c0_384, %c0_385] : memref<1x88xf32, #tpu.memory_space<vmem>>, vector<1x88xf32>
    %cst_386 = arith.constant dense<0.000000e+00> : vector<1x1024xf32>
    %269 = tpu.matmul %268, %267, %cst_386 {dimension_numbers = #tpu.dot_dimension_numbers<[1], [0], [0], [1], [0, 0, 1, 1], [], []>} : vector<1x88xf32>, vector<88x1024xf32>, vector<1x1024xf32> -> vector<1x1024xf32>
    %270 = arith.negf %269 : vector<1x1024xf32>
    %271 = math.exp %270 : vector<1x1024xf32>
    %cst_387 = arith.constant 1.000000e+00 : f32
    %272 = vector.broadcast %cst_387 : f32 to vector<1x1024xf32>
    %273 = arith.addf %272, %271 : vector<1x1024xf32>
    %274 = arith.divf %272, %273 : vector<1x1024xf32>
    %275 = vector.extract_strided_slice %274 {offsets = [0, 0], sizes = [1, 256], strides = [1, 1]} : vector<1x1024xf32> to vector<1x256xf32>
    %c0_388 = arith.constant 0 : index
    %c0_389 = arith.constant 0 : index
    %c0_390 = arith.constant 0 : index
    %276 = vector.load %arg5[%c0_388, %c0_389, %c0_390] : memref<4x1x256xf32, #tpu.memory_space<vmem>>, vector<1x1x256xf32>
    %277 = vector.shape_cast %276 : vector<1x1x256xf32> to vector<1x256xf32>
    %278 = vector.shape_cast %275 : vector<1x256xf32> to vector<1x1x256xf32>
    tpu.vector_store %arg5[%c0_388, %c0_389, %c0_390], %278 {strides = array<i32>} : memref<4x1x256xf32, #tpu.memory_space<vmem>>, vector<1x1x256xf32>,
    %279 = vector.extract_strided_slice %274 {offsets = [0, 256], sizes = [1, 256], strides = [1, 1]} : vector<1x1024xf32> to vector<1x256xf32>
    %c1_391 = arith.constant 1 : index
    %c0_392 = arith.constant 0 : index
    %c0_393 = arith.constant 0 : index
    %280 = vector.load %arg5[%c1_391, %c0_392, %c0_393] : memref<4x1x256xf32, #tpu.memory_space<vmem>>, vector<1x1x256xf32>
    %281 = vector.shape_cast %280 : vector<1x1x256xf32> to vector<1x256xf32>
    %282 = vector.shape_cast %279 : vector<1x256xf32> to vector<1x1x256xf32>
    tpu.vector_store %arg5[%c1_391, %c0_392, %c0_393], %282 {strides = array<i32>} : memref<4x1x256xf32, #tpu.memory_space<vmem>>, vector<1x1x256xf32>,
    %283 = vector.extract_strided_slice %274 {offsets = [0, 512], sizes = [1, 256], strides = [1, 1]} : vector<1x1024xf32> to vector<1x256xf32>
    %c2_394 = arith.constant 2 : index
    %c0_395 = arith.constant 0 : index
    %c0_396 = arith.constant 0 : index
    %284 = vector.load %arg5[%c2_394, %c0_395, %c0_396] : memref<4x1x256xf32, #tpu.memory_space<vmem>>, vector<1x1x256xf32>
    %285 = vector.shape_cast %284 : vector<1x1x256xf32> to vector<1x256xf32>
    %286 = vector.shape_cast %283 : vector<1x256xf32> to vector<1x1x256xf32>
    tpu.vector_store %arg5[%c2_394, %c0_395, %c0_396], %286 {strides = array<i32>} : memref<4x1x256xf32, #tpu.memory_space<vmem>>, vector<1x1x256xf32>,
    %287 = vector.extract_strided_slice %274 {offsets = [0, 768], sizes = [1, 256], strides = [1, 1]} : vector<1x1024xf32> to vector<1x256xf32>
    %c3_397 = arith.constant 3 : index
    %c0_398 = arith.constant 0 : index
    %c0_399 = arith.constant 0 : index
    %288 = vector.load %arg5[%c3_397, %c0_398, %c0_399] : memref<4x1x256xf32, #tpu.memory_space<vmem>>, vector<1x1x256xf32>
    %289 = vector.shape_cast %288 : vector<1x1x256xf32> to vector<1x256xf32>
    %290 = vector.shape_cast %287 : vector<1x256xf32> to vector<1x1x256xf32>
    tpu.vector_store %arg5[%c3_397, %c0_398, %c0_399], %290 {strides = array<i32>} : memref<4x1x256xf32, #tpu.memory_space<vmem>>, vector<1x1x256xf32>,
    return
  }
  func.func @transform_0(%arg0: i32) -> (i32, i32, i32) {
    %c0_i32 = arith.constant 0 : i32
    %c0_i32_0 = arith.constant 0 : i32
    %c0_i32_1 = arith.constant 0 : i32
    return %arg0, %c0_i32, %c0_i32_0 : i32, i32, i32
  }
  func.func @transform_1(%arg0: i32) -> (i32, i32) {
    %c0_i32 = arith.constant 0 : i32
    %c0_i32_0 = arith.constant 0 : i32
    %c0_i32_1 = arith.constant 0 : i32
    return %c0_i32, %c0_i32_0 : i32, i32
  }
  func.func @transform_2(%arg0: i32) -> (i32, i32) {
    %c0_i32 = arith.constant 0 : i32
    %c0_i32_0 = arith.constant 0 : i32
    %c0_i32_1 = arith.constant 0 : i32
    return %c0_i32, %c0_i32_0 : i32, i32
  }
  func.func @transform_3(%arg0: i32) -> (i32, i32) {
    %c0_i32 = arith.constant 0 : i32
    %c0_i32_0 = arith.constant 0 : i32
    %c0_i32_1 = arith.constant 0 : i32
    return %c0_i32, %c0_i32_0 : i32, i32
  }
  func.func @transform_4(%arg0: i32) -> (i32, i32, i32) {
    %c0_i32 = arith.constant 0 : i32
    %c0_i32_0 = arith.constant 0 : i32
    %c0_i32_1 = arith.constant 0 : i32
    return %arg0, %c0_i32, %c0_i32_0 : i32, i32, i32
  }
}

</mosaic_0001>

<bundles_post_ra>
// kernel: tpu_custom_call.1
= control target key start
LH: loop header
LB: loop body
LE: loop exit
PB: predicated region body
PF: predicated region fallthrough
CT: control target
= control target key end

     0   :  { %9 = vsyncpa [#allocation7], 0  ;;  %s4759_s0 = inlined_call_operand.vmem [shape: f32[8,7,256], index: 0, kind: input, shape index: {}]   ;;  %s4760_s1 = inlined_call_operand.vmem [shape: f32[10,48], index: 1, kind: input, shape index: {}]   ;;  %s4761_s2 = inlined_call_operand.vmem [shape: f32[10,88], index: 2, kind: input, shape index: {}]   ;;  %s4762_s3 = inlined_call_operand.vmem [shape: f32[1,88], index: 3, kind: input, shape index: {}]   ;;  %s4763_s4 = inlined_call_operand.hbm [shape: f32[8,1,256], index: 4, kind: output, shape index: {}]  }
   0x1   :  { %11 = vsyncpa [#allocation7 + $0x1], 0  ;;  %s3436_s15 = smov 0   ;;  %s3438_s16 = smov 0  }
   0x2   :  { %s3440_s17 = smov 0   ;;  %s3442_s18 = smov 0  }
   0x3 LB: > { %s3457_s19 = sadd.s32 4294967295, %s3401_s18   ;;  %s3188_s20 = sadd.s32 4294967294, %s3401_s18   ;;  %s3401_s18 = sphi %s3442_s18, %s4781_s18   ;;  %s3397_s17 = sphi %s3440_s17, %s4780_s17   ;;  %s3393_s16 = sphi %s3438_s16, %s4779_s16   ;;  %s3389_s15 = sphi %s3436_s15, %s4778_s15  }
   0x4   : > { %s3461_s21 = sadd.s32 1, %s3401_s18   ;;  %s113_s22 = sadd.s32 1, %s3397_s17 }
   0x5   : > { %s110_s23 = ssub.s32 %s3401_s18, %s3461_s21  ;;  %p123_p0 = scmp.ne.s32.totalorder %s3397_s17, %s3393_s16 }
   0x6   : > { %p111_p1 = scmp.eq.s32.totalorder %s110_s23, 0  ;;  %p124_p2 = scmp.eq.s32.totalorder %s3457_s19, 1 }
   0x7   : > { %p129_p3 = scmp.ne.s32.totalorder %s3393_s16, %s3389_s15  ;;  %p130_p4 = scmp.eq.s32.totalorder %s3188_s20, 1 }
   0x8   : > { %s3472_s24 = scalar_select %p111_p1, %s3397_s17, %s113_s22  }
   0x9   : > { %p3474_p5 = por %p124_p2, %p123_p0  ;;  %p3478_p6 = por %p130_p4, %p129_p3 }
   0xa   : > { %p3191_p7 = scmp.ge.s32.totalorder %s3401_s18, 1  ;;  %p167_p8 = scmp.lt.s32.totalorder %s3401_s18, 3 }
   0xc   : > { %p168_p9 = pnand %p3191_p7, %p167_p8 }
   0xd   : > { %s3193_s27 = sshll.u32 (!%p168_p9), %s3457_s19, 2  ;;  %s3404_s6 = smov (!%p168_p9), 2  }
   0xe   : > { %171 = sbr.rel (%p168_p9) target bundleno = 1697 (0x6a1), region = 36  ;;  %p195_p10 = scmp.lt.s32.totalorder (!%p168_p9), %s3193_s27, 7 }
   0xf   : > { %s3405_s7 = smov (!%p168_p9), 127   ;;  %s3406_s8 = smov (!%p168_p9), 124  }
  0x10   : > { %s3407_s9 = smov (!%p168_p9), 125   ;;  %s3408_s10 = smov (!%p168_p9), 126  }
  0x11   : > { %s191_s30 = sand.u32 (!%p168_p9), 1, %s3393_s16  }
  0x12   : > { %s3111_s13 = scalar_lea.sflag (!%p168_p9), [#allocation7], %s191_s30 }
  0x13   : > { %vm212_vm0 = vcmask 14336   ;;  %v3403_v0 = vmov 0.0   ;;  %s4783_s27 = smov (!%p195_p10, %s3193_s27), 7  ;;  %vm217_vm1 = vcmask 30736   ;;  %vm222_vm2 = vcmask 15360  }
  0x14   : > { %214 = vst.msk [vmem:[#allocation2 + $0x18] sm:$0x7f] %vm212_vm0, %v3403_v0  ;;  %s3258_s28 = sshll.u32 %s4783_s27, 4  ;;  %vm270_vm3 = vcmask 1046544   ;;  %vm587_vm4 = vcmask 1014784   ;;  %vm514_vm5 = vcmask 1022976  }
  0x15   : > { %204 = vst [vmem:[#allocation5] sm:$0xfe] %v3403_v0  ;;  %s199_s5 = scalar_lea.vmem %s4759_s0, %s3258_s28  ;;  %vm368_vm6 = vcmask 1039360   ;;  %vm441_vm7 = vcmask 1031168   ;;  %vm698_vm8 = vcmask 392192   ;;  %vm232_vm9 = vcmask 31760  }
  0x16   : > { %205 = vst [vmem:[#allocation5 + $0x8] sm:$0xfe] %v3403_v0  ;;  %v3196_v1 = vld [vmem:[%s199_s5 + $0x10] sm:$0x7f]  ;;  %v258_v2 = vld [vmem:[%s199_s5] sm:$0x7f] }
  0x17   : > { %206 = vst [vmem:[#allocation5 + $0x10] sm:$0xfe] %v3403_v0  ;;  %279 = vrot.lane.b32.xlu1 %v3196_v1, %s3404_s6  ;;  %262 = vrot.lane.b32.xlu0 %v258_v2, %s3404_s6  ;;  %v3198_v3 = vld [vmem:[%s199_s5 + $0x20] sm:$0x7f]  ;;  %v3197_v4 = vld [vmem:[%s199_s5 + $0x18] sm:$0x7f] }
  0x18   : > { %207 = vst [vmem:[#allocation5 + $0x18] sm:$0xfe] %v3403_v0  ;;  %296 = vrot.lane.b32.xlu2 %v3198_v3, %s3404_s6  ;;  %v259_v5 = vld [vmem:[%s199_s5 + $0x8] sm:$0x7f]  ;;  %v3201_v7 = vld [vmem:[%s199_s5 + $0x38] sm:$0x7f] }
  0x19   : > { %208 = vst [vmem:[#allocation5 + $0x20] sm:$0xfe] %v3403_v0  ;;  %v3199_v6 = vld [vmem:[%s199_s5 + $0x28] sm:$0x7f]  ;;  %v3200_v8 = vld [vmem:[%s199_s5 + $0x30] sm:$0x7f] }
  0x1a   : > { %209 = vst [vmem:[#allocation5 + $0x28] sm:$0xfe] %v3403_v0  ;;  %vm925_vm10 = vcmask 1047568   ;;  %vm224_vm11 = vcmask 9216   ;;  %vm929_vm12 = vcmask 1041424   ;;  %vm234_vm13 = vcmask 25616  }
  0x1b   : > { %210 = vst [vmem:[#allocation5 + $0x30] sm:$0xfe] %v3403_v0  ;;  %vm1752_vm14 = vcmask 719872   ;;  %s3192_s5 = sshll.u32 %s191_s30, 3  ;;  %s3359_s27 = scalar_lea.hbm %s4763_s4, 16 }
  0x1c   : > { %211 = vst [vmem:[#allocation5 + $0x38] sm:$0xfe] %v3403_v0 }
  0x1d   : > { %213 = vst.msk [vmem:[#allocation2] sm:$0x7f] %vm212_vm0, %v3403_v0 }
  0x1e   : > { %215 = vst.msk [vmem:[#allocation2 + $0x30] sm:$0x7f] %vm212_vm0, %v3403_v0 }
  0x1f   : > { %216 = vst.msk [vmem:[#allocation2 + $0x48] sm:$0x7f] %vm212_vm0, %v3403_v0  ;;  %281 = vrot.lane.b32.xlu1 %v3197_v4, %s3404_s6  ;;  %264 = vrot.lane.b32.xlu0 %v259_v5, %s3404_s6 }
  0x20   : > { %326 = vst [vmem:[#allocation5 + $0x47] ss:$8 sm:$0xf] %v3403_v0  ;;  %298 = vrot.lane.b32.xlu2 %v3199_v6, %s3404_s6 }
  0x21   : > { %327 = vst [vmem:[#allocation5 + $0x47] ss:$8 sm:$0xf0] %v3403_v0 }
  0x22   : > { %329 = vst [vmem:[#allocation5 + $0x87] ss:$8 sm:$0xf] %v3403_v0 }
  0x23   : > { %330 = vst [vmem:[#allocation5 + $0x87] ss:$8 sm:$0xf0] %v3403_v0 }
  0x24   : > { %332 = vst [vmem:[#allocation5 + $0xc7] ss:$8 sm:$0xf] %v3403_v0 }
  0x25   : > { %333 = vst [vmem:[#allocation5 + $0xc7] ss:$8 sm:$0xf0] %v3403_v0 }
  0x26   : > { %335 = vst [vmem:[#allocation5 + $0x107] ss:$8 sm:$0xf] %v3403_v0 }
  0x27   : > { %336 = vst [vmem:[#allocation5 + $0x107] ss:$8 sm:$0xf0] %v3403_v0  ;;  %315 = vrot.lane.b32.xlu1 %v3201_v7, %s3404_s6  ;;  %313 = vrot.lane.b32.xlu0 %v3200_v8, %s3404_s6 }
  0x28   : > { %338 = vst [vmem:[#allocation5 + $0x147] ss:$8 sm:$0xf] %v3403_v0 }
  0x29   : > { %339 = vst [vmem:[#allocation5 + $0x147] ss:$8 sm:$0xf0] %v3403_v0 }
  0x2a   : > { %1030 = vst [vmem:[#allocation5 + $0x180] sm:$0xfc] %v3403_v0 }
  0x2b   : > { %1031 = vst [vmem:[#allocation5 + $0x188] sm:$0xfc] %v3403_v0 }
  0x2c   : > { %1032 = vst [vmem:[#allocation5 + $0x190] sm:$0xfc] %v3403_v0 }
  0x2d   : > { %1033 = vst [vmem:[#allocation5 + $0x198] sm:$0xfc] %v3403_v0 }
  0x2e   : > { %1034 = vst [vmem:[#allocation5 + $0x1a0] sm:$0xfc] %v3403_v0 }
  0x2f   : > { %1035 = vst [vmem:[#allocation5 + $0x1a8] sm:$0xfc] %v3403_v0 }
  0x30   : > { %1036 = vst [vmem:[#allocation5 + $0x1b0] sm:$0xfc] %v3403_v0 }
  0x31   : > { %1037 = vst [vmem:[#allocation5 + $0x1b8] sm:$0xfc] %v3403_v0 }
  0x32   : > { %1038 = vst [vmem:[#allocation5 + $0x200] sm:$0xfc] %v3403_v0 }
  0x33   : > { %1039 = vst [vmem:[#allocation5 + $0x208] sm:$0xfc] %v3403_v0 }
  0x34   : > { %1040 = vst [vmem:[#allocation5 + $0x210] sm:$0xfc] %v3403_v0 }
  0x35   : > { %1041 = vst [vmem:[#allocation5 + $0x218] sm:$0xfc] %v3403_v0 }
  0x36   : > { %1042 = vst [vmem:[#allocation5 + $0x220] sm:$0xfc] %v3403_v0 }
  0x37   : > { %1043 = vst [vmem:[#allocation5 + $0x228] sm:$0xfc] %v3403_v0 }
  0x38   : > { %1044 = vst [vmem:[#allocation5 + $0x230] sm:$0xfc] %v3403_v0 }
  0x39   : > { %1045 = vst [vmem:[#allocation5 + $0x238] sm:$0xfc] %v3403_v0 }
  0x3a   : > { %1046 = vst [vmem:[#allocation5 + $0x280] sm:$0xfc] %v3403_v0 }
  0x3b   : > { %1047 = vst [vmem:[#allocation5 + $0x288] sm:$0xfc] %v3403_v0 }
  0x3c   : > { %1048 = vst [vmem:[#allocation5 + $0x290] sm:$0xfc] %v3403_v0 }
  0x3d   : > { %1049 = vst [vmem:[#allocation5 + $0x298] sm:$0xfc] %v3403_v0 }
  0x3e   : > { %1050 = vst [vmem:[#allocation5 + $0x2a0] sm:$0xfc] %v3403_v0 }
  0x3f   : > { %1051 = vst [vmem:[#allocation5 + $0x2a8] sm:$0xfc] %v3403_v0 }
  0x40   : > { %1052 = vst [vmem:[#allocation5 + $0x2b0] sm:$0xfc] %v3403_v0 }
  0x41   : > { %1053 = vst [vmem:[#allocation5 + $0x2b8] sm:$0xfc] %v3403_v0 }
  0x42   : > { %219 = vst.msk [vmem:[#allocation2 + $0x28] sm:$0x7f] %vm217_vm1, %v3403_v0 }
  0x43   : > { %218 = vst.msk [vmem:[#allocation2 + $0x10] sm:$0x7f] %vm217_vm1, %v3403_v0 }
  0x44   : > { %220 = vst.msk [vmem:[#allocation2 + $0x40] sm:$0x7f] %vm217_vm1, %v3403_v0 }
  0x45   : > { %221 = vst.msk [vmem:[#allocation2 + $0x58] sm:$0x7f] %vm217_vm1, %v3403_v0 }
  0x46   : > { %223 = vst.msk [vmem:[#allocation3] sm:$0xff] %vm222_vm2, %v3403_v0 }
  0x47   : > { %226 = vst.msk [vmem:[#allocation3 + $0x30] sm:$0xff] %vm222_vm2, %v3403_v0 }
  0x48   : > { %228 = vst.msk [vmem:[#allocation3 + $0x60] sm:$0xff] %vm222_vm2, %v3403_v0 }
  0x49   : > { %230 = vst.msk [vmem:[#allocation3 + $0x90] sm:$0xff] %vm222_vm2, %v3403_v0 }
  0x4a   : > { %242 = vst.msk [vmem:[#allocation4] sm:$0xff] %vm222_vm2, %v3403_v0 }
  0x4b   : > { %244 = vst.msk [vmem:[#allocation4 + $0x30] sm:$0xff] %vm222_vm2, %v3403_v0 }
  0x4c   : > { %246 = vst.msk [vmem:[#allocation4 + $0x60] sm:$0xff] %vm222_vm2, %v3403_v0 }
  0x4d   : > { %248 = vst.msk [vmem:[#allocation4 + $0x90] sm:$0xff] %vm222_vm2, %v3403_v0 }
  0x4e   : > { %233 = vst.msk [vmem:[#allocation3 + $0x10] sm:$0xff] %vm232_vm9, %v3403_v0 }
  0x4f   : > { %236 = vst.msk [vmem:[#allocation3 + $0x40] sm:$0xff] %vm232_vm9, %v3403_v0 }
  0x50   : > { %238 = vst.msk [vmem:[#allocation3 + $0x70] sm:$0xff] %vm232_vm9, %v3403_v0 }
  0x51   : > { %240 = vst.msk [vmem:[#allocation3 + $0xa0] sm:$0xff] %vm232_vm9, %v3403_v0 }
  0x52   : > { %250 = vst.msk [vmem:[#allocation4 + $0x10] sm:$0xff] %vm232_vm9, %v3403_v0 }
  0x53   : > { %252 = vst.msk [vmem:[#allocation4 + $0x40] sm:$0xff] %vm232_vm9, %v3403_v0 }
  0x54   : > { %254 = vst.msk [vmem:[#allocation4 + $0x70] sm:$0xff] %vm232_vm9, %v3403_v0 }
  0x55   : > { %256 = vst.msk [vmem:[#allocation4 + $0xa0] sm:$0xff] %vm232_vm9, %v3403_v0 }
  0x56   : > { %225 = vst.msk [vmem:[#allocation3 + $0x18] sm:$0x3] %vm224_vm11, %v3403_v0 }
  0x57   : > { %227 = vst.msk [vmem:[#allocation3 + $0x48] sm:$0x3] %vm224_vm11, %v3403_v0 }
  0x58   : > { %229 = vst.msk [vmem:[#allocation3 + $0x78] sm:$0x3] %vm224_vm11, %v3403_v0 }
  0x59   : > { %231 = vst.msk [vmem:[#allocation3 + $0xa8] sm:$0x3] %vm224_vm11, %v3403_v0 }
  0x5a   : > { %243 = vst.msk [vmem:[#allocation4 + $0x18] sm:$0x3] %vm224_vm11, %v3403_v0 }
  0x5b   : > { %245 = vst.msk [vmem:[#allocation4 + $0x48] sm:$0x3] %vm224_vm11, %v3403_v0 }
  0x5c   : > { %247 = vst.msk [vmem:[#allocation4 + $0x78] sm:$0x3] %vm224_vm11, %v3403_v0 }
  0x5d   : > { %249 = vst.msk [vmem:[#allocation4 + $0xa8] sm:$0x3] %vm224_vm11, %v3403_v0 }
  0x5e   : > { %235 = vst.msk [vmem:[#allocation3 + $0x28] sm:$0x3] %vm234_vm13, %v3403_v0 }
  0x5f   : > { %237 = vst.msk [vmem:[#allocation3 + $0x58] sm:$0x3] %vm234_vm13, %v3403_v0 }
  0x60   : > { %239 = vst.msk [vmem:[#allocation3 + $0x88] sm:$0x3] %vm234_vm13, %v3403_v0 }
  0x61   : > { %241 = vst.msk [vmem:[#allocation3 + $0xb8] sm:$0x3] %vm234_vm13, %v3403_v0 }
  0x62   : > { %251 = vst.msk [vmem:[#allocation4 + $0x28] sm:$0x3] %vm234_vm13, %v3403_v0 }
  0x63   : > { %253 = vst.msk [vmem:[#allocation4 + $0x58] sm:$0x3] %vm234_vm13, %v3403_v0 }
  0x64   : > { %255 = vst.msk [vmem:[#allocation4 + $0x88] sm:$0x3] %vm234_vm13, %v3403_v0 }
  0x65   : > { %257 = vst.msk [vmem:[#allocation4 + $0xb8] sm:$0x3] %vm234_vm13, %v3403_v0 }
  0x72   : > { %v297_v9 = vpop.permute.xlu2 %296 }
  0x73   : > { %305 = vst.msk [vmem:[#allocation2 + $0x30] sm:$0x7f] %vm270_vm3, %v297_v9 }
  0x7a   : > { %v299_v10 = vpop.permute.xlu2 %298  ;;  %v348_v21 = vld [vmem:[#allocation2 + $0x30] sm:$0x7f] }
  0x7b   : > { %v300_v11 = vsel %vm222_vm2, %v297_v9, %v299_v10  ;;  %307 = vst.msk [vmem:[#allocation2 + $0x40] sm:$0x7f] %vm212_vm0, %v299_v10  ;;  %v393_v29 = vld [vmem:[#allocation2 + $0x30] sm:$0x7f] }
  0x7c   : > { %306 = vst [vmem:[#allocation2 + $0x38] sm:$0x7f] %v300_v11  ;;  %v466_v46 = vld [vmem:[#allocation2 + $0x30] sm:$0x7f] }
  0x7d   : > { %350 = vst [vmem:[#allocation5 + $0x60] sm:$0x7f] %v348_v21  ;;  %v612_v11 = vld [vmem:[#allocation2 + $0x30] sm:$0x7f] }
  0x82   : > { %v395_v38 = vld [vmem:[#allocation2 + $0x40] sm:$0x7f] }
  0x83   : > { %v349_v33 = vld [vmem:[#allocation2 + $0x38] sm:$0x7f] }
  0x84   : > { %351 = vst [vmem:[#allocation5 + $0x68] sm:$0x7f] %v349_v33  ;;  %v394_v57 = vld [vmem:[#allocation2 + $0x38] sm:$0x7f] }
  0x85   : > { %v467_v9 = vld [vmem:[#allocation2 + $0x38] sm:$0x7f] }
  0x86   : > { %v613_v10 = vld [vmem:[#allocation2 + $0x38] sm:$0x7f] }
  0x89   : > { %v280_v12 = vpop.permute.xlu1 %279  ;;  %v263_v13 = vpop.permute.xlu0 %262 }
  0x8a   : > { %288 = vst.msk [vmem:[#allocation2 + $0x18] sm:$0x7f] %vm270_vm3, %v280_v12 }
  0x8b   : > { %271 = vst.msk [vmem:[#allocation2] sm:$0x7f] %vm270_vm3, %v263_v13 }
  0x91   : > { %v282_v14 = vpop.permute.xlu1 %281  ;;  %v265_v15 = vpop.permute.xlu0 %264  ;;  %v344_v19 = vld [vmem:[#allocation2 + $0x18] sm:$0x7f] }
  0x92   : > { %v283_v16 = vsel %vm222_vm2, %v280_v12, %v282_v14  ;;  %290 = vst.msk [vmem:[#allocation2 + $0x28] sm:$0x7f] %vm212_vm0, %v282_v14  ;;  %v266_v17 = vsel %vm222_vm2, %v263_v13, %v265_v15  ;;  %v356_v18 = vld [vmem:[#allocation2] sm:$0x7f]  ;;  %v375_v25 = vld [vmem:[#allocation2 + $0x18] sm:$0x7f] }
  0x93   : > { %289 = vst [vmem:[#allocation2 + $0x20] sm:$0x7f] %v283_v16  ;;  %362 = vrot.lane.b32.xlu2 %v356_v18, %s3405_s7  ;;  %v340_v20 = vld [vmem:[#allocation2] sm:$0x7f]  ;;  %v448_v43 = vld [vmem:[#allocation2 + $0x18] sm:$0x7f] }
  0x94   : > { %272 = vst [vmem:[#allocation2 + $0x8] sm:$0x7f] %v266_v17  ;;  %v429_v40 = vld [vmem:[#allocation2] sm:$0x7f]  ;;  %v594_v50 = vld [vmem:[#allocation2 + $0x18] sm:$0x7f] }
  0x95   : > { %273 = vst.msk [vmem:[#allocation2 + $0x10] sm:$0x7f] %vm212_vm0, %v265_v15  ;;  %v521_v53 = vld [vmem:[#allocation2 + $0x18] sm:$0x7f]  ;;  %v575_v62 = vld [vmem:[#allocation2] sm:$0x7f] }
  0x96   : > { %346 = vst [vmem:[#allocation5 + $0x50] sm:$0x7f] %v344_v19  ;;  %v502_v7 = vld [vmem:[#allocation2] sm:$0x7f]  ;;  %v540_v14 = vld [vmem:[#allocation2 + $0x38] sm:$0x7f] }
  0x97   : > { %342 = vst [vmem:[#allocation5 + $0x40] sm:$0x7f] %v340_v20  ;;  %v614_v13 = vld [vmem:[#allocation2 + $0x40] sm:$0x7f]  ;;  %v539_v15 = vld [vmem:[#allocation2 + $0x30] sm:$0x7f] }
  0x98   : > { %v541_v19 = vld [vmem:[#allocation2 + $0x40] sm:$0x7f] }
  0x99   : > { %v596_v22 = vld [vmem:[#allocation2 + $0x28] sm:$0x7f]  ;;  %v316_v23 = vpop.permute.xlu1 %315  ;;  %v314_v24 = vpop.permute.xlu0 %313  ;;  %v468_v20 = vld [vmem:[#allocation2 + $0x40] sm:$0x7f] }
  0x9a   : > { %604 = vrot.lane.b32.xlu0 %v596_v22, %s3406_s8  ;;  %324 = vst.msk [vmem:[#allocation2 + $0x58] sm:$0x7f] %vm212_vm0, %v316_v23  ;;  %v317_v26 = vsel %vm222_vm2, %v314_v24, %v316_v23  ;;  %v523_v30 = vld [vmem:[#allocation2 + $0x28] sm:$0x7f]  ;;  %v345_v31 = vld [vmem:[#allocation2 + $0x20] sm:$0x7f] }
  0x9b   : > { %381 = vrot.lane.b32.xlu2 %v375_v25, %s3405_s7  ;;  %322 = vst.msk [vmem:[#allocation2 + $0x48] sm:$0x7f] %vm270_vm3, %v314_v24  ;;  %v341_v28 = vld [vmem:[#allocation2 + $0x8] sm:$0x7f]  ;;  %v595_v49 = vld [vmem:[#allocation2 + $0x20] sm:$0x7f] }
  0x9c   : > { %v358_v27 = vld [vmem:[#allocation2 + $0x10] sm:$0x7f]  ;;  %323 = vst [vmem:[#allocation2 + $0x50] sm:$0x7f] %v317_v26  ;;  %v377_v32 = vld [vmem:[#allocation2 + $0x28] sm:$0x7f] }
  0x9d   : > { %366 = vrot.lane.b32.xlu1 %v358_v27, %s3405_s7  ;;  %343 = vst [vmem:[#allocation5 + $0x48] sm:$0x7f] %v341_v28  ;;  %v577_v42 = vld [vmem:[#allocation2 + $0x10] sm:$0x7f]  ;;  %v450_v47 = vld [vmem:[#allocation2 + $0x28] sm:$0x7f] }
  0x9e   : > { %347 = vst [vmem:[#allocation5 + $0x58] sm:$0x7f] %v345_v31  ;;  %v431_v44 = vld [vmem:[#allocation2 + $0x10] sm:$0x7f]  ;;  %v357_v51 = vld [vmem:[#allocation2 + $0x8] sm:$0x7f] }
  0x9f   : > { %v504_v48 = vld [vmem:[#allocation2 + $0x10] sm:$0x7f]  ;;  %v522_v52 = vld [vmem:[#allocation2 + $0x20] sm:$0x7f]  ;;  %v576_v61 = vld [vmem:[#allocation2 + $0x8] sm:$0x7f] }
  0xa0   : > { %v376_v54 = vld [vmem:[#allocation2 + $0x20] sm:$0x7f]  ;;  %v430_v1 = vld [vmem:[#allocation2 + $0x8] sm:$0x7f] }
  0xa1   : > { %v632_v36 = vld [vmem:[#allocation2 + $0x58] sm:$0x7f]  ;;  %v449_v5 = vld [vmem:[#allocation2 + $0x20] sm:$0x7f]  ;;  %v503_v6 = vld [vmem:[#allocation2 + $0x8] sm:$0x7f] }
  0xa2   : > { %531 = vrot.lane.b32.xlu0 %v523_v30, %s3407_s9  ;;  %v352_v34 = vld [vmem:[#allocation2 + $0x48] sm:$0x7f]  ;;  %v559_v39 = vld [vmem:[#allocation2 + $0x58] sm:$0x7f] }
  0xa3   : > { %399 = vrot.lane.b32.xlu2 %v393_v29, %s3405_s7  ;;  %v353_v35 = vld [vmem:[#allocation2 + $0x50] sm:$0x7f]  ;;  %354 = vst [vmem:[#allocation5 + $0x70] sm:$0x7f] %v352_v34  ;;  %v411_v37 = vld [vmem:[#allocation2 + $0x48] sm:$0x7f] }
  0xa4   : > { %355 = vst [vmem:[#allocation5 + $0x78] sm:$0x7f] %v353_v35  ;;  %v413_v41 = vld [vmem:[#allocation2 + $0x58] sm:$0x7f]  ;;  %v631_v55 = vld [vmem:[#allocation2 + $0x50] sm:$0x7f] }
  0xa5   : > { %385 = vrot.lane.b32.xlu1 %v377_v32, %s3405_s7  ;;  %v486_v45 = vld [vmem:[#allocation2 + $0x58] sm:$0x7f]  ;;  %v630_v56 = vld [vmem:[#allocation2 + $0x48] sm:$0x7f]  ;;  %v558_v58 = vld [vmem:[#allocation2 + $0x50] sm:$0x7f] }
  0xa6   : > { %v557_v59 = vld [vmem:[#allocation2 + $0x48] sm:$0x7f]  ;;  %v412_v60 = vld [vmem:[#allocation2 + $0x50] sm:$0x7f] }
  0xa7   : > { %v485_v2 = vld [vmem:[#allocation2 + $0x50] sm:$0x7f]  ;;  %v484_v3 = vld [vmem:[#allocation2 + $0x48] sm:$0x7f] }
  0xaa   : > { %640 = vrot.lane.b32.xlu0 %v632_v36, %s3406_s8 }
  0xab   : > { %417 = vrot.lane.b32.xlu2 %v411_v37, %s3405_s7 }
  0xad   : > { %403 = vrot.lane.b32.xlu1 %v395_v38, %s3405_s7 }
  0xb2   : > { %567 = vrot.lane.b32.xlu0 %v559_v39, %s3407_s9 }
  0xb3   : > { %435 = vrot.lane.b32.xlu2 %v429_v40, %s3408_s10 }
  0xb5   : > { %421 = vrot.lane.b32.xlu1 %v413_v41, %s3405_s7 }
  0xba   : > { %585 = vrot.lane.b32.xlu0 %v577_v42, %s3406_s8 }
  0xbb   : > { %454 = vrot.lane.b32.xlu2 %v448_v43, %s3408_s10 }
  0xbd   : > { %439 = vrot.lane.b32.xlu1 %v431_v44, %s3408_s10 }
  0xc2   : > { %494 = vrot.lane.b32.xlu0 %v486_v45, %s3408_s10 }
  0xc3   : > { %472 = vrot.lane.b32.xlu2 %v466_v46, %s3408_s10 }
  0xc5   : > { %458 = vrot.lane.b32.xlu1 %v450_v47, %s3408_s10 }
  0xca   : > { %512 = vrot.lane.b32.xlu0 %v504_v48, %s3407_s9 }
  0xcb   : > { %602 = vrot.lane.b32.xlu2 %v595_v49, %s3406_s8 }
  0xcd   : > { %600 = vrot.lane.b32.xlu1 %v594_v50, %s3406_s8 }
  0xd2   : > { %364 = vrot.lane.b32.xlu0 %v357_v51, %s3405_s7 }
  0xd3   : > { %529 = vrot.lane.b32.xlu2 %v522_v52, %s3407_s9 }
  0xd5   : > { %527 = vrot.lane.b32.xlu1 %v521_v53, %s3407_s9 }
  0xda   : > { %383 = vrot.lane.b32.xlu0 %v376_v54, %s3405_s7 }
  0xdb   : > { %638 = vrot.lane.b32.xlu2 %v631_v55, %s3406_s8 }
  0xdd   : > { %636 = vrot.lane.b32.xlu1 %v630_v56, %s3406_s8 }
  0xe2   : > { %401 = vrot.lane.b32.xlu0 %v394_v57, %s3405_s7 }
  0xe3   : > { %565 = vrot.lane.b32.xlu2 %v558_v58, %s3407_s9 }
  0xe5   : > { %563 = vrot.lane.b32.xlu1 %v557_v59, %s3407_s9 }
  0xea   : > { %419 = vrot.lane.b32.xlu0 %v412_v60, %s3405_s7 }
  0xeb   : > { %583 = vrot.lane.b32.xlu2 %v576_v61, %s3406_s8 }
  0xed   : > { %581 = vrot.lane.b32.xlu1 %v575_v62, %s3406_s8  ;;  %v3612_v63 = vpop.permute.xlu2 %362 }
  0xf2   : > { %437 = vrot.lane.b32.xlu0 %v430_v1, %s3408_s10 }
  0xf3   : > { %492 = vrot.lane.b32.xlu2 %v485_v2, %s3408_s10 }
  0xf5   : > { %490 = vrot.lane.b32.xlu1 %v484_v3, %s3408_s10  ;;  %v3617_v4 = vpop.permute.xlu2 %381  ;;  %v3409_v3 = vmov 1.0  }
  0xf6   : > { %202 = vst [vmem:[#allocation5] ss:$8 sm:$0xf] %v3409_v3 }
  0xf7   : > { %203 = vst [vmem:[#allocation5] ss:$8 sm:$0xf0] %v3409_v3 }
  0xfa   : > { %456 = vrot.lane.b32.xlu0 %v449_v5, %s3408_s10 }
  0xfb   : > { %510 = vrot.lane.b32.xlu2 %v503_v6, %s3407_s9 }
  0xfd   : > { %508 = vrot.lane.b32.xlu1 %v502_v7, %s3407_s9  ;;  %v3622_v8 = vpop.permute.xlu2 %399 }
 0x102   : > { %474 = vrot.lane.b32.xlu0 %v467_v9, %s3408_s10 }
 0x103   : > { %620 = vrot.lane.b32.xlu2 %v613_v10, %s3406_s8 }
 0x105   : > { %618 = vrot.lane.b32.xlu1 %v612_v11, %s3406_s8  ;;  %v3627_v12 = vpop.permute.xlu2 %417 }
 0x10a   : > { %622 = vrot.lane.b32.xlu0 %v614_v13, %s3406_s8 }
 0x10b   : > { %547 = vrot.lane.b32.xlu2 %v540_v14, %s3407_s9 }
 0x10c   : > { %v605_v16 = vpop.permute.xlu0 %604 }
 0x10d   : > { %545 = vrot.lane.b32.xlu1 %v539_v15, %s3407_s9  ;;  %v3632_v17 = vpop.permute.xlu2 %435 }
 0x10f   : > { %v367_v18 = vpop.permute.xlu1 %366 }
 0x112   : > { %549 = vrot.lane.b32.xlu0 %v541_v19, %s3407_s9 }
 0x114   : > { %v532_v21 = vpop.permute.xlu0 %531 }
 0x115   : > { %476 = vrot.lane.b32.xlu1 %v468_v20, %s3408_s10  ;;  %v3636_v22 = vpop.permute.xlu2 %454 }
 0x117   : > { %v386_v23 = vpop.permute.xlu1 %385 }
 0x11c   : > { %v641_v24 = vpop.permute.xlu0 %640 }
 0x11d   : > { %v3638_v25 = vpop.permute.xlu2 %472 }
 0x11f   : > { %v3640_v26 = vpop.permute.xlu1 %403 }
 0x124   : > { %v568_v27 = vpop.permute.xlu0 %567 }
 0x125   : > { %v603_v28 = vpop.permute.xlu2 %602 }
 0x126   : > { %v607_v29 = vsel %vm587_vm4, %v603_v28, %v605_v16 }
 0x127   : > { %v3643_v30 = vpop.permute.xlu1 %421  ;;  %611 = vst [vmem:[#allocation5 + $0x158] sm:$0x7f] %v607_v29 }
 0x12c   : > { %v586_v31 = vpop.permute.xlu0 %585 }
 0x12d   : > { %v530_v32 = vpop.permute.xlu2 %529 }
 0x12e   : > { %v534_v33 = vsel %vm514_vm5, %v530_v32, %v532_v21  ;;  %v691_v34 = vld [vmem:[#allocation5 + $0x158] sm:$0xff] }
 0x12f   : > { %v3646_v35 = vpop.permute.xlu1 %439  ;;  %538 = vst [vmem:[#allocation5 + $0x118] sm:$0x7f] %v534_v33  ;;  %784 = vmatpush.msra.mxu3 %v691_v34 }
 0x134   : > { %v495_v36 = vpop.permute.xlu0 %494 }
 0x135   : > { %v639_v37 = vpop.permute.xlu2 %638 }
 0x136   : > { %v643_v38 = vsel %vm587_vm4, %v639_v37, %v641_v24  ;;  %v683_v39 = vld [vmem:[#allocation5 + $0x118] sm:$0xff] }
 0x137   : > { %v3649_v40 = vpop.permute.xlu1 %458  ;;  %647 = vst [vmem:[#allocation5 + $0x178] sm:$0x7f] %v643_v38  ;;  %785 = vmatpush.msra.mxu3 %v683_v39  ;;  %v657_v38 = vld [vmem:[#allocation5 + $0x48] sm:$0xff] }
 0x138   : > { %1025 = vst [vmem:[#allocation5 + $0x118] sm:$0xfc] %v3403_v0  ;;  %v649_v39 = vld [vmem:[#allocation5 + $0x8] sm:$0xff] }
 0x13c   : > { %v513_v41 = vpop.permute.xlu0 %512 }
 0x13d   : > { %v566_v42 = vpop.permute.xlu2 %565 }
 0x13e   : > { %v570_v43 = vsel %vm514_vm5, %v566_v42, %v568_v27 }
 0x13f   : > { %v601_v44 = vpop.permute.xlu1 %600  ;;  %574 = vst [vmem:[#allocation5 + $0x138] sm:$0x7f] %v570_v43 }
 0x140   : > { %v606_v45 = vsel %vm587_vm4, %v601_v44, %v603_v28 }
 0x141   : > { %610 = vst [vmem:[#allocation5 + $0x150] sm:$0x7f] %v606_v45 }
 0x144   : > { %v365_v46 = vpop.permute.xlu0 %364 }
 0x145   : > { %v584_v47 = vpop.permute.xlu2 %583  ;;  %v369_v48 = vsel %vm368_vm6, %v3612_v63, %v365_v46  ;;  %v370_v49 = vsel %vm368_vm6, %v365_v46, %v367_v18 }
 0x146   : > { %v589_v50 = vsel %vm587_vm4, %v584_v47, %v586_v31  ;;  %373 = vst [vmem:[#allocation5 + $0x80] sm:$0x7f] %v369_v48  ;;  %v3659_v54 = vld [vmem:[#allocation5 + $0x138] sm:$0xff]  ;;  %v658_v48 = vld [vmem:[#allocation5 + $0x50] sm:$0xff] }
 0x147   : > { %v528_v51 = vpop.permute.xlu1 %527  ;;  %593 = vst [vmem:[#allocation5 + $0x148] sm:$0x7f] %v589_v50  ;;  %v659_v50 = vld [vmem:[#allocation5 + $0x58] sm:$0xff] }
 0x148   : > { %v533_v52 = vsel %vm514_vm5, %v528_v51, %v530_v32  ;;  %374 = vst [vmem:[#allocation5 + $0x88] sm:$0x7f] %v370_v49  ;;  %v690_v53 = vld [vmem:[#allocation5 + $0x150] sm:$0xff]  ;;  %v651_v51 = vld [vmem:[#allocation5 + $0x18] sm:$0xff] }
 0x149   : > { %537 = vst [vmem:[#allocation5 + $0x110] sm:$0x7f] %v533_v52  ;;  %761 = vmatpush.msra.mxu2 %v690_v53 }
 0x14a   : > { %1029 = vst [vmem:[#allocation5 + $0x138] sm:$0xfc] %v3403_v0 }
 0x14c   : > { %v384_v55 = vpop.permute.xlu0 %383 }
 0x14d   : > { %v493_v56 = vpop.permute.xlu2 %492  ;;  %v387_v57 = vsel %vm368_vm6, %v3617_v4, %v384_v55  ;;  %v388_v58 = vsel %vm368_vm6, %v384_v55, %v386_v23 }
 0x14e   : > { %v497_v59 = vsel %vm441_vm7, %v493_v56, %v495_v36  ;;  %391 = vst [vmem:[#allocation5 + $0x90] sm:$0x7f] %v387_v57  ;;  %v689_v60 = vld [vmem:[#allocation5 + $0x148] sm:$0xff]  ;;  %v656_v57 = vld [vmem:[#allocation5 + $0x40] sm:$0xff] }
 0x14f   : > { %v637_v61 = vpop.permute.xlu1 %636  ;;  %501 = vst [vmem:[#allocation5 + $0xf8] sm:$0x7f] %v497_v59  ;;  %738 = vmatpush.msra.mxu1 %v689_v60  ;;  %v3668_v1 = vld [vmem:[#allocation5 + $0x88] sm:$0xff] }
 0x150   : > { %v642_v62 = vsel %vm587_vm4, %v637_v61, %v639_v37  ;;  %392 = vst [vmem:[#allocation5 + $0x98] sm:$0x7f] %v388_v58  ;;  %v682_v63 = vld [vmem:[#allocation5 + $0x110] sm:$0xff]  ;;  %v648_v58 = vld [vmem:[#allocation5] sm:$0xff] }
 0x151   : > { %646 = vst [vmem:[#allocation5 + $0x170] sm:$0x7f] %v642_v62  ;;  %762 = vmatpush.msra.mxu2 %v682_v63 }
 0x152   : > { %1024 = vst [vmem:[#allocation5 + $0x110] sm:$0xfc] %v3403_v0 }
 0x153   : > { %1015 = vst [vmem:[#allocation5 + $0x88] sm:$0xfc] %v3403_v0 }
 0x154   : > { %v402_v2 = vpop.permute.xlu0 %401 }
 0x155   : > { %v511_v4 = vpop.permute.xlu2 %510  ;;  %v405_v5 = vsel %vm368_vm6, %v3622_v8, %v402_v2  ;;  %v406_v6 = vsel %vm368_vm6, %v402_v2, %v3640_v26  ;;  %v3677_v11 = vld [vmem:[#allocation5 + $0x90] sm:$0xff]  ;;  %v3683_v8 = vld [vmem:[#allocation5 + $0x80] sm:$0xff]  ;;  %v697_v2 = vld [vmem:[%s4760_s1 + $0x8] sm:$0x3] }
 0x156   : > { %v516_v7 = vsel %vm514_vm5, %v511_v4, %v513_v41  ;;  %409 = vst [vmem:[#allocation5 + $0xa0] sm:$0x7f] %v405_v5 }
 0x157   : > { %v564_v9 = vpop.permute.xlu1 %563  ;;  %520 = vst [vmem:[#allocation5 + $0x108] sm:$0x7f] %v516_v7  ;;  %v3680_v13 = vld [vmem:[#allocation5 + $0x98] sm:$0xff] }
 0x158   : > { %v569_v10 = vsel %vm514_vm5, %v564_v9, %v566_v42  ;;  %410 = vst [vmem:[#allocation5 + $0xa8] sm:$0x7f] %v406_v6  ;;  %v694_v55 = vld [vmem:[#allocation5 + $0x170] sm:$0xff]  ;;  %v663_v7 = vld [vmem:[#allocation5 + $0x78] sm:$0xff] }
 0x159   : > { %573 = vst [vmem:[#allocation5 + $0x130] sm:$0x7f] %v569_v10  ;;  %v654_v6 = vld [vmem:[#allocation5 + $0x30] sm:$0xff]  ;;  %v655_v10 = vld [vmem:[#allocation5 + $0x38] sm:$0xff] }
 0x15a   : > { %1016 = vst [vmem:[#allocation5 + $0x90] sm:$0xfc] %v3403_v0 }
 0x15b   : > { %1017 = vst [vmem:[#allocation5 + $0x98] sm:$0xfc] %v3403_v0 }
 0x15c   : > { %v420_v14 = vpop.permute.xlu0 %419  ;;  %1014 = vst [vmem:[#allocation5 + $0x80] sm:$0xfc] %v3403_v0 }
 0x15d   : > { %v423_v15 = vsel %vm368_vm6, %v3627_v12, %v420_v14  ;;  %v424_v16 = vsel %vm368_vm6, %v420_v14, %v3643_v30  ;;  %v3695_v23 = vld [vmem:[#allocation5 + $0xa0] sm:$0xff]  ;;  %v621_v41 = vpop.permute.xlu2 %620 }
 0x15e   : > { %427 = vst [vmem:[#allocation5 + $0xb0] sm:$0x7f] %v423_v15  ;;  %v681_v18 = vld [vmem:[#allocation5 + $0x108] sm:$0xff]  ;;  %v660_v15 = vld [vmem:[#allocation5 + $0x60] sm:$0xff] }
 0x15f   : > { %v582_v19 = vpop.permute.xlu1 %581  ;;  %428 = vst [vmem:[#allocation5 + $0xb8] sm:$0x7f] %v424_v16  ;;  %739 = vmatpush.msra.mxu1 %v681_v18  ;;  %v3698_v12 = vld [vmem:[#allocation5 + $0xa8] sm:$0xff]  ;;  %v652_v16 = vld [vmem:[#allocation5 + $0x20] sm:$0xff] }
 0x160   : > { %v588_v20 = vsel %vm587_vm4, %v582_v19, %v584_v47  ;;  %1023 = vst [vmem:[#allocation5 + $0x108] sm:$0xfc] %v3403_v0  ;;  %v3692_v21 = vld [vmem:[#allocation5 + $0x130] sm:$0xff]  ;;  %v661_v19 = vld [vmem:[#allocation5 + $0x68] sm:$0xff] }
 0x161   : > { %592 = vst [vmem:[#allocation5 + $0x140] sm:$0x7f] %v588_v20  ;;  %v653_v20 = vld [vmem:[#allocation5 + $0x28] sm:$0xff] }
 0x162   : > { %1028 = vst [vmem:[#allocation5 + $0x130] sm:$0xfc] %v3403_v0 }
 0x163   : > { %1018 = vst [vmem:[#allocation5 + $0xa0] sm:$0xfc] %v3403_v0 }
 0x164   : > { %v438_v24 = vpop.permute.xlu0 %437  ;;  %1019 = vst [vmem:[#allocation5 + $0xa8] sm:$0xfc] %v3403_v0 }
 0x165   : > { %v442_v26 = vsel %vm441_vm7, %v3632_v17, %v438_v24  ;;  %v443_v27 = vsel %vm441_vm7, %v438_v24, %v3646_v35  ;;  %v3705_v29 = vld [vmem:[#allocation5 + $0xb0] sm:$0xff]  ;;  %v548_v59 = vpop.permute.xlu2 %547 }
 0x166   : > { %446 = vst [vmem:[#allocation5 + $0xc0] sm:$0x7f] %v442_v26  ;;  %v3709_v32 = vld [vmem:[#allocation5 + $0xb8] sm:$0xff] }
 0x167   : > { %v491_v28 = vpop.permute.xlu1 %490  ;;  %447 = vst [vmem:[#allocation5 + $0xc8] sm:$0x7f] %v443_v27 }
 0x168   : > { %v496_v30 = vsel %vm441_vm7, %v491_v28, %v493_v56  ;;  %v688_v31 = vld [vmem:[#allocation5 + $0x140] sm:$0xff]  ;;  %1020 = vst [vmem:[#allocation5 + $0xb0] sm:$0xfc] %v3403_v0  ;;  %v695_v56 = vld [vmem:[#allocation5 + $0x178] sm:$0xff] }
 0x169   : > { %500 = vst [vmem:[#allocation5 + $0xf0] sm:$0x7f] %v496_v30  ;;  %715 = vmatpush.msra.mxu0 %v688_v31 }
 0x16a   : > { %1021 = vst [vmem:[#allocation5 + $0xb8] sm:$0xfc] %v3403_v0 }
 0x16c   : > { %v457_v17 = vpop.permute.xlu0 %456 }
 0x16d   : > { %v460_v33 = vsel %vm441_vm7, %v3636_v22, %v457_v17  ;;  %v461_v34 = vsel %vm441_vm7, %v457_v17, %v3649_v40  ;;  %v3721_v22 = vld [vmem:[%s4760_s1] sm:$0xff] }
 0x16e   : > { %464 = vst [vmem:[#allocation5 + $0xd0] sm:$0x7f] %v460_v33  ;;  %v673_v35 = vld [vmem:[#allocation5 + $0xc8] sm:$0xff]  ;;  %v672_v49 = vld [vmem:[#allocation5 + $0xc0] sm:$0xff] }
 0x16f   : > { %v509_v36 = vpop.permute.xlu1 %508  ;;  %465 = vst [vmem:[#allocation5 + $0xd8] sm:$0x7f] %v461_v34  ;;  %740 = vmatpush.msra.mxu1 %v673_v35 }
 0x170   : > { %v515_v37 = vsel %vm514_vm5, %v509_v36, %v511_v4  ;;  %v678_v63 = vld [vmem:[#allocation5 + $0xf0] sm:$0xff] }
 0x171   : > { %519 = vst [vmem:[#allocation5 + $0x100] sm:$0x7f] %v515_v37  ;;  %741 = vmatpush.msra.mxu1 %v3668_v1  ;;  %v679_v1 = vld [vmem:[#allocation5 + $0xf8] sm:$0xff]  ;;  %v662_v4 = vld [vmem:[#allocation5 + $0x70] sm:$0xff] }
 0x173   : > { %742 = vmatpush.msra.mxu1 %v657_v38 }
 0x174   : > { %v3723_v40 = vpop.permute.xlu0 %474 }
 0x175   : > { %743 = vmatpush.msra.mxu1 %v649_v39  ;;  %v478_v42 = vsel %vm441_vm7, %v3638_v25, %v3723_v40  ;;  %v674_v43 = vld [vmem:[#allocation5 + $0xd0] sm:$0xff] }
 0x176   : > { %482 = vst [vmem:[#allocation5 + $0xe0] sm:$0x7f] %v478_v42  ;;  %3204 = vmatmul.msk.f32.vlgmr.msra.gmra.mxu1 %vm698_vm8, %v3721_v22  ;;  %763 = vmatpush.msra.mxu2 %v674_v43  ;;  %v675_v44 = vld [vmem:[#allocation5 + $0xd8] sm:$0xff]  ;;  %v650_v25 = vld [vmem:[#allocation5 + $0x10] sm:$0xff] }
 0x177   : > { %v619_v45 = vpop.permute.xlu1 %618  ;;  %786 = vmatpush.msra.mxu3 %v675_v44 }
 0x178   : > { %v624_v46 = vsel %vm587_vm4, %v619_v45, %v621_v41  ;;  %v680_v47 = vld [vmem:[#allocation5 + $0x100] sm:$0xff]  ;;  %764 = vmatpush.msra.mxu2 %v3677_v11 }
 0x179   : > { %628 = vst [vmem:[#allocation5 + $0x160] sm:$0x7f] %v624_v46  ;;  %716 = vmatpush.msra.mxu0 %v680_v47  ;;  %787 = vmatpush.msra.mxu3 %v3680_v13 }
 0x17a   : > { %1022 = vst [vmem:[#allocation5 + $0x100] sm:$0xfc] %v3403_v0  ;;  %765 = vmatpush.msra.mxu2 %v658_v48 }
 0x17b   : > { %717 = vmatpush.msra.mxu0 %v672_v49  ;;  %788 = vmatpush.msra.mxu3 %v659_v50 }
 0x17c   : > { %766 = vmatpush.msra.mxu2 %v650_v25  ;;  %v623_v52 = vpop.permute.xlu0 %622 }
 0x17d   : > { %718 = vmatpush.msra.mxu0 %v3683_v8  ;;  %789 = vmatpush.msra.mxu3 %v651_v51  ;;  %v625_v53 = vsel %vm587_vm4, %v621_v41, %v623_v52  ;;  %v676_v8 = vld [vmem:[#allocation5 + $0xe0] sm:$0xff] }
 0x17e   : > { %629 = vst [vmem:[#allocation5 + $0x168] sm:$0x7f] %v625_v53  ;;  %853 = vmatpush.msrb.mxu2 %v694_v55  ;;  %3208 = vmatmul.msk.f32.vlgmr.msra.gmra.mxu3 %vm698_vm8, %v3721_v22 }
 0x17f   : > { %876 = vmatpush.msrb.mxu3 %v695_v56  ;;  %v546_v60 = vpop.permute.xlu1 %545  ;;  %719 = vmatpush.msra.mxu0 %v656_v57 }
 0x180   : > { %3206 = vmatmul.msk.f32.vlgmr.msra.gmra.mxu2 %vm698_vm8, %v3721_v22  ;;  %v551_v61 = vsel %vm514_vm5, %v546_v60, %v548_v59  ;;  %v692_v62 = vld [vmem:[#allocation5 + $0x160] sm:$0xff]  ;;  %3205 = vmatmul.msk.f32.gmra.mxu1 %vm698_vm8, %v697_v2 }
 0x181   : > { %854 = vmatpush.msrb.mxu2 %v3692_v21  ;;  %877 = vmatpush.msrb.mxu3 %v3659_v54  ;;  %555 = vst [vmem:[#allocation5 + $0x120] sm:$0x7f] %v551_v61 }
 0x182   : > { %720 = vmatpush.msra.mxu0 %v648_v58 }
 0x183   : > { %3202 = vmatmul.msk.f32.vlgmr.msra.gmra.mxu0 %vm698_vm8, %v3721_v22  ;;  %855 = vmatpush.msrb.mxu2 %v678_v63 }
 0x184   : > { %807 = vmatpush.msrb.mxu0 %v692_v62  ;;  %878 = vmatpush.msrb.mxu3 %v679_v1  ;;  %v550_v54 = vpop.permute.xlu0 %549 }
 0x185   : > { %856 = vmatpush.msrb.mxu2 %v3705_v29  ;;  %v552_v3 = vsel %vm514_vm5, %v548_v59, %v550_v54  ;;  %v693_v5 = vld [vmem:[#allocation5 + $0x168] sm:$0xff] }
 0x186   : > { %879 = vmatpush.msrb.mxu3 %v3709_v32  ;;  %556 = vst [vmem:[#allocation5 + $0x128] sm:$0x7f] %v552_v3  ;;  %830 = vmatpush.msrb.mxu1 %v693_v5 }
 0x187   : > { %857 = vmatpush.msrb.mxu2 %v662_v4  ;;  %v477_v9 = vpop.permute.xlu1 %476  ;;  %3209 = vmatmul.msk.f32.gmra.mxu3 %vm698_vm8, %v697_v2 }
 0x188   : > { %880 = vmatpush.msrb.mxu3 %v663_v7  ;;  %3207 = vmatmul.msk.f32.gmra.mxu2 %vm698_vm8, %v697_v2  ;;  %v479_v11 = vsel %vm441_vm7, %v3723_v40, %v477_v9  ;;  %v684_v13 = vld [vmem:[#allocation5 + $0x120] sm:$0xff] }
 0x189   : > { %858 = vmatpush.msrb.mxu2 %v654_v6  ;;  %483 = vst [vmem:[#allocation5 + $0xe8] sm:$0x7f] %v479_v11  ;;  %808 = vmatpush.msrb.mxu0 %v684_v13 }
 0x18a   : > { %1026 = vst [vmem:[#allocation5 + $0x120] sm:$0xfc] %v3403_v0  ;;  %881 = vmatpush.msrb.mxu3 %v655_v10 }
 0x18b   : > { %3203 = vmatmul.msk.f32.gmra.mxu0 %vm698_vm8, %v697_v2 }
 0x18c   : > { %809 = vmatpush.msrb.mxu0 %v676_v8 }
 0x18d   : > { %v685_v14 = vld [vmem:[#allocation5 + $0x128] sm:$0xff] }
 0x18e   : > { %810 = vmatpush.msrb.mxu0 %v3695_v23  ;;  %831 = vmatpush.msrb.mxu1 %v685_v14  ;;  %1027 = vst [vmem:[#allocation5 + $0x128] sm:$0xfc] %v3403_v0 }
 0x18f   : > { %3216 = vmatmul.msk.f32.vlgmr.msrb.gmra.mxu3 %vm698_vm8, %v3721_v22 }
 0x190   : > { %811 = vmatpush.msrb.mxu0 %v660_v15  ;;  %3214 = vmatmul.msk.f32.vlgmr.msrb.gmra.mxu2 %vm698_vm8, %v3721_v22  ;;  %v677_v18 = vld [vmem:[#allocation5 + $0xe8] sm:$0xff] }
 0x191   : > { %832 = vmatpush.msrb.mxu1 %v677_v18 }
 0x192   : > { %812 = vmatpush.msrb.mxu0 %v652_v16 }
 0x193   : > { %3210 = vmatmul.msk.f32.vlgmr.msrb.gmra.mxu0 %vm698_vm8, %v3721_v22  ;;  %833 = vmatpush.msrb.mxu1 %v3698_v12 }
 0x195   : > { %834 = vmatpush.msrb.mxu1 %v661_v19 }
 0x197   : > { %835 = vmatpush.msrb.mxu1 %v653_v20  ;;  %3217 = vmatmul.msk.f32.gmra.mxu3 %vm698_vm8, %v697_v2 }
 0x198   : > { %3215 = vmatmul.msk.f32.gmra.mxu2 %vm698_vm8, %v697_v2  ;;  %3212 = vmatmul.msk.f32.vlgmr.msrb.gmra.mxu1 %vm698_vm8, %v3721_v22 }
 0x19b   : > { %3211 = vmatmul.msk.f32.gmra.mxu0 %vm698_vm8, %v697_v2 }
 0x1a0   : > { %3213 = vmatmul.msk.f32.gmra.mxu1 %vm698_vm8, %v697_v2 }
 0x1f3   : > { %v745_v21 = vpop.f32.mrf.mxu1 }
 0x1f4   : > { %v890_v23 = vmax.f32 %v745_v21, 0.0 }
 0x1f6   : > { %911 = vrot.lane.b32.xlu0 %v890_v23, %s3404_s6 }
 0x1fd   : > { %v748_v28 = vpop.f32.mrf.mxu1 }
 0x1fe   : > { %v898_v31 = vmax.f32 %v748_v28, 0.0 }
 0x200   : > { %v722_v12 = vpop.f32.mrf.mxu0 }
 0x201   : > { %v889_v24 = vmax.f32 %v722_v12, 0.0  ;;  %v791_v29 = vpop.f32.mrf.mxu3 }
 0x202   : > { %v892_v30 = vmax.f32 %v791_v29, 0.0 }
 0x203   : > { %909 = vrot.lane.b32.xlu2 %v889_v24, %s3404_s6  ;;  %v768_v26 = vpop.f32.mrf.mxu2 }
 0x204   : > { %v891_v27 = vmax.f32 %v768_v26, 0.0  ;;  %939 = vrot.lane.b32.xlu1 %v892_v30, %s3404_s6 }
 0x206   : > { %937 = vrot.lane.b32.xlu0 %v891_v27, %s3404_s6 }
 0x208   : > { %v725_v32 = vpop.f32.mrf.mxu0 }
 0x209   : > { %v897_v17 = vmax.f32 %v725_v32, 0.0 }
 0x20a   : > { %v794_v34 = vpop.f32.mrf.mxu3 }
 0x20b   : > { %915 = vrot.lane.b32.xlu2 %v898_v31, %s3404_s6  ;;  %v771_v33 = vpop.f32.mrf.mxu2  ;;  %v900_v35 = vmax.f32 %v794_v34, 0.0 }
 0x20c   : > { %v899_v36 = vmax.f32 %v771_v33, 0.0  ;;  %913 = vrot.lane.b32.xlu1 %v897_v17, %s3404_s6 }
 0x20e   : > { %943 = vrot.lane.b32.xlu0 %v900_v35, %s3404_s6 }
 0x210   : > { %v814_v37 = vpop.f32.mrf.mxu0 }
 0x211   : > { %v893_v38 = vmax.f32 %v814_v37, 0.0 }
 0x212   : > { %v883_v39 = vpop.f32.mrf.mxu3 }
 0x213   : > { %941 = vrot.lane.b32.xlu2 %v899_v36, %s3404_s6  ;;  %v896_v40 = vmax.f32 %v883_v39, 0.0  ;;  %v860_v44 = vpop.f32.mrf.mxu2 }
 0x214   : > { %964 = vrot.lane.b32.xlu1 %v893_v38, %s3404_s6  ;;  %v895_v46 = vmax.f32 %v860_v44, 0.0 }
 0x215   : > { %v837_v22 = vpop.f32.mrf.mxu1 }
 0x216   : > { %v894_v41 = vmax.f32 %v837_v22, 0.0  ;;  %993 = vrot.lane.b32.xlu0 %v896_v40, %s3404_s6 }
 0x218   : > { %v817_v42 = vpop.f32.mrf.mxu0 }
 0x219   : > { %v901_v43 = vmax.f32 %v817_v42, 0.0 }
 0x21a   : > { %v886_v48 = vpop.f32.mrf.mxu3 }
 0x21b   : > { %966 = vrot.lane.b32.xlu2 %v894_v41, %s3404_s6  ;;  %v904_v25 = vmax.f32 %v886_v48, 0.0  ;;  %v863_v49 = vpop.f32.mrf.mxu2 }
 0x21c   : > { %v903_v50 = vmax.f32 %v863_v49, 0.0 }
 0x21d   : > { %v840_v45 = vpop.f32.mrf.mxu1 }
 0x21e   : > { %968 = vrot.lane.b32.xlu0 %v901_v43, %s3404_s6  ;;  %v902_v47 = vmax.f32 %v840_v45, 0.0 }
 0x220   : > { %970 = vrot.lane.b32.xlu1 %v902_v47, %s3404_s6 }
 0x223   : > { %991 = vrot.lane.b32.xlu2 %v895_v46, %s3404_s6 }
 0x228   : > { %995 = vrot.lane.b32.xlu1 %v903_v50, %s3404_s6 }
 0x22b   : > { %997 = vrot.lane.b32.xlu2 %v904_v25, %s3404_s6 }
 0x25d   : > { %v910_v51 = vpop.permute.xlu2 %909 }
 0x25e   : > { %926 = vst.msk [vmem:[#allocation3] sm:$0xff] %vm925_vm10, %v910_v51 }
 0x265   : > { %v3798_v52 = vld [vmem:[#allocation3] sm:$0xff]  ;;  %v916_v61 = vpop.permute.xlu2 %915 }
 0x266   : > { %1098 = vrot.lane.b32.xlu0 %v3798_v52, %s3405_s7  ;;  %932 = vst.msk [vmem:[#allocation3 + $0x28] sm:$0x3] %vm224_vm11, %v916_v61 }
 0x268   : > { %v912_v53 = vpop.permute.xlu0 %911 }
 0x269   : > { %v3803_v55 = vsel %vm222_vm2, %v910_v51, %v912_v53  ;;  %928 = vst.msk [vmem:[#allocation3 + $0x10] sm:$0xff] %vm222_vm2, %v912_v53 }
 0x26a   : > { %1100 = vrot.lane.b32.xlu1 %v3803_v55, %s3405_s7 }
 0x26d   : > { %v942_v2 = vpop.permute.xlu2 %941  ;;  %v1091_v23 = vld [vmem:[#allocation3 + $0x28] sm:$0x3] }
 0x26e   : > { %1242 = vrot.lane.b32.xlu0 %v3798_v52, %s3408_s10  ;;  %957 = vst.msk [vmem:[#allocation3 + $0x48] sm:$0x3] %vm929_vm12, %v942_v2  ;;  %v1235_v29 = vld [vmem:[#allocation3 + $0x28] sm:$0x3] }
 0x26f   : > { %v1523_v34 = vld [vmem:[#allocation3 + $0x28] sm:$0x3] }
 0x270   : > { %v1088_v56 = vld [vmem:[#allocation3 + $0x10] sm:$0xff]  ;;  %v1379_v39 = vld [vmem:[#allocation3 + $0x28] sm:$0x3] }
 0x271   : > { %1102 = vrot.lane.b32.xlu2 %v1088_v56, %s3405_s7 }
 0x272   : > { %1244 = vrot.lane.b32.xlu1 %v3803_v55, %s3408_s10 }
 0x275   : > { %v967_v4 = vpop.permute.xlu2 %966  ;;  %v1064_v9 = vld [vmem:[#allocation3 + $0x48] sm:$0x3] }
 0x276   : > { %1530 = vrot.lane.b32.xlu0 %v3798_v52, %s3406_s8  ;;  %v940_v58 = vpop.permute.xlu1 %939  ;;  %983 = vst.msk [vmem:[#allocation3 + $0x70] sm:$0xff] %vm222_vm2, %v967_v4  ;;  %v1125_v36 = vld [vmem:[#allocation3 + $0x48] sm:$0x3] }
 0x277   : > { %956 = vst.msk [vmem:[#allocation3 + $0x40] sm:$0xff] %vm222_vm2, %v940_v58  ;;  %v1269_v41 = vld [vmem:[#allocation3 + $0x48] sm:$0x3] }
 0x278   : > { %v938_v57 = vpop.permute.xlu0 %937  ;;  %1068 = vst [vmem:[#allocation5 + $0x90] sm:$0x3] %v1064_v9  ;;  %v1557_v45 = vld [vmem:[#allocation3 + $0x48] sm:$0x3] }
 0x279   : > { %954 = vst.msk [vmem:[#allocation3 + $0x30] sm:$0xff] %vm925_vm10, %v938_v57  ;;  %1246 = vrot.lane.b32.xlu2 %v1088_v56, %s3408_s10  ;;  %v3820_v59 = vsel %vm222_vm2, %v938_v57, %v940_v58  ;;  %v1413_v49 = vld [vmem:[#allocation3 + $0x48] sm:$0x3] }
 0x27a   : > { %1532 = vrot.lane.b32.xlu1 %v3803_v55, %s3406_s8 }
 0x27d   : > { %v992_v11 = vpop.permute.xlu2 %991 }
 0x27e   : > { %1386 = vrot.lane.b32.xlu0 %v3798_v52, %s3407_s9  ;;  %v914_v60 = vpop.permute.xlu1 %913  ;;  %v1124_v3 = vld [vmem:[#allocation3 + $0x40] sm:$0xff]  ;;  %1008 = vst.msk [vmem:[#allocation3 + $0x90] sm:$0xff] %vm925_vm10, %v992_v11 }
 0x27f   : > { %930 = vst.msk [vmem:[#allocation3 + $0x18] sm:$0x3] %vm929_vm12, %v914_v60  ;;  %v918_v63 = vsel %vm222_vm2, %v914_v60, %v916_v61 }
 0x280   : > { %v3838_v62 = vld [vmem:[#allocation3 + $0x30] sm:$0xff]  ;;  %931 = vst [vmem:[#allocation3 + $0x20] sm:$0x3] %v918_v63  ;;  %v944_v6 = vpop.permute.xlu0 %943 }
 0x281   : > { %1534 = vrot.lane.b32.xlu2 %v1088_v56, %s3406_s8  ;;  %v946_v0 = vsel %vm222_vm2, %v942_v2, %v944_v6  ;;  %959 = vst.msk [vmem:[#allocation3 + $0x58] sm:$0x3] %vm224_vm11, %v944_v6 }
 0x282   : > { %1388 = vrot.lane.b32.xlu1 %v3803_v55, %s3407_s9  ;;  %958 = vst [vmem:[#allocation3 + $0x50] sm:$0x3] %v946_v0 }
 0x285   : > { %v998_v16 = vpop.permute.xlu2 %997  ;;  %v3904_v18 = vld [vmem:[#allocation3 + $0x90] sm:$0xff] }
 0x286   : > { %1134 = vrot.lane.b32.xlu0 %v3838_v62, %s3405_s7  ;;  %v1056_v1 = vld [vmem:[#allocation3 + $0x18] sm:$0x3]  ;;  %v965_v5 = vpop.permute.xlu1 %964  ;;  %1013 = vst.msk [vmem:[#allocation3 + $0xb8] sm:$0x3] %vm224_vm11, %v998_v16 }
 0x287   : > { %1060 = vst [vmem:[#allocation5 + $0x80] sm:$0x3] %v1056_v1  ;;  %v1057_v54 = vld [vmem:[#allocation3 + $0x20] sm:$0x3]  ;;  %v3880_v7 = vsel %vm222_vm2, %v965_v5, %v967_v4  ;;  %v1089_v15 = vld [vmem:[#allocation3 + $0x18] sm:$0x3] }
 0x288   : > { %1061 = vst [vmem:[#allocation5 + $0x88] sm:$0x3] %v1057_v54  ;;  %v994_v13 = vpop.permute.xlu0 %993  ;;  %v1090_v19 = vld [vmem:[#allocation3 + $0x20] sm:$0x3]  ;;  %v1233_v20 = vld [vmem:[#allocation3 + $0x18] sm:$0x3] }
 0x289   : > { %1390 = vrot.lane.b32.xlu2 %v1088_v56, %s3407_s9  ;;  %981 = vst.msk [vmem:[#allocation3 + $0x60] sm:$0xff] %vm925_vm10, %v965_v5  ;;  %v3895_v8 = vsel %vm222_vm2, %v992_v11, %v994_v13  ;;  %v1065_v14 = vld [vmem:[#allocation3 + $0x50] sm:$0x3]  ;;  %v1234_v12 = vld [vmem:[#allocation3 + $0x20] sm:$0x3] }
 0x28a   : > { %1136 = vrot.lane.b32.xlu1 %v3820_v59, %s3405_s7  ;;  %1075 = vst [vmem:[#allocation5 + $0x68] sm:$0xff] %v3880_v7  ;;  %v1521_v24 = vld [vmem:[#allocation3 + $0x18] sm:$0x3]  ;;  %v1522_v30 = vld [vmem:[#allocation3 + $0x20] sm:$0x3]  ;;  %v1160_v54 = vld [vmem:[#allocation3 + $0x70] sm:$0xff] }
 0x28b   : > { %1010 = vst.msk [vmem:[#allocation3 + $0xa0] sm:$0xff] %vm222_vm2, %v994_v13  ;;  %v1377_v31 = vld [vmem:[#allocation3 + $0x18] sm:$0x3]  ;;  %v1378_v35 = vld [vmem:[#allocation3 + $0x20] sm:$0x3] }
 0x28c   : > { %1069 = vst [vmem:[#allocation5 + $0x98] sm:$0x3] %v1065_v14  ;;  %v1126_v22 = vld [vmem:[#allocation3 + $0x50] sm:$0x3]  ;;  %v1127_v42 = vld [vmem:[#allocation3 + $0x58] sm:$0x3] }
 0x28d   : > { %1083 = vst [vmem:[#allocation5 + $0x78] sm:$0xff] %v3895_v8  ;;  %v1270_v43 = vld [vmem:[#allocation3 + $0x50] sm:$0x3]  ;;  %v1271_v47 = vld [vmem:[#allocation3 + $0x58] sm:$0x3] }
 0x28e   : > { %1278 = vrot.lane.b32.xlu0 %v3838_v62, %s3408_s10  ;;  %1082 = vst [vmem:[#allocation5 + $0x70] sm:$0xff] %v3904_v18  ;;  %v1558_v48 = vld [vmem:[#allocation3 + $0x50] sm:$0x3]  ;;  %v1559_v53 = vld [vmem:[#allocation3 + $0x58] sm:$0x3] }
 0x28f   : > { %v1414_v56 = vld [vmem:[#allocation3 + $0x50] sm:$0x3]  ;;  %v1415_v61 = vld [vmem:[#allocation3 + $0x58] sm:$0x3] }
 0x290   : > { %v3891_v10 = vld [vmem:[#allocation3 + $0x60] sm:$0xff]  ;;  %v969_v21 = vpop.permute.xlu0 %968 }
 0x291   : > { %1138 = vrot.lane.b32.xlu2 %v1124_v3, %s3405_s7  ;;  %1074 = vst [vmem:[#allocation5 + $0x60] sm:$0xff] %v3891_v10 }
 0x292   : > { %1280 = vrot.lane.b32.xlu1 %v3820_v59, %s3408_s10  ;;  %984 = vst.msk [vmem:[#allocation3 + $0x78] sm:$0x3] %vm929_vm12, %v969_v21  ;;  %v971_v27 = vpop.permute.xlu1 %970 }
 0x293   : > { %v973_v28 = vsel %vm222_vm2, %v969_v21, %v971_v27  ;;  %986 = vst.msk [vmem:[#allocation3 + $0x88] sm:$0x3] %vm224_vm11, %v971_v27 }
 0x294   : > { %985 = vst [vmem:[#allocation3 + $0x80] sm:$0x3] %v973_v28 }
 0x296   : > { %1566 = vrot.lane.b32.xlu0 %v3838_v62, %s3406_s8 }
 0x299   : > { %1282 = vrot.lane.b32.xlu2 %v1124_v3, %s3408_s10  ;;  %v1072_v26 = vld [vmem:[#allocation3 + $0x78] sm:$0x3] }
 0x29a   : > { %1568 = vrot.lane.b32.xlu1 %v3820_v59, %s3406_s8  ;;  %1076 = vst [vmem:[#allocation5 + $0xa0] sm:$0x3] %v1072_v26  ;;  %v996_v32 = vpop.permute.xlu1 %995 }
 0x29b   : > { %v1073_v17 = vld [vmem:[#allocation3 + $0x80] sm:$0x3]  ;;  %v1000_v33 = vsel %vm222_vm2, %v996_v32, %v998_v16  ;;  %1011 = vst.msk [vmem:[#allocation3 + $0xa8] sm:$0x3] %vm929_vm12, %v996_v32 }
 0x29c   : > { %1077 = vst [vmem:[#allocation5 + $0xa8] sm:$0x3] %v1073_v17  ;;  %v1196_v16 = vld [vmem:[#allocation3 + $0xa0] sm:$0xff] }
 0x29d   : > { %1012 = vst [vmem:[#allocation3 + $0xb0] sm:$0x3] %v1000_v33  ;;  %v1162_v17 = vld [vmem:[#allocation3 + $0x80] sm:$0x3] }
 0x29e   : > { %1422 = vrot.lane.b32.xlu0 %v3838_v62, %s3407_s9 }
 0x2a1   : > { %1570 = vrot.lane.b32.xlu2 %v1124_v3, %s3406_s8 }
 0x2a2   : > { %1424 = vrot.lane.b32.xlu1 %v3820_v59, %s3407_s9  ;;  %v1080_v37 = vld [vmem:[#allocation3 + $0xa8] sm:$0x3] }
 0x2a3   : > { %1084 = vst [vmem:[#allocation5 + $0xb0] sm:$0x3] %v1080_v37 }
 0x2a4   : > { %v1081_v38 = vld [vmem:[#allocation3 + $0xb0] sm:$0x3] }
 0x2a5   : > { %1085 = vst [vmem:[#allocation5 + $0xb8] sm:$0x3] %v1081_v38  ;;  %v1163_v38 = vld [vmem:[#allocation3 + $0x88] sm:$0x3] }
 0x2a6   : > { %1104 = vrot.lane.b32.xlu0 %v1089_v15, %s3405_s7 }
 0x2a9   : > { %1426 = vrot.lane.b32.xlu2 %v1124_v3, %s3407_s9 }
 0x2aa   : > { %1106 = vrot.lane.b32.xlu1 %v1090_v19, %s3405_s7 }
 0x2ae   : > { %1248 = vrot.lane.b32.xlu0 %v1233_v20, %s3408_s10 }
 0x2b1   : > { %1108 = vrot.lane.b32.xlu2 %v1091_v23, %s3405_s7 }
 0x2b2   : > { %1250 = vrot.lane.b32.xlu1 %v1234_v12, %s3408_s10 }
 0x2b6   : > { %1536 = vrot.lane.b32.xlu0 %v1521_v24, %s3406_s8 }
 0x2b9   : > { %1252 = vrot.lane.b32.xlu2 %v1235_v29, %s3408_s10  ;;  %v1161_v29 = vld [vmem:[#allocation3 + $0x78] sm:$0x3] }
 0x2ba   : > { %1538 = vrot.lane.b32.xlu1 %v1522_v30, %s3406_s8 }
 0x2be   : > { %1392 = vrot.lane.b32.xlu0 %v1377_v31, %s3407_s9 }
 0x2c1   : > { %1540 = vrot.lane.b32.xlu2 %v1523_v34, %s3406_s8  ;;  %v1593_v34 = vld [vmem:[#allocation3 + $0x78] sm:$0x3] }
 0x2c2   : > { %1394 = vrot.lane.b32.xlu1 %v1378_v35, %s3407_s9 }
 0x2c6   : > { %1140 = vrot.lane.b32.xlu0 %v1125_v36, %s3405_s7 }
 0x2c9   : > { %1396 = vrot.lane.b32.xlu2 %v1379_v39, %s3407_s9  ;;  %v1594_v39 = vld [vmem:[#allocation3 + $0x80] sm:$0x3] }
 0x2ca   : > { %1142 = vrot.lane.b32.xlu1 %v1126_v22, %s3405_s7 }
 0x2cb   : > { %v3927_v40 = vpop.permute.xlu2 %1102 }
 0x2ce   : > { %1284 = vrot.lane.b32.xlu0 %v1269_v41, %s3408_s10  ;;  %v1449_v41 = vld [vmem:[#allocation3 + $0x78] sm:$0x3] }
 0x2d1   : > { %1144 = vrot.lane.b32.xlu2 %v1127_v42, %s3405_s7 }
 0x2d2   : > { %1286 = vrot.lane.b32.xlu1 %v1270_v43, %s3408_s10 }
 0x2d3   : > { %v3932_v44 = vpop.permute.xlu2 %1246 }
 0x2d6   : > { %1572 = vrot.lane.b32.xlu0 %v1557_v45, %s3406_s8 }
 0x2d8   : > { %v3935_v46 = vpop.permute.xlu0 %1098 }
 0x2d9   : > { %1288 = vrot.lane.b32.xlu2 %v1271_v47, %s3408_s10 }
 0x2da   : > { %1574 = vrot.lane.b32.xlu1 %v1558_v48, %s3406_s8 }
 0x2db   : > { %v3939_v25 = vpop.permute.xlu2 %1534 }
 0x2dc   : > { %v3941_v50 = vpop.permute.xlu1 %1100 }
 0x2de   : > { %1428 = vrot.lane.b32.xlu0 %v1413_v49, %s3407_s9 }
 0x2e0   : > { %v3944_v51 = vpop.permute.xlu0 %1242 }
 0x2e1   : > { %1576 = vrot.lane.b32.xlu2 %v1559_v53, %s3406_s8 }
 0x2e2   : > { %1430 = vrot.lane.b32.xlu1 %v1414_v56, %s3407_s9 }
 0x2e3   : > { %v3948_v57 = vpop.permute.xlu2 %1390 }
 0x2e4   : > { %v3950_v58 = vpop.permute.xlu1 %1244 }
 0x2e6   : > { %1170 = vrot.lane.b32.xlu0 %v3891_v10, %s3405_s7 }
 0x2e8   : > { %v3954_v60 = vpop.permute.xlu0 %1530 }
 0x2e9   : > { %1432 = vrot.lane.b32.xlu2 %v1415_v61, %s3407_s9  ;;  %v1595_v61 = vld [vmem:[#allocation3 + $0x88] sm:$0x3] }
 0x2ea   : > { %1172 = vrot.lane.b32.xlu1 %v3880_v7, %s3405_s7 }
 0x2eb   : > { %v3959_v63 = vpop.permute.xlu2 %1138 }
 0x2ec   : > { %v3961_v1 = vpop.permute.xlu1 %1532 }
 0x2ed   : > { %v1542_v49 = vsel %vm587_vm4, %v3954_v60, %v3961_v1  ;;  %v1543_v56 = vsel %vm587_vm4, %v3961_v1, %v3939_v25 }
 0x2ee   : > { %1314 = vrot.lane.b32.xlu0 %v3891_v10, %s3408_s10 }
 0x2f0   : > { %v3965_v2 = vpop.permute.xlu0 %1386 }
 0x2f1   : > { %1174 = vrot.lane.b32.xlu2 %v1160_v54, %s3405_s7 }
 0x2f2   : > { %1316 = vrot.lane.b32.xlu1 %v3880_v7, %s3408_s10 }
 0x2f3   : > { %v3970_v3 = vpop.permute.xlu2 %1282 }
 0x2f4   : > { %v3972_v4 = vpop.permute.xlu1 %1388 }
 0x2f5   : > { %v1398_v1 = vsel %vm514_vm5, %v3965_v2, %v3972_v4  ;;  %v1254_v2 = vsel %vm441_vm7, %v3944_v51, %v3950_v58 }
 0x2f6   : > { %1602 = vrot.lane.b32.xlu0 %v3891_v10, %s3406_s8 }
 0x2f8   : > { %v3976_v5 = vpop.permute.xlu0 %1134 }
 0x2f9   : > { %1318 = vrot.lane.b32.xlu2 %v1160_v54, %s3408_s10 }
 0x2fa   : > { %1604 = vrot.lane.b32.xlu1 %v3880_v7, %s3406_s8 }
 0x2fb   : > { %v3981_v6 = vpop.permute.xlu2 %1570 }
 0x2fc   : > { %v3983_v0 = vpop.permute.xlu1 %1136 }
 0x2fe   : > { %1458 = vrot.lane.b32.xlu0 %v3891_v10, %s3407_s9 }
 0x300   : > { %v3987_v9 = vpop.permute.xlu0 %1278 }
 0x301   : > { %1606 = vrot.lane.b32.xlu2 %v1160_v54, %s3406_s8 }
 0x302   : > { %1460 = vrot.lane.b32.xlu1 %v3880_v7, %s3407_s9 }
 0x303   : > { %v3992_v11 = vpop.permute.xlu2 %1426 }
 0x304   : > { %v3994_v13 = vpop.permute.xlu1 %1280 }
 0x306   : > { %1206 = vrot.lane.b32.xlu0 %v3904_v18, %s3405_s7 }
 0x308   : > { %v3998_v14 = vpop.permute.xlu0 %1566 }
 0x309   : > { %1462 = vrot.lane.b32.xlu2 %v1160_v54, %s3407_s9  ;;  %v1450_v54 = vld [vmem:[#allocation3 + $0x80] sm:$0x3] }
 0x30a   : > { %1208 = vrot.lane.b32.xlu1 %v3895_v8, %s3405_s7 }
 0x30b   : > { %v1109_v10 = vpop.permute.xlu2 %1108 }
 0x30c   : > { %v4003_v15 = vpop.permute.xlu1 %1568 }
 0x30e   : > { %1638 = vrot.lane.b32.xlu0 %v3904_v18, %s3406_s8 }
 0x310   : > { %v4007_v7 = vpop.permute.xlu0 %1422 }
 0x311   : > { %1210 = vrot.lane.b32.xlu2 %v1196_v16, %s3405_s7 }
 0x312   : > { %1640 = vrot.lane.b32.xlu1 %v3895_v8, %s3406_s8 }
 0x313   : > { %v1253_v19 = vpop.permute.xlu2 %1252 }
 0x314   : > { %v4012_v20 = vpop.permute.xlu1 %1424 }
 0x316   : > { %1494 = vrot.lane.b32.xlu0 %v3904_v18, %s3407_s9 }
 0x318   : > { %v1105_v21 = vpop.permute.xlu0 %1104 }
 0x319   : > { %1642 = vrot.lane.b32.xlu2 %v1196_v16, %s3406_s8 }
 0x31a   : > { %1496 = vrot.lane.b32.xlu1 %v3895_v8, %s3407_s9 }
 0x31b   : > { %v1541_v23 = vpop.permute.xlu2 %1540 }
 0x31c   : > { %v1107_v12 = vpop.permute.xlu1 %1106 }
 0x31d   : > { %v1112_v24 = vsel %vm368_vm6, %v1105_v21, %v1107_v12  ;;  %v1113_v26 = vsel %vm368_vm6, %v1107_v12, %v1109_v10 }
 0x31e   : > { %1350 = vrot.lane.b32.xlu0 %v3904_v18, %s3408_s10  ;;  %1120 = vst [vmem:[#allocation5 + $0x100] sm:$0x3] %v1112_v24  ;;  %v1399_v24 = vsel %vm514_vm5, %v3972_v4, %v3948_v57  ;;  %v1255_v57 = vsel %vm441_vm7, %v3950_v58, %v3932_v44  ;;  %v1197_v4 = vld [vmem:[#allocation3 + $0xa8] sm:$0x3]  ;;  %v1111_v44 = vsel %vm368_vm6, %v3941_v50, %v3927_v40 }
 0x31f   : > { %1121 = vst [vmem:[#allocation5 + $0x108] sm:$0x3] %v1113_v26  ;;  %v1451_v26 = vld [vmem:[#allocation3 + $0x88] sm:$0x3] }
 0x320   : > { %v1249_v27 = vpop.permute.xlu0 %1248  ;;  %v1307_v58 = vld [vmem:[#allocation3 + $0x88] sm:$0x3] }
 0x321   : > { %1498 = vrot.lane.b32.xlu2 %v1196_v16, %s3407_s9 }
 0x322   : > { %1352 = vrot.lane.b32.xlu1 %v3895_v8, %s3408_s10 }
 0x323   : > { %v1397_v28 = vpop.permute.xlu2 %1396 }
 0x324   : > { %v1251_v30 = vpop.permute.xlu1 %1250 }
 0x325   : > { %v1256_v31 = vsel %vm441_vm7, %v1249_v27, %v1251_v30  ;;  %v1257_v18 = vsel %vm441_vm7, %v1251_v30, %v1253_v19  ;;  %v1306_v27 = vld [vmem:[#allocation3 + $0x80] sm:$0x3] }
 0x326   : > { %1176 = vrot.lane.b32.xlu0 %v1161_v29, %s3405_s7  ;;  %1264 = vst [vmem:[#allocation5 + $0x180] sm:$0x3] %v1256_v31  ;;  %v1695_v51 = vld [vmem:[#allocation5 + $0x108] sm:$0xff] }
 0x327   : > { %1265 = vst [vmem:[#allocation5 + $0x188] sm:$0x3] %v1257_v18 }
 0x328   : > { %v1537_v32 = vpop.permute.xlu0 %1536 }
 0x329   : > { %1354 = vrot.lane.b32.xlu2 %v1196_v16, %s3408_s10  ;;  %v1305_v16 = vld [vmem:[#allocation3 + $0x78] sm:$0x3] }
 0x32a   : > { %1178 = vrot.lane.b32.xlu1 %v1162_v17, %s3405_s7  ;;  %v1694_v17 = vld [vmem:[#allocation5 + $0x100] sm:$0xff] }
 0x32b   : > { %v1145_v33 = vpop.permute.xlu2 %1144 }
 0x32c   : > { %v1539_v8 = vpop.permute.xlu1 %1538 }
 0x32d   : > { %v1544_v35 = vsel %vm587_vm4, %v1537_v32, %v1539_v8  ;;  %v1545_v36 = vsel %vm587_vm4, %v1539_v8, %v1541_v23  ;;  %v1198_v8 = vld [vmem:[#allocation3 + $0xb0] sm:$0x3] }
 0x32e   : > { %1608 = vrot.lane.b32.xlu0 %v1593_v34, %s3406_s8  ;;  %1552 = vst [vmem:[#allocation5 + $0x280] sm:$0x3] %v1544_v35  ;;  %v1711_v29 = vld [vmem:[#allocation5 + $0x188] sm:$0xff]  ;;  %v1678_v35 = vld [vmem:[#allocation5 + $0x80] sm:$0xff] }
 0x32f   : > { %1553 = vst [vmem:[#allocation5 + $0x288] sm:$0x3] %v1545_v36  ;;  %v1679_v36 = vld [vmem:[#allocation5 + $0x88] sm:$0xff] }
 0x330   : > { %v1393_v37 = vpop.permute.xlu0 %1392 }
 0x331   : > { %1180 = vrot.lane.b32.xlu2 %v1163_v38, %s3405_s7 }
 0x332   : > { %1610 = vrot.lane.b32.xlu1 %v1594_v39, %s3406_s8 }
 0x333   : > { %v1289_v22 = vpop.permute.xlu2 %1288 }
 0x334   : > { %v1395_v42 = vpop.permute.xlu1 %1394 }
 0x335   : > { %v1400_v43 = vsel %vm514_vm5, %v1393_v37, %v1395_v42  ;;  %v1401_v45 = vsel %vm514_vm5, %v1395_v42, %v1397_v28  ;;  %v1742_v47 = vld [vmem:[#allocation5 + $0x280] sm:$0xff] }
 0x336   : > { %1464 = vrot.lane.b32.xlu0 %v1449_v41, %s3407_s9  ;;  %1408 = vst [vmem:[#allocation5 + $0x200] sm:$0x3] %v1400_v43  ;;  %1764 = vmatpush.msra.mxu0 %v1742_v47  ;;  %v1743_v48 = vld [vmem:[#allocation5 + $0x288] sm:$0xff]  ;;  %v1710_v28 = vld [vmem:[#allocation5 + $0x180] sm:$0xff]  ;;  %v1630_v41 = vld [vmem:[#allocation3 + $0xb0] sm:$0x3] }
 0x337   : > { %1409 = vst [vmem:[#allocation5 + $0x208] sm:$0x3] %v1401_v45  ;;  %1787 = vmatpush.msra.mxu1 %v1743_v48 }
 0x338   : > { %v1141_v53 = vpop.permute.xlu0 %1140  ;;  %1765 = vmatpush.msra.mxu0 %v1542_v49  ;;  %v1578_v49 = vsel %vm587_vm4, %v3998_v14, %v4003_v15 }
 0x339   : > { %1612 = vrot.lane.b32.xlu2 %v1595_v61, %s3406_s8  ;;  %1788 = vmatpush.msra.mxu1 %v1543_v56  ;;  %v1579_v56 = vsel %vm587_vm4, %v4003_v15, %v3981_v6  ;;  %v1631_v61 = vld [vmem:[#allocation3 + $0xb8] sm:$0x3]  ;;  %v1434_v6 = vsel %vm514_vm5, %v4007_v7, %v4012_v20  ;;  %v1290_v7 = vsel %vm441_vm7, %v3987_v9, %v3994_v13  ;;  %v4127_v9 = vld [vmem:[%s4761_s2] sm:$0xff] }
 0x33a   : > { %1466 = vrot.lane.b32.xlu1 %v1450_v54, %s3407_s9  ;;  %v1486_v54 = vld [vmem:[#allocation3 + $0xb0] sm:$0x3] }
 0x33b   : > { %v1577_v10 = vpop.permute.xlu2 %1576 }
 0x33c   : > { %v1143_v19 = vpop.permute.xlu1 %1142 }
 0x33d   : > { %v1148_v60 = vsel %vm368_vm6, %v1141_v53, %v1143_v19  ;;  %v1149_v21 = vsel %vm368_vm6, %v1143_v19, %v1145_v33  ;;  %v1726_v23 = vld [vmem:[#allocation5 + $0x200] sm:$0xff]  ;;  %v1110_v33 = vsel %vm368_vm6, %v3935_v46, %v3941_v50  ;;  %v1629_v46 = vld [vmem:[#allocation3 + $0xa8] sm:$0x3] }
 0x33e   : > { %1320 = vrot.lane.b32.xlu0 %v1305_v16, %s3408_s10  ;;  %1156 = vst [vmem:[#allocation5 + $0x110] sm:$0x3] %v1148_v60  ;;  %1766 = vmatpush.msra.mxu0 %v1726_v23  ;;  %v1727_v25 = vld [vmem:[#allocation5 + $0x208] sm:$0xff]  ;;  %v1487_v23 = vld [vmem:[#allocation3 + $0xb8] sm:$0x3] }
 0x33f   : > { %1157 = vst [vmem:[#allocation5 + $0x118] sm:$0x3] %v1149_v21  ;;  %1789 = vmatpush.msra.mxu1 %v1727_v25  ;;  %v1341_v16 = vld [vmem:[#allocation3 + $0xa8] sm:$0x3]  ;;  %v1435_v21 = vsel %vm514_vm5, %v4012_v20, %v3992_v11  ;;  %v1342_v25 = vld [vmem:[#allocation3 + $0xb0] sm:$0x3]  ;;  %v1291_v11 = vsel %vm441_vm7, %v3994_v13, %v3970_v3  ;;  %v1147_v3 = vsel %vm368_vm6, %v3983_v0, %v3959_v63 }
 0x340   : > { %v1285_v12 = vpop.permute.xlu0 %1284  ;;  %1767 = vmatpush.msra.mxu0 %v1398_v1  ;;  %v1343_v13 = vld [vmem:[#allocation3 + $0xb8] sm:$0x3] }
 0x341   : > { %1468 = vrot.lane.b32.xlu2 %v1451_v26, %s3407_s9  ;;  %1790 = vmatpush.msra.mxu1 %v1399_v24  ;;  %v1662_v26 = vld [vmem:[#allocation5] sm:$0xff] }
 0x342   : > { %1322 = vrot.lane.b32.xlu1 %v1306_v27, %s3408_s10  ;;  %1768 = vmatpush.msra.mxu0 %v1710_v28 }
 0x343   : > { %v1433_v30 = vpop.permute.xlu2 %1432  ;;  %1791 = vmatpush.msra.mxu1 %v1711_v29  ;;  %v1146_v29 = vsel %vm368_vm6, %v3976_v5, %v3983_v0  ;;  %v1663_v5 = vld [vmem:[#allocation5 + $0x8] sm:$0xff] }
 0x344   : > { %v1287_v31 = vpop.permute.xlu1 %1286  ;;  %1769 = vmatpush.msra.mxu0 %v1254_v2 }
 0x345   : > { %1792 = vmatpush.msra.mxu1 %v1255_v57  ;;  %v1292_v18 = vsel %vm441_vm7, %v1285_v12, %v1287_v31  ;;  %v1293_v32 = vsel %vm441_vm7, %v1287_v31, %v1289_v22  ;;  %v1199_v22 = vld [vmem:[#allocation3 + $0xb8] sm:$0x3]  ;;  %v1696_v27 = vld [vmem:[#allocation5 + $0x110] sm:$0xff] }
 0x346   : > { %1212 = vrot.lane.b32.xlu0 %v1197_v4, %s3405_s7  ;;  %1300 = vst [vmem:[#allocation5 + $0x190] sm:$0x3] %v1292_v18  ;;  %1770 = vmatpush.msra.mxu0 %v1694_v17  ;;  %v1697_v28 = vld [vmem:[#allocation5 + $0x118] sm:$0xff] }
 0x347   : > { %1301 = vst [vmem:[#allocation5 + $0x198] sm:$0x3] %v1293_v32  ;;  %1793 = vmatpush.msra.mxu1 %v1695_v51  ;;  %v1681_v57 = vld [vmem:[#allocation5 + $0x98] sm:$0xff] }
 0x348   : > { %v1573_v34 = vpop.permute.xlu0 %1572  ;;  %1771 = vmatpush.msra.mxu0 %v1110_v33 }
 0x349   : > { %1324 = vrot.lane.b32.xlu2 %v1307_v58, %s3408_s10  ;;  %1794 = vmatpush.msra.mxu1 %v1111_v44 }
 0x34a   : > { %1214 = vrot.lane.b32.xlu1 %v1198_v8, %s3405_s7  ;;  %1772 = vmatpush.msra.mxu0 %v1678_v35 }
 0x34b   : > { %v4075_v37 = vpop.permute.xlu2 %1174  ;;  %1795 = vmatpush.msra.mxu1 %v1679_v36  ;;  %v4165_v36 = vld [vmem:[%s4761_s2 + $0x8] sm:$0x3] }
 0x34c   : > { %v1575_v38 = vpop.permute.xlu1 %1574  ;;  %1773 = vmatpush.msra.mxu0 %v3798_v52  ;;  %v1485_v52 = vld [vmem:[#allocation3 + $0xa8] sm:$0x3] }
 0x34d   : > { %1796 = vmatpush.msra.mxu1 %v3803_v55  ;;  %v1580_v40 = vsel %vm587_vm4, %v1573_v34, %v1575_v38  ;;  %v1581_v50 = vsel %vm587_vm4, %v1575_v38, %v1577_v10  ;;  %v1712_v1 = vld [vmem:[#allocation5 + $0x190] sm:$0xff] }
 0x34e   : > { %1644 = vrot.lane.b32.xlu0 %v1629_v46, %s3406_s8  ;;  %1588 = vst [vmem:[#allocation5 + $0x290] sm:$0x3] %v1580_v40  ;;  %v1713_v12 = vld [vmem:[#allocation5 + $0x198] sm:$0xff]  ;;  %1774 = vmatpush.msra.mxu0 %v1662_v26 }
 0x34f   : > { %1589 = vst [vmem:[#allocation5 + $0x298] sm:$0x3] %v1581_v50  ;;  %3218 = vmatmul.msk.f32.vlgmr.msra.gmra.mxu0 %vm1752_vm14, %v4127_v9  ;;  %1797 = vmatpush.msra.mxu1 %v1663_v5  ;;  %v1665_v26 = vld [vmem:[#allocation5 + $0x18] sm:$0xff] }
 0x350   : > { %v1429_v39 = vpop.permute.xlu0 %1428  ;;  %3220 = vmatmul.msk.f32.vlgmr.msra.gmra.mxu1 %vm1752_vm14, %v4127_v9 }
 0x351   : > { %1216 = vrot.lane.b32.xlu2 %v1199_v22, %s3405_s7 }
 0x352   : > { %1646 = vrot.lane.b32.xlu1 %v1630_v41, %s3406_s8 }
 0x353   : > { %v4084_v42 = vpop.permute.xlu2 %1318 }
 0x354   : > { %v1431_v43 = vpop.permute.xlu1 %1430 }
 0x355   : > { %v1436_v55 = vsel %vm514_vm5, %v1429_v39, %v1431_v43  ;;  %v1437_v45 = vsel %vm514_vm5, %v1431_v43, %v1433_v30  ;;  %v1744_v47 = vld [vmem:[#allocation5 + $0x290] sm:$0xff] }
 0x356   : > { %1500 = vrot.lane.b32.xlu0 %v1485_v52, %s3407_s9  ;;  %1444 = vst [vmem:[#allocation5 + $0x210] sm:$0x3] %v1436_v55  ;;  %1810 = vmatpush.msra.mxu2 %v1744_v47  ;;  %v1745_v48 = vld [vmem:[#allocation5 + $0x298] sm:$0xff]  ;;  %v1680_v30 = vld [vmem:[#allocation5 + $0x90] sm:$0xff] }
 0x357   : > { %1445 = vst [vmem:[#allocation5 + $0x218] sm:$0x3] %v1437_v45  ;;  %1833 = vmatpush.msra.mxu3 %v1745_v48  ;;  %3219 = vmatmul.msk.f32.gmra.mxu0 %vm1752_vm14, %v4165_v36 }
 0x358   : > { %v4092_v53 = vpop.permute.xlu0 %1170  ;;  %1811 = vmatpush.msra.mxu2 %v1578_v49  ;;  %3221 = vmatmul.msk.f32.gmra.mxu1 %vm1752_vm14, %v4165_v36  ;;  %v1664_v49 = vld [vmem:[#allocation5 + $0x10] sm:$0xff] }
 0x359   : > { %1648 = vrot.lane.b32.xlu2 %v1631_v61, %s3406_s8  ;;  %1834 = vmatpush.msra.mxu3 %v1579_v56 }
 0x35a   : > { %1502 = vrot.lane.b32.xlu1 %v1486_v54, %s3407_s9 }
 0x35b   : > { %v4099_v10 = vpop.permute.xlu2 %1606 }
 0x35c   : > { %v4101_v14 = vpop.permute.xlu1 %1172 }
 0x35d   : > { %v1728_v19 = vld [vmem:[#allocation5 + $0x210] sm:$0xff] }
 0x35e   : > { %1356 = vrot.lane.b32.xlu0 %v1341_v16, %s3408_s10  ;;  %1812 = vmatpush.msra.mxu2 %v1728_v19  ;;  %v1729_v60 = vld [vmem:[#allocation5 + $0x218] sm:$0xff] }
 0x35f   : > { %1835 = vmatpush.msra.mxu3 %v1729_v60 }
 0x360   : > { %v4107_v15 = vpop.permute.xlu0 %1314  ;;  %1813 = vmatpush.msra.mxu2 %v1434_v6 }
 0x361   : > { %1504 = vrot.lane.b32.xlu2 %v1487_v23, %s3407_s9  ;;  %1836 = vmatpush.msra.mxu3 %v1435_v21 }
 0x362   : > { %1358 = vrot.lane.b32.xlu1 %v1342_v25, %s3408_s10  ;;  %1814 = vmatpush.msra.mxu2 %v1712_v1 }
 0x363   : > { %v4117_v24 = vpop.permute.xlu2 %1462  ;;  %1837 = vmatpush.msra.mxu3 %v1713_v12 }
 0x364   : > { %v4122_v20 = vpop.permute.xlu1 %1316  ;;  %1815 = vmatpush.msra.mxu2 %v1290_v7 }
 0x365   : > { %1838 = vmatpush.msra.mxu3 %v1291_v11 }
 0x366   : > { %1816 = vmatpush.msra.mxu2 %v1696_v27 }
 0x367   : > { %1839 = vmatpush.msra.mxu3 %v1697_v28 }
 0x368   : > { %v4132_v2 = vpop.permute.xlu0 %1602  ;;  %1817 = vmatpush.msra.mxu2 %v1146_v29 }
 0x369   : > { %1360 = vrot.lane.b32.xlu2 %v1343_v13, %s3408_s10  ;;  %1840 = vmatpush.msra.mxu3 %v1147_v3 }
 0x36a   : > { %1818 = vmatpush.msra.mxu2 %v1680_v30 }
 0x36b   : > { %v1211_v4 = vpop.permute.xlu2 %1210  ;;  %1841 = vmatpush.msra.mxu3 %v1681_v57 }
 0x36c   : > { %v1605_v31 = vpop.permute.xlu1 %1604  ;;  %1819 = vmatpush.msra.mxu2 %v3838_v62 }
 0x36d   : > { %1842 = vmatpush.msra.mxu3 %v3820_v59  ;;  %v1614_v12 = vsel %vm587_vm4, %v4132_v2, %v1605_v31  ;;  %v1615_v11 = vsel %vm587_vm4, %v1605_v31, %v4099_v10 }
 0x36e   : > { %1820 = vmatpush.msra.mxu2 %v1664_v49 }
 0x36f   : > { %3222 = vmatmul.msk.f32.vlgmr.msra.gmra.mxu2 %vm1752_vm14, %v4127_v9  ;;  %1843 = vmatpush.msra.mxu3 %v1665_v26  ;;  %v1669_v26 = vld [vmem:[#allocation5 + $0x38] sm:$0xff] }
 0x370   : > { %v4144_v63 = vpop.permute.xlu0 %1458  ;;  %3224 = vmatmul.msk.f32.vlgmr.msra.gmra.mxu3 %vm1752_vm14, %v4127_v9 }
 0x373   : > { %v1643_v0 = vpop.permute.xlu2 %1642 }
 0x374   : > { %v4146_v18 = vpop.permute.xlu1 %1460 }
 0x375   : > { %v1470_v10 = vsel %vm514_vm5, %v4144_v63, %v4146_v18  ;;  %v1471_v57 = vsel %vm514_vm5, %v4146_v18, %v4117_v24  ;;  %v1327_v24 = vsel %vm441_vm7, %v4122_v20, %v4084_v42 }
 0x377   : > { %3223 = vmatmul.msk.f32.gmra.mxu2 %vm1752_vm14, %v4165_v36 }
 0x378   : > { %v4148_v32 = vpop.permute.xlu0 %1206  ;;  %3225 = vmatmul.msk.f32.gmra.mxu3 %vm1752_vm14, %v4165_v36 }
 0x37b   : > { %v1499_v17 = vpop.permute.xlu2 %1498 }
 0x37c   : > { %v4150_v51 = vpop.permute.xlu1 %1208 }
 0x37d   : > { %v4154_v33 = vsel %vm368_vm6, %v4150_v51, %v1211_v4 }
 0x380   : > { %v1639_v62 = vpop.permute.xlu0 %1638 }
 0x383   : > { %v1355_v34 = vpop.permute.xlu2 %1354 }
 0x384   : > { %v1641_v59 = vpop.permute.xlu1 %1640 }
 0x385   : > { %v4157_v44 = vsel %vm587_vm4, %v1639_v62, %v1641_v59  ;;  %v4160_v58 = vsel %vm587_vm4, %v1641_v59, %v1643_v0 }
 0x388   : > { %v1495_v8 = vpop.permute.xlu0 %1494 }
 0x38b   : > { %v1181_v46 = vpop.permute.xlu2 %1180 }
 0x38c   : > { %v1497_v35 = vpop.permute.xlu1 %1496 }
 0x38d   : > { %v4168_v38 = vsel %vm514_vm5, %v1495_v8, %v1497_v35  ;;  %v4171_v40 = vsel %vm514_vm5, %v1497_v35, %v1499_v17  ;;  %v1326_v17 = vsel %vm441_vm7, %v4107_v15, %v4122_v20  ;;  %v1182_v8 = vsel %vm368_vm6, %v4092_v53, %v4101_v14  ;;  %v1666_v53 = vld [vmem:[#allocation5 + $0x20] sm:$0xff] }
 0x38e   : > { %v1183_v15 = vsel %vm368_vm6, %v4101_v14, %v4075_v37 }
 0x390   : > { %v1351_v50 = vpop.permute.xlu0 %1350 }
 0x393   : > { %v1613_v52 = vpop.permute.xlu2 %1612 }
 0x394   : > { %v1353_v39 = vpop.permute.xlu1 %1352 }
 0x395   : > { %v4178_v22 = vsel %vm441_vm7, %v1351_v50, %v1353_v39  ;;  %v4181_v41 = vsel %vm441_vm7, %v1353_v39, %v1355_v34  ;;  %v1683_v50 = vld [vmem:[#allocation5 + $0xa8] sm:$0xff]  ;;  %v1674_v39 = vld [vmem:[#allocation5 + $0x60] sm:$0xff] }
 0x398   : > { %v1177_v43 = vpop.permute.xlu0 %1176 }
 0x39b   : > { %v1469_v56 = vpop.permute.xlu2 %1468 }
 0x39c   : > { %v1179_v55 = vpop.permute.xlu1 %1178 }
 0x39d   : > { %v1184_v45 = vsel %vm368_vm6, %v1177_v43, %v1179_v55  ;;  %v1185_v47 = vsel %vm368_vm6, %v1179_v55, %v1181_v46  ;;  %v1682_v46 = vld [vmem:[#allocation5 + $0xa0] sm:$0xff]  ;;  %v1667_v43 = vld [vmem:[#allocation5 + $0x28] sm:$0xff] }
 0x39e   : > { %1192 = vst [vmem:[#allocation5 + $0x120] sm:$0x3] %v1184_v45 }
 0x39f   : > { %1193 = vst [vmem:[#allocation5 + $0x128] sm:$0x3] %v1185_v47 }
 0x3a0   : > { %v1609_v48 = vpop.permute.xlu0 %1608 }
 0x3a3   : > { %v1325_v60 = vpop.permute.xlu2 %1324 }
 0x3a4   : > { %v1611_v61 = vpop.permute.xlu1 %1610 }
 0x3a5   : > { %v1616_v54 = vsel %vm587_vm4, %v1609_v48, %v1611_v61  ;;  %v1617_v16 = vsel %vm587_vm4, %v1611_v61, %v1613_v52  ;;  %v1698_v34 = vld [vmem:[#allocation5 + $0x120] sm:$0xff]  ;;  %v1675_v52 = vld [vmem:[#allocation5 + $0x68] sm:$0xff] }
 0x3a6   : > { %1624 = vst [vmem:[#allocation5 + $0x2a0] sm:$0x3] %v1616_v54  ;;  %v1699_v59 = vld [vmem:[#allocation5 + $0x128] sm:$0xff] }
 0x3a7   : > { %1625 = vst [vmem:[#allocation5 + $0x2a8] sm:$0x3] %v1617_v16 }
 0x3a8   : > { %v1465_v19 = vpop.permute.xlu0 %1464 }
 0x3ab   : > { %v1217_v28 = vpop.permute.xlu2 %1216 }
 0x3ac   : > { %v1467_v6 = vpop.permute.xlu1 %1466 }
 0x3ad   : > { %v1472_v21 = vsel %vm514_vm5, %v1465_v19, %v1467_v6  ;;  %v1473_v23 = vsel %vm514_vm5, %v1467_v6, %v1469_v56  ;;  %v1746_v25 = vld [vmem:[#allocation5 + $0x2a0] sm:$0xff] }
 0x3ae   : > { %1480 = vst [vmem:[#allocation5 + $0x220] sm:$0x3] %v1472_v21  ;;  %1856 = vmatpush.msrb.mxu0 %v1746_v25  ;;  %v1747_v1 = vld [vmem:[#allocation5 + $0x2a8] sm:$0xff]  ;;  %v1218_v25 = vsel %vm368_vm6, %v4148_v32, %v4150_v51 }
 0x3af   : > { %1481 = vst [vmem:[#allocation5 + $0x228] sm:$0x3] %v1473_v23  ;;  %1879 = vmatpush.msrb.mxu1 %v1747_v1 }
 0x3b0   : > { %v1321_v7 = vpop.permute.xlu0 %1320  ;;  %1857 = vmatpush.msrb.mxu0 %v1614_v12  ;;  %v1685_v12 = vld [vmem:[#allocation5 + $0xb8] sm:$0xff] }
 0x3b1   : > { %1880 = vmatpush.msrb.mxu1 %v1615_v11 }
 0x3b3   : > { %v1649_v62 = vpop.permute.xlu2 %1648 }
 0x3b4   : > { %v1323_v27 = vpop.permute.xlu1 %1322 }
 0x3b5   : > { %v1328_v29 = vsel %vm441_vm7, %v1321_v7, %v1323_v27  ;;  %v1329_v3 = vsel %vm441_vm7, %v1323_v27, %v1325_v60  ;;  %v1730_v2 = vld [vmem:[#allocation5 + $0x220] sm:$0xff]  ;;  %v1668_v7 = vld [vmem:[#allocation5 + $0x30] sm:$0xff] }
 0x3b6   : > { %1336 = vst [vmem:[#allocation5 + $0x1a0] sm:$0x3] %v1328_v29  ;;  %1858 = vmatpush.msrb.mxu0 %v1730_v2  ;;  %v1731_v13 = vld [vmem:[#allocation5 + $0x228] sm:$0xff] }
 0x3b7   : > { %1337 = vst [vmem:[#allocation5 + $0x1a8] sm:$0x3] %v1329_v3  ;;  %1881 = vmatpush.msrb.mxu1 %v1731_v13 }
 0x3b8   : > { %v1213_v30 = vpop.permute.xlu0 %1212  ;;  %1859 = vmatpush.msrb.mxu0 %v1470_v10 }
 0x3b9   : > { %1882 = vmatpush.msrb.mxu1 %v1471_v57 }
 0x3bb   : > { %v1505_v55 = vpop.permute.xlu2 %1504 }
 0x3bc   : > { %v1215_v4 = vpop.permute.xlu1 %1214 }
 0x3bd   : > { %v1220_v5 = vsel %vm368_vm6, %v1213_v30, %v1215_v4  ;;  %v1221_v31 = vsel %vm368_vm6, %v1215_v4, %v1217_v28  ;;  %v1714_v0 = vld [vmem:[#allocation5 + $0x1a0] sm:$0xff] }
 0x3be   : > { %1228 = vst [vmem:[#allocation5 + $0x130] sm:$0x3] %v1220_v5  ;;  %1860 = vmatpush.msrb.mxu0 %v1714_v0  ;;  %v1715_v63 = vld [vmem:[#allocation5 + $0x1a8] sm:$0xff] }
 0x3bf   : > { %1229 = vst [vmem:[#allocation5 + $0x138] sm:$0x3] %v1221_v31  ;;  %1883 = vmatpush.msrb.mxu1 %v1715_v63 }
 0x3c0   : > { %v1645_v18 = vpop.permute.xlu0 %1644  ;;  %1861 = vmatpush.msrb.mxu0 %v1326_v17 }
 0x3c1   : > { %1884 = vmatpush.msrb.mxu1 %v1327_v24 }
 0x3c2   : > { %1862 = vmatpush.msrb.mxu0 %v1698_v34 }
 0x3c3   : > { %1885 = vmatpush.msrb.mxu1 %v1699_v59  ;;  %v1361_v56 = vpop.permute.xlu2 %1360 }
 0x3c4   : > { %v1647_v35 = vpop.permute.xlu1 %1646  ;;  %1863 = vmatpush.msrb.mxu0 %v1182_v8 }
 0x3c5   : > { %1886 = vmatpush.msrb.mxu1 %v1183_v15  ;;  %v1652_v42 = vsel %vm587_vm4, %v1645_v18, %v1647_v35  ;;  %v1653_v20 = vsel %vm587_vm4, %v1647_v35, %v1649_v62  ;;  %v1700_v21 = vld [vmem:[#allocation5 + $0x130] sm:$0xff] }
 0x3c6   : > { %1660 = vst [vmem:[#allocation5 + $0x2b0] sm:$0x3] %v1652_v42  ;;  %1864 = vmatpush.msrb.mxu0 %v1682_v46  ;;  %v1701_v23 = vld [vmem:[#allocation5 + $0x138] sm:$0xff] }
 0x3c7   : > { %1661 = vst [vmem:[#allocation5 + $0x2b8] sm:$0x3] %v1653_v20  ;;  %1887 = vmatpush.msrb.mxu1 %v1683_v50 }
 0x3c8   : > { %1865 = vmatpush.msrb.mxu0 %v1674_v39  ;;  %v1501_v37 = vpop.permute.xlu0 %1500 }
 0x3c9   : > { %1888 = vmatpush.msrb.mxu1 %v1675_v52 }
 0x3ca   : > { %1866 = vmatpush.msrb.mxu0 %v1666_v53 }
 0x3cb   : > { %1889 = vmatpush.msrb.mxu1 %v1667_v43  ;;  %3226 = vmatmul.msk.f32.vlgmr.msrb.gmra.mxu0 %vm1752_vm14, %v4127_v9 }
 0x3cc   : > { %v1503_v14 = vpop.permute.xlu1 %1502  ;;  %3228 = vmatmul.msk.f32.vlgmr.msrb.gmra.mxu1 %vm1752_vm14, %v4127_v9 }
 0x3cd   : > { %v1508_v45 = vsel %vm514_vm5, %v1501_v37, %v1503_v14  ;;  %v1509_v47 = vsel %vm514_vm5, %v1503_v14, %v1505_v55  ;;  %v1748_v48 = vld [vmem:[#allocation5 + $0x2b0] sm:$0xff]  ;;  %v1799_v32 = vpop.f32.mrf.mxu1 }
 0x3ce   : > { %1516 = vst [vmem:[#allocation5 + $0x230] sm:$0x3] %v1508_v45  ;;  %1902 = vmatpush.msrb.mxu2 %v1748_v48  ;;  %v1749_v49 = vld [vmem:[#allocation5 + $0x2b8] sm:$0xff]  ;;  %v1944_v51 = vmax.f32 %v1799_v32, 0.0 }
 0x3cf   : > { %1517 = vst [vmem:[#allocation5 + $0x238] sm:$0x3] %v1509_v47  ;;  %1925 = vmatpush.msrb.mxu3 %v1749_v49 }
 0x3d0   : > { %1903 = vmatpush.msrb.mxu2 %v4157_v44  ;;  %v1357_v61 = vpop.permute.xlu0 %1356  ;;  %1965 = vrot.lane.b32.xlu1 %v1944_v51, %s3404_s6 }
 0x3d1   : > { %1926 = vmatpush.msrb.mxu3 %v4160_v58 }
 0x3d3   : > { %3227 = vmatmul.msk.f32.gmra.mxu0 %vm1752_vm14, %v4165_v36 }
 0x3d4   : > { %v1359_v54 = vpop.permute.xlu1 %1358  ;;  %3229 = vmatmul.msk.f32.gmra.mxu1 %vm1752_vm14, %v4165_v36 }
 0x3d5   : > { %v1364_v16 = vsel %vm441_vm7, %v1357_v61, %v1359_v54  ;;  %v1365_v19 = vsel %vm441_vm7, %v1359_v54, %v1361_v56  ;;  %v1732_v60 = vld [vmem:[#allocation5 + $0x230] sm:$0xff] }
 0x3d6   : > { %1372 = vst [vmem:[#allocation5 + $0x1b0] sm:$0x3] %v1364_v16  ;;  %1904 = vmatpush.msrb.mxu2 %v1732_v60  ;;  %v1733_v6 = vld [vmem:[#allocation5 + $0x238] sm:$0xff] }
 0x3d7   : > { %1373 = vst [vmem:[#allocation5 + $0x1b8] sm:$0x3] %v1365_v19  ;;  %1927 = vmatpush.msrb.mxu3 %v1733_v6 }
 0x3d8   : > { %1905 = vmatpush.msrb.mxu2 %v4168_v38  ;;  %v1776_v38 = vpop.f32.mrf.mxu0 }
 0x3d9   : > { %1928 = vmatpush.msrb.mxu3 %v4171_v40  ;;  %v1684_v40 = vld [vmem:[#allocation5 + $0xb0] sm:$0xff]  ;;  %v1943_v1 = vmax.f32 %v1776_v38, 0.0 }
 0x3db   : > { %1963 = vrot.lane.b32.xlu0 %v1943_v1, %s3404_s6 }
 0x3dd   : > { %v1716_v44 = vld [vmem:[#allocation5 + $0x1b0] sm:$0xff] }
 0x3de   : > { %1906 = vmatpush.msrb.mxu2 %v1716_v44  ;;  %v1717_v58 = vld [vmem:[#allocation5 + $0x1b8] sm:$0xff] }
 0x3df   : > { %1929 = vmatpush.msrb.mxu3 %v1717_v58 }
 0x3e0   : > { %1907 = vmatpush.msrb.mxu2 %v4178_v22  ;;  %v1676_v22 = vld [vmem:[#allocation5 + $0x70] sm:$0xff]  ;;  %v1779_v11 = vpop.f32.mrf.mxu0 }
 0x3e1   : > { %1930 = vmatpush.msrb.mxu3 %v4181_v41  ;;  %v1677_v41 = vld [vmem:[#allocation5 + $0x78] sm:$0xff]  ;;  %v1951_v28 = vmax.f32 %v1779_v11, 0.0 }
 0x3e2   : > { %1908 = vmatpush.msrb.mxu2 %v1700_v21 }
 0x3e3   : > { %1931 = vmatpush.msrb.mxu3 %v1701_v23  ;;  %1967 = vrot.lane.b32.xlu2 %v1951_v28, %s3404_s6 }
 0x3e4   : > { %1909 = vmatpush.msrb.mxu2 %v1218_v25 }
 0x3e5   : > { %1932 = vmatpush.msrb.mxu3 %v4154_v33  ;;  %v1802_v33 = vpop.f32.mrf.mxu1 }
 0x3e6   : > { %1910 = vmatpush.msrb.mxu2 %v1684_v40  ;;  %v1952_v27 = vmax.f32 %v1802_v33, 0.0 }
 0x3e7   : > { %1933 = vmatpush.msrb.mxu3 %v1685_v12 }
 0x3e8   : > { %1911 = vmatpush.msrb.mxu2 %v1676_v22  ;;  %1969 = vrot.lane.b32.xlu0 %v1952_v27, %s3404_s6 }
 0x3e9   : > { %1934 = vmatpush.msrb.mxu3 %v1677_v41 }
 0x3ea   : > { %1912 = vmatpush.msrb.mxu2 %v1668_v7 }
 0x3eb   : > { %1935 = vmatpush.msrb.mxu3 %v1669_v26  ;;  %3230 = vmatmul.msk.f32.vlgmr.msrb.gmra.mxu2 %vm1752_vm14, %v4127_v9 }
 0x3ec   : > { %3232 = vmatmul.msk.f32.vlgmr.msrb.gmra.mxu3 %vm1752_vm14, %v4127_v9 }
 0x3f2   : > { %v1822_v29 = vpop.f32.mrf.mxu2 }
 0x3f3   : > { %3231 = vmatmul.msk.f32.gmra.mxu2 %vm1752_vm14, %v4165_v36  ;;  %v1945_v3 = vmax.f32 %v1822_v29, 0.0  ;;  %v1845_v9 = vpop.f32.mrf.mxu3 }
 0x3f4   : > { %3233 = vmatmul.msk.f32.gmra.mxu3 %vm1752_vm14, %v4165_v36  ;;  %v1946_v2 = vmax.f32 %v1845_v9, 0.0 }
 0x3f5   : > { %1989 = vrot.lane.b32.xlu1 %v1945_v3, %s3404_s6 }
 0x3f6   : > { %1991 = vrot.lane.b32.xlu2 %v1946_v2, %s3404_s6 }
 0x3fa   : > { %v1825_v5 = vpop.f32.mrf.mxu2 }
 0x3fb   : > { %v1848_v13 = vpop.f32.mrf.mxu3  ;;  %v1953_v31 = vmax.f32 %v1825_v5, 0.0 }
 0x3fc   : > { %v1954_v10 = vmax.f32 %v1848_v13, 0.0 }
 0x3fe   : > { %1995 = vrot.lane.b32.xlu1 %v1954_v10, %s3404_s6 }
 0x43d   : > { %v1968_v8 = vpop.permute.xlu2 %1967 }
 0x43e   : > { %1982 = vst.msk [vmem:[#allocation4 + $0x18] sm:$0x3] %vm929_vm12, %v1968_v8 }
 0x442   : > { %v1966_v18 = vpop.permute.xlu1 %1965 }
 0x443   : > { %1981 = vst.msk [vmem:[#allocation4 + $0x10] sm:$0xff] %vm222_vm2, %v1966_v18 }
 0x445   : > { %v2068_v46 = vld [vmem:[#allocation4 + $0x18] sm:$0x3] }
 0x446   : > { %2072 = vst [vmem:[#allocation5 + $0x80] sm:$0x3] %v2068_v46  ;;  %v2101_v47 = vld [vmem:[#allocation4 + $0x18] sm:$0x3] }
 0x447   : > { %v2533_v60 = vld [vmem:[#allocation4 + $0x18] sm:$0x3] }
 0x448   : > { %v1868_v36 = vpop.f32.mrf.mxu0  ;;  %v2245_v6 = vld [vmem:[#allocation4 + $0x18] sm:$0x3] }
 0x449   : > { %v1891_v30 = vpop.f32.mrf.mxu1  ;;  %v1947_v57 = vmax.f32 %v1868_v36, 0.0  ;;  %v2389_v23 = vld [vmem:[#allocation4 + $0x18] sm:$0x3] }
 0x44a   : > { %v1948_v4 = vmax.f32 %v1891_v30, 0.0  ;;  %v2100_v43 = vld [vmem:[#allocation4 + $0x10] sm:$0xff] }
 0x44b   : > { %2016 = vrot.lane.b32.xlu2 %v1947_v57, %s3404_s6 }
 0x44c   : > { %2018 = vrot.lane.b32.xlu0 %v1948_v4, %s3404_s6 }
 0x44d   : > { %v1964_v24 = vpop.permute.xlu0 %1963 }
 0x44e   : > { %1979 = vst.msk [vmem:[#allocation4] sm:$0xff] %vm925_vm10, %v1964_v24  ;;  %v4269_v34 = vsel %vm222_vm2, %v1964_v24, %v1966_v18 }
 0x44f   : > { %2071 = vst [vmem:[#allocation5 + $0x48] sm:$0xff] %v4269_v34 }
 0x450   : > { %v1871_v0 = vpop.f32.mrf.mxu0  ;;  %v1992_v45 = vpop.permute.xlu2 %1991 }
 0x451   : > { %v1955_v63 = vmax.f32 %v1871_v0, 0.0  ;;  %v1894_v17 = vpop.f32.mrf.mxu1  ;;  %2008 = vst.msk [vmem:[#allocation4 + $0x40] sm:$0xff] %vm222_vm2, %v1992_v45 }
 0x452   : > { %v1956_v62 = vmax.f32 %v1894_v17, 0.0 }
 0x453   : > { %2020 = vrot.lane.b32.xlu1 %v1955_v63, %s3404_s6 }
 0x454   : > { %1993 = vrot.lane.b32.xlu0 %v1953_v31, %s3404_s6  ;;  %2022 = vrot.lane.b32.xlu2 %v1956_v62, %s3404_s6 }
 0x455   : > { %v4272_v59 = vld [vmem:[#allocation4] sm:$0xff] }
 0x456   : > { %2070 = vst [vmem:[#allocation5 + $0x40] sm:$0xff] %v4272_v59 }
 0x458   : > { %v2136_v1 = vld [vmem:[#allocation4 + $0x40] sm:$0xff] }
 0x45a   : > { %v1970_v55 = vpop.permute.xlu0 %1969 }
 0x45b   : > { %v1972_v37 = vsel %vm222_vm2, %v1968_v8, %v1970_v55  ;;  %1984 = vst.msk [vmem:[#allocation4 + $0x28] sm:$0x3] %vm224_vm11, %v1970_v55 }
 0x45c   : > { %1983 = vst [vmem:[#allocation4 + $0x20] sm:$0x3] %v1972_v37 }
 0x462   : > { %v2535_v56 = vld [vmem:[#allocation4 + $0x28] sm:$0x3] }
 0x463   : > { %v2069_v14 = vld [vmem:[#allocation4 + $0x20] sm:$0x3]  ;;  %v2247_v61 = vld [vmem:[#allocation4 + $0x28] sm:$0x3] }
 0x464   : > { %2073 = vst [vmem:[#allocation5 + $0x88] sm:$0x3] %v2069_v14  ;;  %v2103_v54 = vld [vmem:[#allocation4 + $0x28] sm:$0x3]  ;;  %v2534_v25 = vld [vmem:[#allocation4 + $0x20] sm:$0x3] }
 0x465   : > { %v2391_v44 = vld [vmem:[#allocation4 + $0x28] sm:$0x3]  ;;  %v2246_v38 = vld [vmem:[#allocation4 + $0x20] sm:$0x3] }
 0x466   : > { %v2102_v12 = vld [vmem:[#allocation4 + $0x20] sm:$0x3] }
 0x467   : > { %v1990_v48 = vpop.permute.xlu1 %1989  ;;  %v2390_v41 = vld [vmem:[#allocation4 + $0x20] sm:$0x3] }
 0x468   : > { %v4306_v49 = vsel %vm222_vm2, %v1990_v48, %v1992_v45  ;;  %2006 = vst.msk [vmem:[#allocation4 + $0x30] sm:$0xff] %vm925_vm10, %v1990_v48 }
 0x469   : > { %2079 = vst [vmem:[#allocation5 + $0x58] sm:$0xff] %v4306_v49 }
 0x46e   : > { %v1914_v15 = vpop.f32.mrf.mxu2 }
 0x46f   : > { %v1949_v35 = vmax.f32 %v1914_v15, 0.0  ;;  %v1937_v42 = vpop.f32.mrf.mxu3  ;;  %v4311_v16 = vld [vmem:[#allocation4 + $0x30] sm:$0xff] }
 0x470   : > { %v1950_v20 = vmax.f32 %v1937_v42, 0.0  ;;  %2078 = vst [vmem:[#allocation5 + $0x50] sm:$0xff] %v4311_v16  ;;  %v1996_v40 = vpop.permute.xlu1 %1995 }
 0x471   : > { %2043 = vrot.lane.b32.xlu0 %v1949_v35, %s3404_s6  ;;  %2011 = vst.msk [vmem:[#allocation4 + $0x58] sm:$0x3] %vm224_vm11, %v1996_v40 }
 0x472   : > { %2045 = vrot.lane.b32.xlu1 %v1950_v20, %s3404_s6 }
 0x476   : > { %v1917_v50 = vpop.f32.mrf.mxu2 }
 0x477   : > { %v1957_v39 = vmax.f32 %v1917_v50, 0.0  ;;  %v1940_v53 = vpop.f32.mrf.mxu3 }
 0x478   : > { %v1958_v52 = vmax.f32 %v1940_v53, 0.0  ;;  %v2139_v4 = vld [vmem:[#allocation4 + $0x58] sm:$0x3] }
 0x479   : > { %2047 = vrot.lane.b32.xlu2 %v1957_v39, %s3404_s6  ;;  %v2571_v18 = vld [vmem:[#allocation4 + $0x58] sm:$0x3] }
 0x47a   : > { %2049 = vrot.lane.b32.xlu0 %v1958_v52, %s3404_s6  ;;  %2110 = vrot.lane.b32.xlu1 %v4272_v59, %s3405_s7  ;;  %v2283_v8 = vld [vmem:[#allocation4 + $0x58] sm:$0x3] }
 0x481   : > { %2398 = vrot.lane.b32.xlu2 %v4272_v59, %s3407_s9 }
 0x482   : > { %2114 = vrot.lane.b32.xlu0 %v2100_v43, %s3405_s7  ;;  %2546 = vrot.lane.b32.xlu1 %v2100_v43, %s3406_s8 }
 0x489   : > { %2254 = vrot.lane.b32.xlu2 %v4272_v59, %s3408_s10 }
 0x48a   : > { %2258 = vrot.lane.b32.xlu0 %v2100_v43, %s3408_s10  ;;  %2542 = vrot.lane.b32.xlu1 %v4272_v59, %s3406_s8 }
 0x491   : > { %2112 = vrot.lane.b32.xlu2 %v4269_v34, %s3405_s7 }
 0x492   : > { %2402 = vrot.lane.b32.xlu1 %v2100_v43, %s3407_s9  ;;  %2544 = vrot.lane.b32.xlu0 %v4269_v34, %s3406_s8 }
 0x499   : > { %2256 = vrot.lane.b32.xlu2 %v4269_v34, %s3408_s10 }
 0x49a   : > { %2116 = vrot.lane.b32.xlu1 %v2101_v47, %s3405_s7  ;;  %2400 = vrot.lane.b32.xlu0 %v4269_v34, %s3407_s9 }
 0x4a1   : > { %2552 = vrot.lane.b32.xlu2 %v2535_v56, %s3406_s8 }
 0x4a2   : > { %2264 = vrot.lane.b32.xlu1 %v2247_v61, %s3408_s10  ;;  %2120 = vrot.lane.b32.xlu0 %v2103_v54, %s3405_s7 }
 0x4a5   : > { %v2017_v19 = vpop.permute.xlu2 %2016 }
 0x4a6   : > { %2033 = vst.msk [vmem:[#allocation4 + $0x60] sm:$0xff] %vm925_vm10, %v2017_v19 }
 0x4a9   : > { %2548 = vrot.lane.b32.xlu2 %v2533_v60, %s3406_s8 }
 0x4aa   : > { %2260 = vrot.lane.b32.xlu1 %v2245_v6, %s3408_s10  ;;  %2408 = vrot.lane.b32.xlu0 %v2391_v44, %s3407_s9 }
 0x4ad   : > { %v4320_v58 = vld [vmem:[#allocation4 + $0x60] sm:$0xff] }
 0x4ae   : > { %2086 = vst [vmem:[#allocation5 + $0x60] sm:$0xff] %v4320_v58  ;;  %v2023_v21 = vpop.permute.xlu2 %2022 }
 0x4af   : > { %2038 = vst.msk [vmem:[#allocation4 + $0x88] sm:$0x3] %vm224_vm11, %v2023_v21 }
 0x4b1   : > { %2404 = vrot.lane.b32.xlu2 %v2389_v23, %s3407_s9 }
 0x4b2   : > { %2550 = vrot.lane.b32.xlu1 %v2534_v25, %s3406_s8  ;;  %2262 = vrot.lane.b32.xlu0 %v2246_v38, %s3408_s10 }
 0x4b6   : > { %v2607_v38 = vld [vmem:[#allocation4 + $0x88] sm:$0x3] }
 0x4b9   : > { %2118 = vrot.lane.b32.xlu2 %v2102_v12, %s3405_s7 }
 0x4ba   : > { %2146 = vrot.lane.b32.xlu1 %v4311_v16, %s3405_s7  ;;  %2150 = vrot.lane.b32.xlu0 %v2136_v1, %s3405_s7 }
 0x4be   : > { %v2019_v22 = vpop.permute.xlu0 %2018 }
 0x4bf   : > { %v4333_v7 = vsel %vm222_vm2, %v2017_v19, %v2019_v22  ;;  %2035 = vst.msk [vmem:[#allocation4 + $0x70] sm:$0xff] %vm222_vm2, %v2019_v22 }
 0x4c0   : > { %2087 = vst [vmem:[#allocation5 + $0x68] sm:$0xff] %v4333_v7 }
 0x4c1   : > { %2406 = vrot.lane.b32.xlu2 %v2390_v41, %s3407_s9 }
 0x4c2   : > { %2580 = vrot.lane.b32.xlu1 %v4306_v49, %s3406_s8  ;;  %2578 = vrot.lane.b32.xlu0 %v4311_v16, %s3406_s8 }
 0x4c5   : > { %v2021_v26 = vpop.permute.xlu1 %2020 }
 0x4c6   : > { %v2025_v32 = vsel %vm222_vm2, %v2021_v26, %v2023_v21  ;;  %2036 = vst.msk [vmem:[#allocation4 + $0x78] sm:$0x3] %vm929_vm12, %v2021_v26  ;;  %v1994_v51 = vpop.permute.xlu0 %1993  ;;  %v4350_v28 = vld [vmem:[#allocation4 + $0x70] sm:$0xff] }
 0x4c7   : > { %2037 = vst [vmem:[#allocation4 + $0x80] sm:$0x3] %v2025_v32  ;;  %v1998_v33 = vsel %vm222_vm2, %v1994_v51, %v1996_v40  ;;  %v2427_v32 = vld [vmem:[#allocation4 + $0x58] sm:$0x3] }
 0x4c8   : > { %2009 = vst.msk [vmem:[#allocation4 + $0x48] sm:$0x3] %vm929_vm12, %v1994_v51 }
 0x4c9   : > { %2582 = vrot.lane.b32.xlu2 %v2136_v1, %s3406_s8  ;;  %2010 = vst [vmem:[#allocation4 + $0x50] sm:$0x3] %v1998_v33 }
 0x4ca   : > { %2436 = vrot.lane.b32.xlu1 %v4306_v49, %s3407_s9  ;;  %2294 = vrot.lane.b32.xlu0 %v2136_v1, %s3408_s10 }
 0x4cd   : > { %v2084_v11 = vld [vmem:[#allocation4 + $0x78] sm:$0x3] }
 0x4ce   : > { %v2085_v27 = vld [vmem:[#allocation4 + $0x80] sm:$0x3]  ;;  %2088 = vst [vmem:[#allocation5 + $0xa0] sm:$0x3] %v2084_v11  ;;  %v2173_v19 = vld [vmem:[#allocation4 + $0x78] sm:$0x3] }
 0x4cf   : > { %2089 = vst [vmem:[#allocation5 + $0xa8] sm:$0x3] %v2085_v27  ;;  %v2076_v29 = vld [vmem:[#allocation4 + $0x48] sm:$0x3]  ;;  %v2606_v40 = vld [vmem:[#allocation4 + $0x80] sm:$0x3] }
 0x4d0   : > { %v2077_v3 = vld [vmem:[#allocation4 + $0x50] sm:$0x3]  ;;  %2080 = vst [vmem:[#allocation5 + $0x90] sm:$0x3] %v2076_v29  ;;  %v2137_v5 = vld [vmem:[#allocation4 + $0x48] sm:$0x3] }
 0x4d1   : > { %2438 = vrot.lane.b32.xlu2 %v2136_v1, %s3407_s9  ;;  %2081 = vst [vmem:[#allocation5 + $0x98] sm:$0x3] %v2077_v3  ;;  %v2569_v39 = vld [vmem:[#allocation4 + $0x48] sm:$0x3]  ;;  %v2426_v45 = vld [vmem:[#allocation4 + $0x50] sm:$0x3] }
 0x4d2   : > { %2182 = vrot.lane.b32.xlu1 %v4320_v58, %s3405_s7  ;;  %2186 = vrot.lane.b32.xlu0 %v4350_v28, %s3405_s7  ;;  %v2281_v53 = vld [vmem:[#allocation4 + $0x48] sm:$0x3]  ;;  %v2282_v60 = vld [vmem:[#allocation4 + $0x50] sm:$0x3]  ;;  %v2605_v51 = vld [vmem:[#allocation4 + $0x78] sm:$0x3] }
 0x4d3   : > { %v2048_v9 = vpop.permute.xlu2 %2047  ;;  %v2425_v14 = vld [vmem:[#allocation4 + $0x48] sm:$0x3] }
 0x4d4   : > { %2063 = vst.msk [vmem:[#allocation4 + $0xa8] sm:$0x3] %vm929_vm12, %v2048_v9 }
 0x4d9   : > { %2434 = vrot.lane.b32.xlu2 %v4311_v16, %s3407_s9 }
 0x4da   : > { %2474 = vrot.lane.b32.xlu1 %v4350_v28, %s3407_s9  ;;  %2618 = vrot.lane.b32.xlu0 %v4350_v28, %s3406_s8 }
 0x4db   : > { %v2092_v2 = vld [vmem:[#allocation4 + $0xa8] sm:$0x3]  ;;  %v4364_v13 = vpop.permute.xlu2 %2398 }
 0x4dc   : > { %2096 = vst [vmem:[#allocation5 + $0xb0] sm:$0x3] %v2092_v2  ;;  %v2463_v2 = vld [vmem:[#allocation4 + $0x88] sm:$0x3] }
 0x4e1   : > { %2290 = vrot.lane.b32.xlu2 %v4311_v16, %s3408_s10 }
 0x4e2   : > { %2472 = vrot.lane.b32.xlu0 %v4333_v7, %s3407_s9  ;;  %2328 = vrot.lane.b32.xlu1 %v4333_v7, %s3408_s10 }
 0x4e3   : > { %v2255_v10 = vpop.permute.xlu2 %2254  ;;  %v2044_v36 = vpop.permute.xlu0 %2043 }
 0x4e4   : > { %v2046_v30 = vpop.permute.xlu1 %2045  ;;  %2060 = vst.msk [vmem:[#allocation4 + $0x90] sm:$0xff] %vm925_vm10, %v2044_v36 }
 0x4e5   : > { %2062 = vst.msk [vmem:[#allocation4 + $0xa0] sm:$0xff] %vm222_vm2, %v2046_v30  ;;  %v4375_v57 = vsel %vm222_vm2, %v2044_v36, %v2046_v30 }
 0x4e6   : > { %2095 = vst [vmem:[#allocation5 + $0x78] sm:$0xff] %v4375_v57 }
 0x4e9   : > { %2148 = vrot.lane.b32.xlu2 %v4306_v49, %s3405_s7 }
 0x4ea   : > { %2156 = vrot.lane.b32.xlu0 %v2139_v4, %s3405_s7  ;;  %2152 = vrot.lane.b32.xlu1 %v2137_v5, %s3405_s7 }
 0x4eb   : > { %v4382_v31 = vld [vmem:[#allocation4 + $0x90] sm:$0xff]  ;;  %v2113_v0 = vpop.permute.xlu2 %2112 }
 0x4ec   : > { %2094 = vst [vmem:[#allocation5 + $0x70] sm:$0xff] %v4382_v31  ;;  %v2111_v63 = vpop.permute.xlu1 %2110  ;;  %v2050_v17 = vpop.permute.xlu0 %2049 }
 0x4ed   : > { %v4386_v62 = vsel %vm368_vm6, %v2111_v63, %v2113_v0  ;;  %v2052_v24 = vsel %vm222_vm2, %v2048_v9, %v2050_v17  ;;  %2065 = vst.msk [vmem:[#allocation4 + $0xb8] sm:$0x3] %vm224_vm11, %v2050_v17  ;;  %v2138_v9 = vld [vmem:[#allocation4 + $0x50] sm:$0x3] }
 0x4ee   : > { %2130 = vst [vmem:[#allocation5 + $0xc0] sm:$0xff] %v4386_v62  ;;  %v2570_v17 = vld [vmem:[#allocation4 + $0x50] sm:$0x3] }
 0x4ef   : > { %2064 = vst [vmem:[#allocation4 + $0xb0] sm:$0x3] %v2052_v24  ;;  %v2319_v24 = vld [vmem:[#allocation4 + $0x88] sm:$0x3] }
 0x4f1   : > { %2292 = vrot.lane.b32.xlu2 %v4306_v49, %s3408_s10 }
 0x4f2   : > { %2588 = vrot.lane.b32.xlu0 %v2571_v18, %s3406_s8  ;;  %2300 = vrot.lane.b32.xlu1 %v2283_v8, %s3408_s10  ;;  %v4450_v18 = vld [vmem:[#allocation4 + $0xa0] sm:$0xff] }
 0x4f3   : > { %v2257_v15 = vpop.permute.xlu2 %2256 }
 0x4f4   : > { %v2547_v35 = vpop.permute.xlu1 %2546  ;;  %v4396_v42 = vsel %vm441_vm7, %v2255_v10, %v2257_v15  ;;  %v2115_v20 = vpop.permute.xlu0 %2114 }
 0x4f5   : > { %2274 = vst [vmem:[#allocation5 + $0x140] sm:$0xff] %v4396_v42  ;;  %v4400_v46 = vsel %vm368_vm6, %v2113_v0, %v2115_v20 }
 0x4f6   : > { %v2093_v50 = vld [vmem:[#allocation4 + $0xb0] sm:$0x3]  ;;  %2131 = vst [vmem:[#allocation5 + $0xc8] sm:$0xff] %v4400_v46 }
 0x4f7   : > { %2097 = vst [vmem:[#allocation5 + $0xb8] sm:$0x3] %v2093_v50 }
 0x4f9   : > { %2614 = vrot.lane.b32.xlu2 %v4320_v58, %s3406_s8 }
 0x4fa   : > { %2584 = vrot.lane.b32.xlu0 %v2569_v39, %s3406_s8  ;;  %2296 = vrot.lane.b32.xlu1 %v2281_v53, %s3408_s10  ;;  %v2461_v39 = vld [vmem:[#allocation4 + $0x78] sm:$0x3] }
 0x4fb   : > { %v2553_v52 = vpop.permute.xlu2 %2552 }
 0x4fc   : > { %v2543_v43 = vpop.permute.xlu1 %2542  ;;  %v2259_v55 = vpop.permute.xlu0 %2258 }
 0x4fd   : > { %v4408_v37 = vsel %vm441_vm7, %v2257_v15, %v2259_v55 }
 0x4fe   : > { %2275 = vst [vmem:[#allocation5 + $0x148] sm:$0xff] %v4408_v37 }
 0x501   : > { %2470 = vrot.lane.b32.xlu2 %v4320_v58, %s3407_s9 }
 0x502   : > { %2440 = vrot.lane.b32.xlu0 %v2425_v14, %s3407_s9  ;;  %2442 = vrot.lane.b32.xlu1 %v2426_v45, %s3407_s9 }
 0x503   : > { %v2549_v47 = vpop.permute.xlu2 %2548 }
 0x504   : > { %v2403_v48 = vpop.permute.xlu1 %2402  ;;  %v2545_v56 = vpop.permute.xlu0 %2544 }
 0x505   : > { %v4416_v61 = vsel %vm587_vm4, %v2543_v43, %v2545_v56  ;;  %v4419_v54 = vsel %vm587_vm4, %v2545_v56, %v2547_v35 }
 0x509   : > { %2184 = vrot.lane.b32.xlu2 %v4333_v7, %s3405_s7 }
 0x50a   : > { %2188 = vrot.lane.b32.xlu1 %v2173_v19, %s3405_s7  ;;  %2298 = vrot.lane.b32.xlu0 %v2282_v60, %s3408_s10 }
 0x50b   : > { %v2405_v6 = vpop.permute.xlu2 %2404 }
 0x50c   : > { %v2117_v44 = vpop.permute.xlu1 %2116  ;;  %v2401_v21 = vpop.permute.xlu0 %2400 }
 0x50d   : > { %v4427_v23 = vsel %vm514_vm5, %v4364_v13, %v2401_v21  ;;  %v4430_v25 = vsel %vm514_vm5, %v2401_v21, %v2403_v48  ;;  %v2318_v13 = vld [vmem:[#allocation4 + $0x80] sm:$0x3]  ;;  %v2691_v21 = vld [vmem:[#allocation5 + $0x88] sm:$0xff] }
 0x511   : > { %2616 = vrot.lane.b32.xlu2 %v4333_v7, %s3406_s8  ;;  %v2462_v7 = vld [vmem:[#allocation4 + $0x80] sm:$0x3] }
 0x512   : > { %2624 = vrot.lane.b32.xlu1 %v2607_v38, %s3406_s8  ;;  %2622 = vrot.lane.b32.xlu0 %v2606_v40, %s3406_s8 }
 0x513   : > { %v2119_v1 = vpop.permute.xlu2 %2118 }
 0x514   : > { %v2265_v12 = vpop.permute.xlu1 %2264  ;;  %v2124_v22 = vsel %vm368_vm6, %v2117_v44, %v2119_v1  ;;  %v2121_v41 = vpop.permute.xlu0 %2120  ;;  %v2690_v44 = vld [vmem:[#allocation5 + $0x80] sm:$0xff] }
 0x515   : > { %2132 = vst [vmem:[#allocation5 + $0x100] sm:$0x3] %v2124_v22  ;;  %v2125_v26 = vsel %vm368_vm6, %v2119_v1, %v2121_v41  ;;  %v2643_v22 = vld [vmem:[#allocation4 + $0xb8] sm:$0x3]  ;;  %v2497_v41 = vld [vmem:[#allocation4 + $0xa8] sm:$0x3] }
 0x516   : > { %2133 = vst [vmem:[#allocation5 + $0x108] sm:$0x3] %v2125_v26  ;;  %v2355_v26 = vld [vmem:[#allocation4 + $0xb8] sm:$0x3] }
 0x519   : > { %2444 = vrot.lane.b32.xlu2 %v2427_v32, %s3407_s9 }
 0x51a   : > { %2620 = vrot.lane.b32.xlu1 %v2605_v51, %s3406_s8  ;;  %2478 = vrot.lane.b32.xlu0 %v2462_v7, %s3407_s9 }
 0x51b   : > { %v2407_v33 = vpop.permute.xlu2 %2406 }
 0x51c   : > { %v2261_v11 = vpop.permute.xlu1 %2260  ;;  %v2412_v27 = vsel %vm514_vm5, %v2405_v6, %v2407_v33  ;;  %v2409_v29 = vpop.permute.xlu0 %2408 }
 0x51d   : > { %2420 = vst [vmem:[#allocation5 + $0x200] sm:$0x3] %v2412_v27  ;;  %v2413_v3 = vsel %vm514_vm5, %v2407_v33, %v2409_v29  ;;  %v2353_v27 = vld [vmem:[#allocation4 + $0xa8] sm:$0x3]  ;;  %v2642_v29 = vld [vmem:[#allocation4 + $0xb0] sm:$0x3] }
 0x51e   : > { %2421 = vst [vmem:[#allocation5 + $0x208] sm:$0x3] %v2413_v3 }
 0x521   : > { %2154 = vrot.lane.b32.xlu2 %v2138_v9, %s3405_s7 }
 0x522   : > { %2480 = vrot.lane.b32.xlu1 %v2463_v2, %s3407_s9  ;;  %2334 = vrot.lane.b32.xlu0 %v2318_v13, %s3408_s10 }
 0x523   : > { %v2583_v10 = vpop.permute.xlu2 %2582 }
 0x524   : > { %v2551_v36 = vpop.permute.xlu1 %2550  ;;  %v2263_v30 = vpop.permute.xlu0 %2262  ;;  %v2738_v53 = vld [vmem:[#allocation5 + $0x200] sm:$0xff] }
 0x525   : > { %v2556_v4 = vsel %vm587_vm4, %v2549_v47, %v2551_v36  ;;  %v2557_v5 = vsel %vm587_vm4, %v2551_v36, %v2553_v52  ;;  %v2268_v0 = vsel %vm441_vm7, %v2261_v11, %v2263_v30  ;;  %v2269_v63 = vsel %vm441_vm7, %v2263_v30, %v2265_v12  ;;  %v2739_v52 = vld [vmem:[#allocation5 + $0x208] sm:$0xff]  ;;  %v2498_v30 = vld [vmem:[#allocation4 + $0xb0] sm:$0x3] }
 0x526   : > { %2564 = vst [vmem:[#allocation5 + $0x280] sm:$0x3] %v2556_v4  ;;  %v2641_v11 = vld [vmem:[#allocation4 + $0xa8] sm:$0x3] }
 0x527   : > { %2565 = vst [vmem:[#allocation5 + $0x288] sm:$0x3] %v2557_v5  ;;  %v2209_v36 = vld [vmem:[#allocation4 + $0xa8] sm:$0x3] }
 0x528   : > { %2276 = vst [vmem:[#allocation5 + $0x180] sm:$0x3] %v2268_v0 }
 0x529   : > { %2277 = vst [vmem:[#allocation5 + $0x188] sm:$0x3] %v2269_v63  ;;  %2586 = vrot.lane.b32.xlu2 %v2570_v17, %s3406_s8 }
 0x52a   : > { %2336 = vrot.lane.b32.xlu1 %v2319_v24, %s3408_s10  ;;  %2654 = vrot.lane.b32.xlu0 %v4450_v18, %s3406_s8  ;;  %v2211_v24 = vld [vmem:[#allocation4 + $0xb8] sm:$0x3] }
 0x52b   : > { %v2439_v8 = vpop.permute.xlu2 %2438 }
 0x52c   : > { %v2147_v15 = vpop.permute.xlu1 %2146  ;;  %v2151_v35 = vpop.permute.xlu0 %2150 }
 0x52d   : > { %v2754_v20 = vld [vmem:[#allocation5 + $0x280] sm:$0xff] }
 0x52e   : > { %2771 = vmatpush.msra.mxu0 %v2754_v20  ;;  %v2755_v50 = vld [vmem:[#allocation5 + $0x288] sm:$0xff] }
 0x52f   : > { %2791 = vmatpush.msra.mxu1 %v2755_v50  ;;  %v2722_v48 = vld [vmem:[#allocation5 + $0x180] sm:$0xff] }
 0x530   : > { %2772 = vmatpush.msra.mxu0 %v4416_v61  ;;  %v2723_v56 = vld [vmem:[#allocation5 + $0x188] sm:$0xff]  ;;  %v2706_v61 = vld [vmem:[#allocation5 + $0x100] sm:$0xff] }
 0x531   : > { %2792 = vmatpush.msra.mxu1 %v4419_v54  ;;  %2476 = vrot.lane.b32.xlu2 %v2461_v39, %s3407_s9  ;;  %v2707_v54 = vld [vmem:[#allocation5 + $0x108] sm:$0xff] }
 0x532   : > { %2510 = vrot.lane.b32.xlu1 %v4450_v18, %s3407_s9  ;;  %2218 = vrot.lane.b32.xlu0 %v4382_v31, %s3405_s7 }
 0x533   : > { %2773 = vmatpush.msra.mxu0 %v2738_v53  ;;  %2793 = vmatpush.msra.mxu1 %v2739_v52  ;;  %v2435_v43 = vpop.permute.xlu2 %2434  ;;  %v2675_v53 = vld [vmem:[#allocation5 + $0x8] sm:$0xff]  ;;  %v2174_v52 = vld [vmem:[#allocation4 + $0x80] sm:$0x3] }
 0x534   : > { %v2581_v55 = vpop.permute.xlu1 %2580  ;;  %v2579_v14 = vpop.permute.xlu0 %2578 }
 0x535   : > { %v4464_v45 = vsel %vm587_vm4, %v2581_v55, %v2583_v10  ;;  %2774 = vmatpush.msra.mxu0 %v4427_v23  ;;  %2794 = vmatpush.msra.mxu1 %v4430_v25  ;;  %v4469_v47 = vsel %vm587_vm4, %v2579_v14, %v2581_v55  ;;  %v2499_v10 = vld [vmem:[#allocation4 + $0xb8] sm:$0x3] }
 0x537   : > { %2775 = vmatpush.msra.mxu0 %v2722_v48  ;;  %2795 = vmatpush.msra.mxu1 %v2723_v56 }
 0x539   : > { %2776 = vmatpush.msra.mxu0 %v4396_v42  ;;  %2796 = vmatpush.msra.mxu1 %v4408_v37 }
 0x53a   : > { %2650 = vrot.lane.b32.xlu2 %v4382_v31, %s3406_s8  ;;  %2506 = vrot.lane.b32.xlu1 %v4382_v31, %s3407_s9 }
 0x53b   : > { %2508 = vrot.lane.b32.xlu0 %v4375_v57, %s3407_s9  ;;  %2777 = vmatpush.msra.mxu0 %v2706_v61  ;;  %v2291_v19 = vpop.permute.xlu2 %2290 }
 0x53c   : > { %2797 = vmatpush.msra.mxu1 %v2707_v54  ;;  %v2437_v60 = vpop.permute.xlu1 %2436  ;;  %v2295_v6 = vpop.permute.xlu0 %2294  ;;  %v2674_v54 = vld [vmem:[#allocation5] sm:$0xff] }
 0x53d   : > { %v4480_v42 = vsel %vm514_vm5, %v2435_v43, %v2437_v60  ;;  %v4483_v37 = vsel %vm514_vm5, %v2437_v60, %v2439_v8  ;;  %2778 = vmatpush.msra.mxu0 %v4386_v62  ;;  %v2354_v8 = vld [vmem:[#allocation4 + $0xb0] sm:$0x3] }
 0x53e   : > { %2798 = vmatpush.msra.mxu1 %v4400_v46  ;;  %v2210_v43 = vld [vmem:[#allocation4 + $0xb0] sm:$0x3] }
 0x53f   : > { %2779 = vmatpush.msra.mxu0 %v2690_v44 }
 0x540   : > { %2799 = vmatpush.msra.mxu1 %v2691_v21 }
 0x541   : > { %2780 = vmatpush.msra.mxu0 %v4272_v59 }
 0x542   : > { %2800 = vmatpush.msra.mxu1 %v4269_v34  ;;  %2366 = vrot.lane.b32.xlu1 %v4450_v18, %s3408_s10 }
 0x543   : > { %2362 = vrot.lane.b32.xlu2 %v4382_v31, %s3408_s10  ;;  %2364 = vrot.lane.b32.xlu0 %v4375_v57, %s3408_s10  ;;  %v2149_v62 = vpop.permute.xlu2 %2148 }
 0x544   : > { %v2183_v23 = vpop.permute.xlu1 %2182  ;;  %v4496_v46 = vsel %vm368_vm6, %v2147_v15, %v2149_v62  ;;  %v4499_v25 = vsel %vm368_vm6, %v2149_v62, %v2151_v35  ;;  %v2187_v59 = vpop.permute.xlu0 %2186  ;;  %2801 = vmatpush.msra.mxu1 %v2675_v53  ;;  %2781 = vmatpush.msra.mxu0 %v2674_v54  ;;  %v2677_v54 = vld [vmem:[#allocation5 + $0x18] sm:$0xff] }
 0x545   : > { %2166 = vst [vmem:[#allocation5 + $0xd0] sm:$0xff] %v4496_v46 }
 0x546   : > { %2167 = vst [vmem:[#allocation5 + $0xd8] sm:$0xff] %v4499_v25 }
 0x54a   : > { %2222 = vrot.lane.b32.xlu1 %v4450_v18, %s3405_s7  ;;  %v2317_v18 = vld [vmem:[#allocation4 + $0x78] sm:$0x3] }
 0x54b   : > { %2652 = vrot.lane.b32.xlu2 %v4375_v57, %s3406_s8  ;;  %2220 = vrot.lane.b32.xlu0 %v4375_v57, %s3405_s7  ;;  %v2293_v34 = vpop.permute.xlu2 %2292 }
 0x54c   : > { %v4510_v38 = vsel %vm441_vm7, %v2291_v19, %v2293_v34  ;;  %v4513_v40 = vsel %vm441_vm7, %v2293_v34, %v2295_v6  ;;  %v2475_v1 = vpop.permute.xlu1 %2474  ;;  %v2619_v12 = vpop.permute.xlu0 %2618  ;;  %v2175_v19 = vld [vmem:[#allocation4 + $0x88] sm:$0x3] }
 0x54d   : > { %2310 = vst [vmem:[#allocation5 + $0x150] sm:$0xff] %v4510_v38 }
 0x54e   : > { %2311 = vst [vmem:[#allocation5 + $0x158] sm:$0xff] %v4513_v40 }
 0x552   : > { %2660 = vrot.lane.b32.xlu1 %v2643_v22, %s3406_s8 }
 0x553   : > { %2512 = vrot.lane.b32.xlu2 %v2497_v41, %s3407_s9  ;;  %2372 = vrot.lane.b32.xlu0 %v2355_v26, %s3408_s10  ;;  %v2615_v32 = vpop.permute.xlu2 %2614 }
 0x554   : > { %v4520_v51 = vpop.permute.xlu1 %2328  ;;  %v2473_v7 = vpop.permute.xlu0 %2472 }
 0x555   : > { %v4523_v33 = vsel %vm514_vm5, %v2473_v7, %v2475_v1 }
 0x55a   : > { %2656 = vrot.lane.b32.xlu1 %v2641_v11, %s3406_s8 }
 0x55b   : > { %2368 = vrot.lane.b32.xlu2 %v2353_v27, %s3408_s10  ;;  %2658 = vrot.lane.b32.xlu0 %v2642_v29, %s3406_s8  ;;  %v2471_v3 = vpop.permute.xlu2 %2470  ;;  %s3259_s8 = sshll.u32 %s3457_s19, 3 }
 0x55c   : > { %v4529_v9 = vsel %vm514_vm5, %v2471_v3, %v2473_v7  ;;  %v2153_v2 = vpop.permute.xlu1 %2152  ;;  %v2157_v13 = vpop.permute.xlu0 %2156  ;;  %s3122_s19 = scalar_lea.hbm %s4763_s4, %s3259_s8 }
 0x55d   : > { %s3125_s12 = sshll.u32 %s3122_s19, 4  ;;  %s3126_s12 = int_to_ptr.hbm [resolvable:$true] %s3125_s12 }
 0x55e   : > { %s3353_s14 = sshra.s32 %s3126_s12, 4  ;;  %s3354_s14 = int_to_ptr.hbm [resolvable:$true] %s3353_s14 }
 0x55f   : > { %s3355_s20 = scalar_lea.hbm %s3354_s14, 8  ;;  %p3360_p0 = scmp.lt.s32.totalorder %s3354_s14, %s4763_s4 }
 0x560   : > { %p3356_p11 = scmp.ne.s32.totalorder %s3354_s14, %s3355_s20  ;;  %p3361_p1 = scmp.lt.s32.totalorder %s3359_s27, %s3355_s20 }
 0x562   : > { %2516 = vrot.lane.b32.xlu1 %v2499_v10, %s3407_s9  ;;  %p3357_p12 = pnand %p3356_p11, %p3474_p5  ;;  %p3362_p2 = por %p3361_p1, %p3360_p0 }
 0x563   : > { %2224 = vrot.lane.b32.xlu2 %v2209_v36, %s3405_s7  ;;  %2514 = vrot.lane.b32.xlu0 %v2498_v30, %s3407_s9  ;;  %v2185_v4 = vpop.permute.xlu2 %2184 }
 0x564   : > { %v4535_v5 = vsel %vm368_vm6, %v2183_v23, %v2185_v4  ;;  %v4538_v0 = vsel %vm368_vm6, %v2185_v4, %v2187_v59  ;;  %v2301_v63 = vpop.permute.xlu1 %2300  ;;  %v2589_v17 = vpop.permute.xlu0 %2588  ;;  %p3358_p13 = pneg %p3357_p12 }
 0x565   : > { %2202 = vst [vmem:[#allocation5 + $0xe0] sm:$0xff] %v4535_v5 }
 0x566   : > { %2203 = vst [vmem:[#allocation5 + $0xe8] sm:$0xff] %v4538_v0  ;;  %p3363_p3 = pnand %p3362_p2, %p3358_p13 }
 0x56a   : > { %2228 = vrot.lane.b32.xlu1 %v2211_v24, %s3405_s7 }
 0x56b   : > { %2332 = vrot.lane.b32.xlu0 %v2317_v18, %s3408_s10  ;;  %2370 = vrot.lane.b32.xlu2 %v2354_v8, %s3408_s10  ;;  %v2617_v15 = vpop.permute.xlu2 %2616  ;;  %v2692_v18 = vld [vmem:[#allocation5 + $0x90] sm:$0xff] }
 0x56c   : > { %v4546_v35 = vsel %vm587_vm4, %v2615_v32, %v2617_v15  ;;  %v2627_v20 = vsel %vm587_vm4, %v2617_v15, %v2619_v12  ;;  %v2297_v50 = vpop.permute.xlu1 %2296  ;;  %v2585_v39 = vpop.permute.xlu0 %2584  ;;  %v2693_v15 = vld [vmem:[#allocation5 + $0x98] sm:$0xff] }
 0x572   : > { %2190 = vrot.lane.b32.xlu1 %v2174_v52, %s3405_s7 }
 0x573   : > { %2330 = vrot.lane.b32.xlu2 %v4350_v28, %s3408_s10  ;;  %2226 = vrot.lane.b32.xlu0 %v2210_v43, %s3405_s7  ;;  %v2445_v55 = vpop.permute.xlu2 %2444 }
 0x574   : > { %v2443_v14 = vpop.permute.xlu1 %2442  ;;  %v2441_v48 = vpop.permute.xlu0 %2440 }
 0x575   : > { %v2449_v56 = vsel %vm514_vm5, %v2443_v14, %v2445_v55  ;;  %v2448_v61 = vsel %vm514_vm5, %v2441_v48, %v2443_v14 }
 0x576   : > { %2457 = vst [vmem:[#allocation5 + $0x218] sm:$0x3] %v2449_v56 }
 0x577   : > { %2456 = vst [vmem:[#allocation5 + $0x210] sm:$0x3] %v2448_v61  ;;  %v2676_v61 = vld [vmem:[#allocation5 + $0x10] sm:$0xff] }
 0x57b   : > { %2192 = vrot.lane.b32.xlu2 %v2175_v19, %s3405_s7  ;;  %2326 = vrot.lane.b32.xlu0 %v4320_v58, %s3408_s10  ;;  %v2155_v28 = vpop.permute.xlu2 %2154  ;;  %s4692_s7 = scalar_lea.vmem [#allocation6], %s3192_s5 }
 0x57c   : > { %v4558_v60 = vpop.permute.xlu1 %2188  ;;  %v2160_v6 = vsel %vm368_vm6, %v2153_v2, %v2155_v28  ;;  %v2161_v44 = vsel %vm368_vm6, %v2155_v28, %v2157_v13  ;;  %v2299_v21 = vpop.permute.xlu0 %2298  ;;  %s3123_s11 = sshll.u32 %s4692_s7, 4  ;;  %s3124_s11 = int_to_ptr.vmem [resolvable:$true] %s3123_s11 }
 0x57d   : > { %2168 = vst [vmem:[#allocation5 + $0x110] sm:$0x3] %v2160_v6  ;;  %v2304_v62 = vsel %vm441_vm7, %v2297_v50, %v2299_v21  ;;  %v2305_v23 = vsel %vm441_vm7, %v2299_v21, %v2301_v63  ;;  %v2741_v13 = vld [vmem:[#allocation5 + $0x218] sm:$0xff] }
 0x57e   : > { %2169 = vst [vmem:[#allocation5 + $0x118] sm:$0x3] %v2161_v44  ;;  %v2740_v2 = vld [vmem:[#allocation5 + $0x210] sm:$0xff] }
 0x57f   : > { %2312 = vst [vmem:[#allocation5 + $0x190] sm:$0x3] %v2304_v62 }
 0x580   : > { %2313 = vst [vmem:[#allocation5 + $0x198] sm:$0x3] %v2305_v23 }
 0x583   : > { %v2587_v59 = vpop.permute.xlu2 %2586 }
 0x584   : > { %v2625_v34 = vpop.permute.xlu1 %2624  ;;  %v2592_v58 = vsel %vm587_vm4, %v2585_v39, %v2587_v59  ;;  %v2593_v1 = vsel %vm587_vm4, %v2587_v59, %v2589_v17  ;;  %v2623_v12 = vpop.permute.xlu0 %2622 }
 0x585   : > { %2600 = vst [vmem:[#allocation5 + $0x290] sm:$0x3] %v2592_v58  ;;  %v2629_v22 = vsel %vm587_vm4, %v2623_v12, %v2625_v34 }
 0x586   : > { %2601 = vst [vmem:[#allocation5 + $0x298] sm:$0x3] %v2593_v1  ;;  %v2724_v30 = vld [vmem:[#allocation5 + $0x190] sm:$0xff]  ;;  %v4614_v1 = vld [vmem:[%s4762_s3] sm:$0x1] }
 0x587   : > { %2637 = vst [vmem:[#allocation5 + $0x2a8] sm:$0x3] %v2629_v22  ;;  %3235 = vmatmul.msk.f32.vlgmr.msra.gmra.mxu1 %vm1752_vm14, %v4614_v1  ;;  %3234 = vmatmul.msk.f32.vlgmr.msra.gmra.mxu0 %vm1752_vm14, %v4614_v1 }
 0x58b   : > { %v2477_v41 = vpop.permute.xlu2 %2476 }
 0x58c   : > { %v2621_v26 = vpop.permute.xlu1 %2620  ;;  %v2479_v32 = vpop.permute.xlu0 %2478  ;;  %v2756_v7 = vld [vmem:[#allocation5 + $0x290] sm:$0xff] }
 0x58d   : > { %v2628_v11 = vsel %vm587_vm4, %v2621_v26, %v2623_v12  ;;  %v2484_v27 = vsel %vm514_vm5, %v2477_v41, %v2479_v32  ;;  %2811 = vmatpush.msra.mxu2 %v2756_v7  ;;  %v2757_v29 = vld [vmem:[#allocation5 + $0x298] sm:$0xff] }
 0x58e   : > { %2636 = vst [vmem:[#allocation5 + $0x2a0] sm:$0x3] %v2628_v11  ;;  %2831 = vmatpush.msra.mxu3 %v2757_v29  ;;  %v2759_v3 = vld [vmem:[#allocation5 + $0x2a8] sm:$0xff] }
 0x58f   : > { %2492 = vst [vmem:[#allocation5 + $0x220] sm:$0x3] %v2484_v27  ;;  %2871 = vmatpush.msrb.mxu1 %v2759_v3  ;;  %2812 = vmatpush.msra.mxu2 %v4469_v47  ;;  %v2725_v47 = vld [vmem:[#allocation5 + $0x198] sm:$0xff] }
 0x590   : > { %2832 = vmatpush.msra.mxu3 %v4464_v45  ;;  %v2708_v45 = vld [vmem:[#allocation5 + $0x110] sm:$0xff] }
 0x591   : > { %2872 = vmatpush.msrb.mxu1 %v2627_v20  ;;  %2813 = vmatpush.msra.mxu2 %v2740_v2 }
 0x592   : > { %2833 = vmatpush.msra.mxu3 %v2741_v13 }
 0x593   : > { %2814 = vmatpush.msra.mxu2 %v4480_v42  ;;  %v2709_v42 = vld [vmem:[#allocation5 + $0x118] sm:$0xff] }
 0x594   : > { %v2481_v10 = vpop.permute.xlu1 %2480  ;;  %v2651_v36 = vpop.permute.xlu2 %2650  ;;  %2834 = vmatpush.msra.mxu3 %v4483_v37 }
 0x595   : > { %v2485_v4 = vsel %vm514_vm5, %v2479_v32, %v2481_v10  ;;  %v4574_v63 = vpop.permute.xlu0 %2334  ;;  %2815 = vmatpush.msra.mxu2 %v2724_v30  ;;  %v2758_v17 = vld [vmem:[#allocation5 + $0x2a0] sm:$0xff] }
 0x596   : > { %2493 = vst [vmem:[#allocation5 + $0x228] sm:$0x3] %v2485_v4  ;;  %2835 = vmatpush.msra.mxu3 %v2725_v47  ;;  %2851 = vmatpush.msrb.mxu0 %v2758_v17  ;;  %v2742_v37 = vld [vmem:[#allocation5 + $0x220] sm:$0xff] }
 0x597   : > { %2816 = vmatpush.msra.mxu2 %v4510_v38 }
 0x598   : > { %2836 = vmatpush.msra.mxu3 %v4513_v40  ;;  %2852 = vmatpush.msrb.mxu0 %v4546_v35 }
 0x599   : > { %2817 = vmatpush.msra.mxu2 %v2708_v45 }
 0x59a   : > { %2837 = vmatpush.msra.mxu3 %v2709_v42  ;;  %2853 = vmatpush.msrb.mxu0 %v2742_v37 }
 0x59b   : > { %2818 = vmatpush.msra.mxu2 %v4496_v46 }
 0x59c   : > { %v2337_v24 = vpop.permute.xlu1 %2336  ;;  %2838 = vmatpush.msra.mxu3 %v4499_v25  ;;  %2854 = vmatpush.msrb.mxu0 %v4529_v9 }
 0x59d   : > { %v2341_v38 = vsel %vm441_vm7, %v4574_v63, %v2337_v24  ;;  %v2363_v40 = vpop.permute.xlu2 %2362  ;;  %v2655_v8 = vpop.permute.xlu0 %2654  ;;  %2819 = vmatpush.msra.mxu2 %v2692_v18  ;;  %v2743_v35 = vld [vmem:[#allocation5 + $0x228] sm:$0xff] }
 0x59e   : > { %2349 = vst [vmem:[#allocation5 + $0x1a8] sm:$0x3] %v2341_v38  ;;  %2839 = vmatpush.msra.mxu3 %v2693_v15  ;;  %2873 = vmatpush.msrb.mxu1 %v2743_v35 }
 0x59f   : > { %2820 = vmatpush.msra.mxu2 %v4311_v16 }
 0x5a0   : > { %2840 = vmatpush.msra.mxu3 %v4306_v49  ;;  %2874 = vmatpush.msrb.mxu1 %v4523_v33 }
 0x5a1   : > { %2821 = vmatpush.msra.mxu2 %v2676_v61 }
 0x5a2   : > { %2841 = vmatpush.msra.mxu3 %v2677_v54  ;;  %3236 = vmatmul.msk.f32.vlgmr.msra.gmra.mxu2 %vm1752_vm14, %v4614_v1 }
 0x5a3   : > { %3237 = vmatmul.msk.f32.vlgmr.msra.gmra.mxu3 %vm1752_vm14, %v4614_v1 }
 0x5a4   : > { %v2511_v46 = vpop.permute.xlu1 %2510 }
 0x5a5   : > { %v2653_v25 = vpop.permute.xlu2 %2652  ;;  %v2219_v9 = vpop.permute.xlu0 %2218  ;;  %v2727_v20 = vld [vmem:[#allocation5 + $0x1a8] sm:$0xff] }
 0x5a6   : > { %v2662_v50 = vsel %vm587_vm4, %v2651_v36, %v2653_v25  ;;  %v2663_v39 = vsel %vm587_vm4, %v2653_v25, %v2655_v8  ;;  %2875 = vmatpush.msrb.mxu1 %v2727_v20  ;;  %v2695_v20 = vld [vmem:[#allocation5 + $0xa8] sm:$0xff] }
 0x5ac   : > { %v2507_v53 = vpop.permute.xlu1 %2506 }
 0x5ad   : > { %v2513_v52 = vpop.permute.xlu2 %2512  ;;  %v2509_v43 = vpop.permute.xlu0 %2508 }
 0x5ae   : > { %v2518_v55 = vsel %vm514_vm5, %v2507_v53, %v2509_v43  ;;  %v2519_v16 = vsel %vm514_vm5, %v2509_v43, %v2511_v46  ;;  %v2679_v53 = vld [vmem:[#allocation5 + $0x28] sm:$0xff]  ;;  %v2694_v43 = vld [vmem:[#allocation5 + $0xa0] sm:$0xff] }
 0x5b4   : > { %v2367_v14 = vpop.permute.xlu1 %2366 }
 0x5b5   : > { %v2369_v49 = vpop.permute.xlu2 %2368  ;;  %v2365_v48 = vpop.permute.xlu0 %2364 }
 0x5b6   : > { %v4592_v33 = vsel %vm441_vm7, %v2363_v40, %v2365_v48  ;;  %v4595_v56 = vsel %vm441_vm7, %v2365_v48, %v2367_v14 }
 0x5b7   : > { %2382 = vst [vmem:[#allocation5 + $0x170] sm:$0xff] %v4592_v33 }
 0x5b8   : > { %2383 = vst [vmem:[#allocation5 + $0x178] sm:$0xff] %v4595_v56 }
 0x5bc   : > { %v2223_v19 = vpop.permute.xlu1 %2222 }
 0x5bd   : > { %v4599_v28 = vpop.permute.xlu2 %2224  ;;  %v2221_v6 = vpop.permute.xlu0 %2220 }
 0x5be   : > { %v4602_v44 = vsel %vm368_vm6, %v2219_v9, %v2221_v6  ;;  %v4605_v21 = vsel %vm368_vm6, %v2221_v6, %v2223_v19 }
 0x5bf   : > { %2238 = vst [vmem:[#allocation5 + $0xf0] sm:$0xff] %v4602_v44 }
 0x5c0   : > { %2239 = vst [vmem:[#allocation5 + $0xf8] sm:$0xff] %v4605_v21 }
 0x5c4   : > { %v2661_v62 = vpop.permute.xlu1 %2660 }
 0x5c5   : > { %v2371_v23 = vpop.permute.xlu2 %2370  ;;  %v2373_v59 = vpop.permute.xlu0 %2372 }
 0x5c6   : > { %v2376_v34 = vsel %vm441_vm7, %v2369_v49, %v2371_v23  ;;  %v2377_v58 = vsel %vm441_vm7, %v2371_v23, %v2373_v59 }
 0x5c7   : > { %2384 = vst [vmem:[#allocation5 + $0x1b0] sm:$0x3] %v2376_v34 }
 0x5c8   : > { %2385 = vst [vmem:[#allocation5 + $0x1b8] sm:$0x3] %v2377_v58 }
 0x5cc   : > { %v2657_v12 = vpop.permute.xlu1 %2656 }
 0x5cd   : > { %v2331_v22 = vpop.permute.xlu2 %2330  ;;  %v2659_v41 = vpop.permute.xlu0 %2658 }
 0x5ce   : > { %v2339_v26 = vsel %vm441_vm7, %v4520_v51, %v2331_v22  ;;  %v2664_v32 = vsel %vm587_vm4, %v2657_v12, %v2659_v41  ;;  %v2665_v7 = vsel %vm587_vm4, %v2659_v41, %v2661_v62  ;;  %v2728_v17 = vld [vmem:[#allocation5 + $0x1b0] sm:$0xff] }
 0x5cf   : > { %2347 = vst [vmem:[#allocation5 + $0x168] sm:$0xff] %v2339_v26  ;;  %2876 = vmatpush.msrb.mxu1 %v2339_v26  ;;  %v2729_v45 = vld [vmem:[#allocation5 + $0x1b8] sm:$0xff] }
 0x5d0   : > { %2672 = vst [vmem:[#allocation5 + $0x2b0] sm:$0x3] %v2664_v32 }
 0x5d1   : > { %2673 = vst [vmem:[#allocation5 + $0x2b8] sm:$0x3] %v2665_v7 }
 0x5d4   : > { %v2517_v11 = vpop.permute.xlu1 %2516 }
 0x5d5   : > { %v2515_v27 = vpop.permute.xlu0 %2514  ;;  %v2193_v42 = vpop.permute.xlu2 %2192 }
 0x5d6   : > { %v2520_v29 = vsel %vm514_vm5, %v2513_v52, %v2515_v27  ;;  %v2521_v3 = vsel %vm514_vm5, %v2515_v27, %v2517_v11  ;;  %v2680_v52 = vld [vmem:[#allocation5 + $0x30] sm:$0xff] }
 0x5d7   : > { %2528 = vst [vmem:[#allocation5 + $0x230] sm:$0x3] %v2520_v29  ;;  %v2760_v2 = vld [vmem:[#allocation5 + $0x2b0] sm:$0xff] }
 0x5d8   : > { %2529 = vst [vmem:[#allocation5 + $0x238] sm:$0x3] %v2521_v3  ;;  %2891 = vmatpush.msrb.mxu2 %v2760_v2  ;;  %v2761_v13 = vld [vmem:[#allocation5 + $0x2b8] sm:$0xff] }
 0x5d9   : > { %2911 = vmatpush.msrb.mxu3 %v2761_v13 }
 0x5da   : > { %2892 = vmatpush.msrb.mxu2 %v2662_v50  ;;  %v2696_v50 = vld [vmem:[#allocation5 + $0xb0] sm:$0xff] }
 0x5db   : > { %2912 = vmatpush.msrb.mxu3 %v2663_v39  ;;  %v2687_v39 = vld [vmem:[#allocation5 + $0x68] sm:$0xff] }
 0x5dc   : > { %v2229_v10 = vpop.permute.xlu1 %2228 }
 0x5dd   : > { %v2333_v36 = vpop.permute.xlu0 %2332 }
 0x5de   : > { %v2340_v30 = vsel %vm441_vm7, %v2333_v36, %v4574_v63  ;;  %v2744_v4 = vld [vmem:[#allocation5 + $0x230] sm:$0xff] }
 0x5df   : > { %2348 = vst [vmem:[#allocation5 + $0x1a0] sm:$0x3] %v2340_v30  ;;  %2893 = vmatpush.msrb.mxu2 %v2744_v4  ;;  %v2745_v47 = vld [vmem:[#allocation5 + $0x238] sm:$0xff] }
 0x5e0   : > { %2913 = vmatpush.msrb.mxu3 %v2745_v47 }
 0x5e1   : > { %2894 = vmatpush.msrb.mxu2 %v2518_v55  ;;  %v2678_v55 = vld [vmem:[#allocation5 + $0x20] sm:$0xff] }
 0x5e2   : > { %2914 = vmatpush.msrb.mxu3 %v2519_v16 }
 0x5e3   : > { %2895 = vmatpush.msrb.mxu2 %v2728_v17 }
 0x5e4   : > { %2915 = vmatpush.msrb.mxu3 %v2729_v45  ;;  %v2191_v37 = vpop.permute.xlu1 %2190 }
 0x5e5   : > { %v2196_v24 = vsel %vm368_vm6, %v4558_v60, %v2191_v37  ;;  %v2197_v18 = vsel %vm368_vm6, %v2191_v37, %v2193_v42  ;;  %2896 = vmatpush.msrb.mxu2 %v4592_v33  ;;  %v2227_v63 = vpop.permute.xlu0 %2226 }
 0x5e6   : > { %2204 = vst [vmem:[#allocation5 + $0x120] sm:$0x3] %v2196_v24  ;;  %2916 = vmatpush.msrb.mxu3 %v4595_v56  ;;  %v2232_v38 = vsel %vm368_vm6, %v4599_v28, %v2227_v63  ;;  %v2233_v40 = vsel %vm368_vm6, %v2227_v63, %v2229_v10  ;;  %v2726_v8 = vld [vmem:[#allocation5 + $0x1a0] sm:$0xff] }
 0x5e7   : > { %2205 = vst [vmem:[#allocation5 + $0x128] sm:$0x3] %v2197_v18  ;;  %2855 = vmatpush.msrb.mxu0 %v2726_v8 }
 0x5e8   : > { %2240 = vst [vmem:[#allocation5 + $0x130] sm:$0x3] %v2232_v38 }
 0x5e9   : > { %2241 = vst [vmem:[#allocation5 + $0x138] sm:$0x3] %v2233_v40 }
 0x5ed   : > { %v2327_v15 = vpop.permute.xlu0 %2326  ;;  %v2710_v9 = vld [vmem:[#allocation5 + $0x120] sm:$0xff] }
 0x5ee   : > { %v2338_v60 = vsel %vm441_vm7, %v2327_v15, %v4520_v51  ;;  %v2711_v35 = vld [vmem:[#allocation5 + $0x128] sm:$0xff]  ;;  %v2697_v51 = vld [vmem:[#allocation5 + $0xb8] sm:$0xff] }
 0x5ef   : > { %2346 = vst [vmem:[#allocation5 + $0x160] sm:$0xff] %v2338_v60  ;;  %2877 = vmatpush.msrb.mxu1 %v2711_v35  ;;  %v2712_v46 = vld [vmem:[#allocation5 + $0x130] sm:$0xff]  ;;  %2856 = vmatpush.msrb.mxu0 %v2338_v60 }
 0x5f0   : > { %2897 = vmatpush.msrb.mxu2 %v2712_v46  ;;  %v2713_v25 = vld [vmem:[#allocation5 + $0x138] sm:$0xff] }
 0x5f1   : > { %2917 = vmatpush.msrb.mxu3 %v2713_v25  ;;  %2878 = vmatpush.msrb.mxu1 %v4538_v0  ;;  %v2681_v0 = vld [vmem:[#allocation5 + $0x38] sm:$0xff] }
 0x5f2   : > { %2898 = vmatpush.msrb.mxu2 %v4602_v44  ;;  %2857 = vmatpush.msrb.mxu0 %v2710_v9 }
 0x5f3   : > { %2918 = vmatpush.msrb.mxu3 %v4605_v21  ;;  %2879 = vmatpush.msrb.mxu1 %v2695_v20 }
 0x5f4   : > { %2899 = vmatpush.msrb.mxu2 %v2696_v50  ;;  %2858 = vmatpush.msrb.mxu0 %v4535_v5  ;;  %v2686_v5 = vld [vmem:[#allocation5 + $0x60] sm:$0xff] }
 0x5f5   : > { %2919 = vmatpush.msrb.mxu3 %v2697_v51  ;;  %2880 = vmatpush.msrb.mxu1 %v2687_v39 }
 0x5f6   : > { %2900 = vmatpush.msrb.mxu2 %v4382_v31  ;;  %2859 = vmatpush.msrb.mxu0 %v2694_v43 }
 0x5f7   : > { %2920 = vmatpush.msrb.mxu3 %v4375_v57  ;;  %2881 = vmatpush.msrb.mxu1 %v2679_v53 }
 0x5f8   : > { %2901 = vmatpush.msrb.mxu2 %v2680_v52  ;;  %3239 = vmatmul.msk.f32.vlgmr.msrb.gmra.mxu1 %vm1752_vm14, %v4614_v1 }
 0x5f9   : > { %2921 = vmatpush.msrb.mxu3 %v2681_v0  ;;  %3240 = vmatmul.msk.f32.vlgmr.msrb.gmra.mxu2 %vm1752_vm14, %v4614_v1 }
 0x5fa   : > { %3241 = vmatmul.msk.f32.vlgmr.msrb.gmra.mxu3 %vm1752_vm14, %v4614_v1  ;;  %2860 = vmatpush.msrb.mxu0 %v2686_v5 }
 0x5fc   : > { %2861 = vmatpush.msrb.mxu0 %v2678_v55  ;;  %v3084_v55 = vlaneseq }
 0x5fd   : > { %3238 = vmatmul.msk.f32.vlgmr.msrb.gmra.mxu0 %vm1752_vm14, %v4614_v1 }
 0x604   : > { %v2803_v57 = vpop.f32.mrf.mxu1  ;;  %v2783_v16 = vpop.f32.mrf.mxu0 }
 0x605   : > { %v3243_v31 = vmul.f32 -1.442695, %v2803_v57  ;;  %v3242_v14 = vmul.f32 -1.442695, %v2783_v16 }
 0x607   : > { %3307 = vpow2.f32 %v3243_v31 }
 0x608   : > { %3309 = vpow2.f32 %v3242_v14 }
 0x60d   : > { %v3308_v61 = vpop.eup %3307 }
 0x60e   : > { %v2951_v54 = vadd.f32 1.0, %v3308_v61  ;;  %v3310_v19 = vpop.eup %3309 }
 0x60f   : > { %v2950_v28 = vadd.f32 1.0, %v3310_v19 }
 0x610   : > { %v2982_v59 = vand.u32 2147483647, %v2951_v54  ;;  %v2984_v34 = vand.u32 2147483648, %v2951_v54  ;;  %vm2978_vm15 = vweird.f32 %v2951_v54 }
 0x611   : > { %vm2963_vm2 = vweird.f32 %v2950_v28  ;;  %v2967_v11 = vand.u32 2147483647, %v2950_v28  ;;  %v2969_v27 = vand.u32 2147483648, %v2950_v28 }
 0x612   : > { %vm4656_vm1 = vcmp.eq.f32.partialorder %v2982_v59, 8.507059e+37  ;;  %v2985_v41 = vor.u32 1.1754944e-38, %v2984_v34 }
 0x613   : > { %vm4671_vm10 = vcmp.eq.f32.partialorder %v2967_v11, 8.507059e+37  ;;  %v2970_v60 = vor.u32 1.1754944e-38, %v2969_v27 }
 0x625   : > { %v2823_v48 = vpop.f32.mrf.mxu2 }
 0x626   : > { %v2843_v49 = vpop.f32.mrf.mxu3  ;;  %v3244_v56 = vmul.f32 -1.442695, %v2823_v48 }
 0x627   : > { %v3245_v33 = vmul.f32 -1.442695, %v2843_v49 }
 0x629   : > { %3311 = vpow2.f32 %v3245_v33 }
 0x62a   : > { %3313 = vpow2.f32 %v3244_v56 }
 0x62b   : > { %3315 = vrcp.f32 %v2951_v54 }
 0x62c   : > { %3317 = vrcp.f32 %v2950_v28 }
 0x62f   : > { %v3312_v6 = vpop.eup %3311 }
 0x630   : > { %v3314_v44 = vpop.eup %3313  ;;  %v2953_v21 = vadd.f32 1.0, %v3312_v6 }
 0x631   : > { %v2952_v62 = vadd.f32 1.0, %v3314_v44  ;;  %v3316_v23 = vpop.eup %3315 }
 0x632   : > { %3319 = vrcp.f32 %v2953_v21  ;;  %v2974_v58 = vmul.f32 %v3316_v23, %v2951_v54  ;;  %v3318_v1 = vpop.eup %3317  ;;  %vm2979_vm0 = vweird.f32 %v3316_v23  ;;  %vm3008_vm3 = vweird.f32 %v2953_v21 }
 0x633   : > { %3321 = vrcp.f32 %v2952_v62  ;;  %v2959_v26 = vmul.f32 %v3318_v1, %v2950_v28  ;;  %vm4660_vm4 = vmor %vm2978_vm15, %vm2979_vm0  ;;  %v3012_v13 = vand.u32 2147483647, %v2953_v21  ;;  %vm2964_vm5 = vweird.f32 %v3318_v1 }
 0x634   : > { %v2975_v12 = vsub.f32 1.0, %v2974_v58  ;;  %v3014_v30 = vand.u32 2147483648, %v2953_v21  ;;  %vm2993_vm6 = vweird.f32 %v2952_v62  ;;  %v2999_v45 = vand.u32 2147483648, %v2952_v62  ;;  %vm4667_vm8 = vmor %vm2963_vm2, %vm2964_vm5 }
 0x635   : > { %v2960_v10 = vsub.f32 1.0, %v2959_v26  ;;  %v2997_v18 = vand.u32 2147483647, %v2952_v62  ;;  %vm3013_vm12 = vcmp.eq.f32.partialorder %v3012_v13, 8.507059e+37  ;;  %vm3081_vm15 = vcmask 1040384  }
 0x636   : > { %v2976_v7 = vmul.f32 %v3316_v23, %v2975_v12  ;;  %v3015_v15 = vor.u32 1.1754944e-38, %v3014_v30  ;;  %v3000_v9 = vor.u32 1.1754944e-38, %v2999_v45  ;;  %vm4688_vm0 = vcmp.lt.s32.totalorder %v3084_v55, 256 }
 0x637   : > { %v2961_v17 = vmul.f32 %v3318_v1, %v2960_v10  ;;  %vm2998_vm14 = vcmp.eq.f32.partialorder %v2997_v18, 8.507059e+37 }
 0x638   : > { %v3320_v32 = vpop.eup %3319  ;;  %v2977_v36 = vadd.f32 %v3316_v23, %v2976_v7 }
 0x639   : > { %v3322_v29 = vpop.eup %3321  ;;  %v3004_v2 = vmul.f32 %v3320_v32, %v2953_v21  ;;  %vm3009_vm7 = vweird.f32 %v3320_v32  ;;  %v2962_v38 = vadd.f32 %v3318_v1, %v2961_v17 }
 0x63a   : > { %v2989_v4 = vmul.f32 %v3322_v29, %v2952_v62  ;;  %v2981_v42 = vsel %vm4660_vm4, %v3316_v23, %v2977_v36  ;;  %vm2994_vm9 = vweird.f32 %v3322_v29  ;;  %vm3010_vm11 = vmor %vm3008_vm3, %vm3009_vm7 }
 0x63b   : > { %v3005_v47 = vsub.f32 1.0, %v3004_v2  ;;  %v2986_v8 = vsel %vm4656_vm1, %v2985_v41, %v2981_v42  ;;  %v2966_v25 = vsel %vm4667_vm8, %v3318_v1, %v2962_v38  ;;  %vm2995_vm13 = vmor %vm2993_vm6, %vm2994_vm9 }
 0x63c   : > { %v2990_v24 = vsub.f32 1.0, %v2989_v4  ;;  %v3080_v50 = vrot.slane %v2986_v8, 7  ;;  %v2971_v53 = vsel %vm4671_vm10, %v2970_v60, %v2966_v25 }
 0x63d   : > { %v3006_v63 = vmul.f32 %v3320_v32, %v3005_v47 }
 0x63e   : > { %v2991_v35 = vmul.f32 %v3322_v29, %v2990_v24  ;;  %v3082_v5 = vsel %vm3081_vm15, %v2971_v53, %v3080_v50 }
 0x63f   : > { %v3007_v46 = vadd.f32 %v3320_v32, %v3006_v63  ;;  %3088 = vst.msk [vmem:[%s4692_s7] sm:$0x3] %vm4688_vm0, %v3082_v5 }
 0x640   : > { %v2992_v20 = vadd.f32 %v3322_v29, %v2991_v35 }
 0x641   : > { %v3011_v51 = vsel %vm3010_vm11, %v3320_v32, %v3007_v46 }
 0x642   : > { %v3016_v39 = vsel %vm3013_vm12, %v3015_v15, %v3011_v51  ;;  %v2996_v52 = vsel %vm2995_vm13, %v3322_v29, %v2992_v20 }
 0x643   : > { %v3091_v43 = vrot.slane %v3016_v39, 7  ;;  %v3001_v0 = vsel %vm2998_vm14, %v3000_v9, %v2996_v52 }
 0x645   : > { %v3092_v57 = vsel %vm3081_vm15, %v3001_v0, %v3091_v43 }
 0x646   : > { %3250 = vst.msk [vmem:[%s4692_s7 + $0x2] sm:$0x3] %vm4688_vm0, %v3092_v57 }
 0x675   : > { %v2883_v16 = vpop.f32.mrf.mxu1 }
 0x676   : > { %v3247_v14 = vmul.f32 -1.442695, %v2883_v16 }
 0x678   : > { %3323 = vpow2.f32 %v3247_v14 }
 0x67a   : > { %v2863_v49 = vpop.f32.mrf.mxu0 }
 0x67b   : > { %v3246_v48 = vmul.f32 -1.442695, %v2863_v49 }
 0x67c   : > { %v2903_v33 = vpop.f32.mrf.mxu2 }
 0x67d   : > { %v3248_v56 = vmul.f32 -1.442695, %v2903_v33  ;;  %v2923_v61 = vpop.f32.mrf.mxu3  ;;  %3325 = vpow2.f32 %v3246_v48 }
 0x67e   : > { %v3324_v54 = vpop.eup %3323  ;;  %v3249_v19 = vmul.f32 -1.442695, %v2923_v61 }
 0x67f   : > { %v2955_v28 = vadd.f32 1.0, %v3324_v54  ;;  %3327 = vpow2.f32 %v3248_v56 }
 0x680   : > { %3329 = vpow2.f32 %v3249_v19 }
 0x681   : > { %3331 = vrcp.f32 %v2955_v28  ;;  %v3042_v12 = vand.u32 2147483647, %v2955_v28  ;;  %v3044_v22 = vand.u32 2147483648, %v2955_v28  ;;  %vm3038_vm1 = vweird.f32 %v2955_v28 }
 0x683   : > { %v3326_v6 = vpop.eup %3325  ;;  %vm3043_vm3 = vcmp.eq.f32.partialorder %v3042_v12, 8.507059e+37  ;;  %v3045_v29 = vor.u32 1.1754944e-38, %v3044_v22 }
 0x684   : > { %v2954_v44 = vadd.f32 1.0, %v3326_v6 }
 0x685   : > { %v3328_v21 = vpop.eup %3327 }
 0x686   : > { %v3330_v62 = vpop.eup %3329  ;;  %v4700_v23 = vadd.f32 1.0, %v3328_v21  ;;  %3333 = vrcp.f32 %v2954_v44  ;;  %vm3023_vm5 = vweird.f32 %v2954_v44  ;;  %v3027_v36 = vand.u32 2147483647, %v2954_v44 }
 0x687   : > { %v3332_v59 = vpop.eup %3331  ;;  %v2957_v34 = vadd.f32 1.0, %v3330_v62  ;;  %v3029_v30 = vand.u32 2147483648, %v2954_v44 }
 0x688   : > { %v3034_v58 = vmul.f32 %v3332_v59, %v2955_v28  ;;  %3335 = vrcp.f32 %v4700_v23  ;;  %vm3039_vm2 = vweird.f32 %v3332_v59  ;;  %vm3053_vm7 = vweird.f32 %v4700_v23 }
 0x689   : > { %3337 = vrcp.f32 %v2957_v34  ;;  %vm3040_vm4 = vmor %vm3038_vm1, %vm3039_vm2  ;;  %v3074_v42 = vand.u32 2147483648, %v2957_v34  ;;  %v3072_v38 = vand.u32 2147483647, %v2957_v34  ;;  %v3030_v40 = vor.u32 1.1754944e-38, %v3029_v30 }
 0x68a   : > { %v3035_v1 = vsub.f32 1.0, %v3034_v58  ;;  %v3059_v15 = vand.u32 2147483648, %v4700_v23  ;;  %vm3028_vm11 = vcmp.eq.f32.partialorder %v3027_v36, 8.507059e+37  ;;  %v3057_v46 = vand.u32 2147483647, %v4700_v23 }
 0x68b   : > { %vm3068_vm13 = vweird.f32 %v2957_v34  ;;  %v3075_v20 = vor.u32 1.1754944e-38, %v3074_v42  ;;  %vm3073_vm1 = vcmp.eq.f32.partialorder %v3072_v38, 8.507059e+37 }
 0x68c   : > { %v3334_v41 = vpop.eup %3333  ;;  %v3036_v26 = vmul.f32 %v3332_v59, %v3035_v1  ;;  %v3060_v53 = vor.u32 1.1754944e-38, %v3059_v15  ;;  %vm3058_vm2 = vcmp.eq.f32.partialorder %v3057_v46, 8.507059e+37 }
 0x68d   : > { %v3019_v32 = vmul.f32 %v3334_v41, %v2954_v44  ;;  %vm3024_vm6 = vweird.f32 %v3334_v41 }
 0x68e   : > { %v3336_v7 = vpop.eup %3335  ;;  %v3037_v11 = vadd.f32 %v3332_v59, %v3036_v26  ;;  %vm3025_vm10 = vmor %vm3023_vm5, %vm3024_vm6 }
 0x68f   : > { %v3338_v27 = vpop.eup %3337  ;;  %v3049_v3 = vmul.f32 %v3336_v7, %v4700_v23  ;;  %v3020_v2 = vsub.f32 1.0, %v3019_v32  ;;  %vm3054_vm8 = vweird.f32 %v3336_v7 }
 0x690   : > { %v3041_v13 = vsel %vm3040_vm4, %v3332_v59, %v3037_v11  ;;  %v3064_v10 = vmul.f32 %v3338_v27, %v2957_v34  ;;  %vm3069_vm9 = vweird.f32 %v3338_v27  ;;  %vm4713_vm12 = vmor %vm3053_vm7, %vm3054_vm8 }
 0x691   : > { %v3046_v4 = vsel %vm3043_vm3, %v3045_v29, %v3041_v13  ;;  %v3050_v47 = vsub.f32 1.0, %v3049_v3  ;;  %v3021_v17 = vmul.f32 %v3334_v41, %v3020_v2  ;;  %vm3070_vm14 = vmor %vm3068_vm13, %vm3069_vm9 }
 0x692   : > { %v3065_v45 = vsub.f32 1.0, %v3064_v10  ;;  %v3098_v37 = vrot.slane %v3046_v4, 7 }
 0x693   : > { %v3051_v24 = vmul.f32 %v3336_v7, %v3050_v47  ;;  %v3022_v18 = vadd.f32 %v3334_v41, %v3021_v17 }
 0x694   : > { %v3066_v63 = vmul.f32 %v3338_v27, %v3065_v45 }
 0x695   : > { %v3052_v8 = vadd.f32 %v3336_v7, %v3051_v24  ;;  %v3026_v60 = vsel %vm3025_vm10, %v3334_v41, %v3022_v18 }
 0x696   : > { %v3067_v25 = vadd.f32 %v3338_v27, %v3066_v63  ;;  %v3031_v9 = vsel %vm3028_vm11, %v3030_v40, %v3026_v60 }
 0x697   : > { %v3099_v50 = vsel %vm3081_vm15, %v3031_v9, %v3098_v37  ;;  %v3056_v51 = vsel %vm4713_vm12, %v3336_v7, %v3052_v8 }
 0x698   : > { %v3071_v39 = vsel %vm3070_vm14, %v3338_v27, %v3067_v25  ;;  %3251 = vst.msk [vmem:[%s4692_s7 + $0x4] sm:$0x3] %vm4688_vm0, %v3099_v50  ;;  %v3061_v0 = vsel %vm3058_vm2, %v3060_v53, %v3056_v51 }
 0x699   : > { %v3076_v52 = vsel %vm3073_vm1, %v3075_v20, %v3071_v39 }
 0x69a   : > { %v3105_v43 = vrot.slane %v3076_v52, 7 }
 0x69c   : > { %v3106_v5 = vsel %vm3081_vm15, %v3061_v0, %v3105_v43 }
 0x69d   : > { %3252 = vst.msk [vmem:[%s4692_s7 + $0x6] sm:$0x3] %vm4688_vm0, %v3106_v5 }
 0x69e   : > { %3366 = shalt.err (!%p3363_p3)
}
 0x69f   : > { %s3410_s30 = smov 32  }
 0x6a0   : > { %3260 = dma.vmem_to_hbm [thread:$0]  (%p3474_p5), %s3124_s11, 128, %s3126_s12, %s3111_s13, %s3410_s30, %s3410_s30, %s3404_s6  }
 0x6a1 PF: > { %p3266_p4 = scmp.ge.s32.totalorder %s3401_s18, 2  ;;  %s3140_s5 = sand.u32 1, %s3389_s15  }
 0x6a2   : > { %s3141_s7 = scalar_lea.sflag [#allocation7], %s3140_s5 }
 0x6a3   : > { %p3263_p7 = pnand %p3266_p4, %p3478_p6 }
 0x6a5   : > { %p3264_p8 = pneg %p3263_p7 }
 0x6a7   : > { %3384 = dma.done.wait (%p3264_p8), %s3141_s7, 128  }
 0x6a8   : > { %3386 = vsyncadd (%p3264_p8), %s3141_s7, 4294967168  ;;  %p14_p9 = scmp.ge.s32.totalorder %s3461_s21, 4   ;;  %s4778_s15 = smov %s3393_s16 }
 0x6a9   : > { %s4779_s16 = smov %s3397_s17  ;;  %s4780_s17 = smov %s3472_s24 }
 0x6aa   : > { %s4781_s18 = smov %s3461_s21  ;;  %16 = sbr.rel (!%p14_p9) target bundleno = 3 (0x3), region = 91 }
 0x6af   :  { %3147 = vsyncpa [#allocation7], 1 }
 0x6b0   :  { %3149 = vsyncpa [#allocation7 + $0x1], 1 }

</bundles_post_ra>
